<compile_context>
chip_gen: v6e
topology: v6e:2x2x1
jax: 0.10.0
libtpu: 0.0.40
codegen_flags: <defaults>
</compile_context>

<pallas_src>
import functools

import jax
import jax.numpy as jnp
from jax.experimental import pallas as pl
from jax.experimental.pallas import tpu as pltpu


# ----------------------------------------------------------------------------
# Per-generation defaults: scoped VMEM limit + tile sizes.
# ----------------------------------------------------------------------------
def _hw_config():
    vmem_cap = None
    try:
        vmem_cap = int(pltpu.get_tpu_info().vmem_capacity_bytes)
    except Exception:
        try:
            kind = jax.devices()[0].device_kind.lower()
            if "v5" in kind or "v6" in kind:
                vmem_cap = 128 * 1024 * 1024
        except Exception:
            pass
    if vmem_cap is not None and vmem_cap > 64 * 1024 * 1024:
        # v5e / v6e: 128 MiB physical VMEM -> bigger tiles, higher scoped limit.
        return {"vmem_limit": 96 * 1024 * 1024,
                "reduce_tile": 1024, "branch_tile": 1024}
    # v7x-class (64 MiB physical VMEM) or unknown: conservative.  The chunked
    # branch kernel keeps per-step VMEM ~independent of P, so 512 tiles fit.
    return {"vmem_limit": 48 * 1024 * 1024,
            "reduce_tile": 512, "branch_tile": 512}


# ----------------------------------------------------------------------------
# Optional single-buffering of grid-invariant operands (probed once so the
# script still runs on JAX versions without BlockSpec.pipeline_mode support).
# ----------------------------------------------------------------------------
_SINGLE_BUFFER_SUPPORTED = None


def _probe_single_buffer():
    global _SINGLE_BUFFER_SUPPORTED
    if _SINGLE_BUFFER_SUPPORTED is not None:
        return _SINGLE_BUFFER_SUPPORTED
    try:
        with jax.ensure_compile_time_eval():
            def _k(x_ref, o_ref):
                o_ref[...] = x_ref[...] + 1.0
            fn = pl.pallas_call(
                _k,
                out_shape=jax.ShapeDtypeStruct((8, 128), jnp.float32),
                grid=(2,),
                in_specs=[pl.BlockSpec((8, 128), lambda i: (0, 0),
                                       pipeline_mode=pl.Buffered(1))],
                out_specs=pl.BlockSpec((8, 128), lambda i: (0, 0)),
            )
            jax.block_until_ready(fn(jnp.zeros((8, 128), jnp.float32)))
        _SINGLE_BUFFER_SUPPORTED = True
    except Exception:
        _SINGLE_BUFFER_SUPPORTED = False
    return _SINGLE_BUFFER_SUPPORTED


def _spec(block_shape, index_map, *, single_buffer=False):
    """BlockSpec; grid-invariant operands get single-buffering when supported."""
    if single_buffer and _probe_single_buffer():
        return pl.BlockSpec(block_shape, index_map, pipeline_mode=pl.Buffered(1))
    return pl.BlockSpec(block_shape, index_map)


# ----------------------------------------------------------------------------
# Pallas kernel 1: reduce conv = 1x1 Conv + folded BN + ReLU, channels-first.
#   out[b] = relu(Wf @ x[b] + bias)   with Wf = (W * bn_scale)^T   (Cm, Cin)
# Unpadded lane tiling: cdiv grid, boundary blocks handled by masked writes
# (matmul columns are independent, so OOB input garbage never contaminates
# valid output columns).  bf16 output halves the HBM traffic of this
# memory-bound op.
# ----------------------------------------------------------------------------
def _reduce_conv_kernel(x_ref, w_ref, b_ref, o_ref):
    x_bf = x_ref[0].astype(jnp.bfloat16)                       # (Cin, tile_n)
    y = jnp.dot(w_ref[...], x_bf,
                preferred_element_type=jnp.float32) + b_ref[...]
    o_ref[0] = jnp.maximum(y, 0.0).astype(o_ref.dtype)


def reduce_conv(x_cf, params, *, tile_n, vmem_limit, out_dtype=jnp.bfloat16):
    """x_cf: (B, Cin, N) -> (B, Cm, N) out_dtype."""
    b, cin, n = x_cf.shape
    cm = params["w_t"].shape[0]
    tile = n if n <= tile_n else tile_n                         # tile_n % 128 == 0
    return pl.pallas_call(
        _reduce_conv_kernel,
        out_shape=jax.ShapeDtypeStruct((b, cm, n), out_dtype),
        grid=(b, pl.cdiv(n, tile)),
        in_specs=[
            pl.BlockSpec((1, cin, tile), lambda i, j: (i, 0, j)),
            _spec((cm, cin), lambda i, j: (0, 0), single_buffer=True),
            _spec((cm, 1), lambda i, j: (0, 0), single_buffer=True),
        ],
        out_specs=pl.BlockSpec((1, cm, tile), lambda i, j: (i, 0, j)),
        compiler_params=pltpu.CompilerParams(
            dimension_semantics=("parallel", "parallel"),
            vmem_limit_bytes=vmem_limit),
    )(x_cf, params["w_t"], params["b"])


# ----------------------------------------------------------------------------
# Pallas kernel 2: fused ObjectContextBranch core, spatial-major (the PyTorch
# bmm orientation), P-chunked.  Per (batch i, q-tile j, chunk k), with the
# chunk schedule rotated so chunk k==0 is the q tile itself:
#   k==0 : t = relu(pooled_q @ W1 + b1)  cached in scratch;  acc = 0
#   every k: logits = t @ W2[:, chunk] + b2[chunk]
#            sim    = sigmoid(logits)                (tile_q, chunk)  -> stored
#            acc   += sim @ pooled[chunk]            (tile_q, Cm) f32 accumulate
#   last k : out = relu((acc / P) @ [Wip | -Wep] + [bip | bep + Wep^T.colsum/P])
# ----------------------------------------------------------------------------
def _branch_core_kernel(pooled_ref, w1_ref, b1_ref, w2_ref, b2_ref,
                        wpost_ref, bpost_ref, out_ref, sim_ref,
                        t_ref, acc_ref, *, inv_p):
    k = pl.program_id(2)
    n_k = pl.num_programs(2)

    @pl.when(k == 0)
    def _():
        # The rotated chunk at k==0 is exactly this q tile of pooled.
        t = jnp.dot(pooled_ref[0], w1_ref[...],
                    preferred_element_type=jnp.float32) + b1_ref[...]
        t_ref[...] = jnp.maximum(t, 0.0).astype(jnp.bfloat16)
        acc_ref[...] = jnp.zeros_like(acc_ref)

    logits = jnp.dot(t_ref[...], w2_ref[...],
                     preferred_element_type=jnp.float32) + b2_ref[...]
    sim = 1.0 / (1.0 + jnp.exp(-logits))             # exact sigmoid, (tq, chunk)
    # sim is already in the reference (spatial, channel) orientation.
    sim_ref[0] = sim.astype(sim_ref.dtype)

    # intra-context accumulation: acc[q, c] += sum_p sim[q, p] * pooled[p, c]
    acc_ref[...] += jnp.dot(sim.astype(jnp.bfloat16), pooled_ref[0],
                            preferred_element_type=jnp.float32)

    @pl.when(k == n_k - 1)
    def _():
        intra = (acc_ref[...] * inv_p).astype(jnp.bfloat16)
        y = jnp.dot(intra, wpost_ref[...],
                    preferred_element_type=jnp.float32) + bpost_ref[0]
        out_ref[0] = jnp.maximum(y, 0.0).astype(out_ref.dtype)


def branch_core(pooled, params, *, point_num, tile, vmem_limit,
                out_dtype=jnp.bfloat16, sim_dtype=jnp.bfloat16):
    """pooled: (B, P, Cm) f32 spatial-major.

    Returns out_cl (B, P, 2Cm) and sim (B, P, P) with sim[b, q, p] already in
    the reference orientation (no XLA transpose needed)."""
    b, p, cm = pooled.shape
    inv_p = 1.0 / point_num

    if p <= tile:
        blk, p_pad = p, p
    else:
        blk = tile                                              # multiple of 128
        p_pad = pl.cdiv(p, blk) * blk
    n = p_pad // blk

    w2, b2 = params["sim2"]["w"], params["sim2"]["b"]           # (Cm, P), (1, P)
    if p_pad != p:
        # Zero-pad the P axis; padded value rows are zero so they add nothing
        # to the intra accumulation, and padded sim rows/cols are masked on
        # write (they fall outside the unpadded output arrays).
        pooled = jnp.pad(pooled, ((0, 0), (0, p_pad - p), (0, 0)))
        w2 = jnp.pad(w2, ((0, 0), (0, p_pad - p)))
        b2 = jnp.pad(b2, ((0, 0), (0, p_pad - p)))

    # Fuse the two post convs: Wpost = [Wip | -Wep]; the per-batch bias absorbs
    # inter = colsum/P - intra, so the kernel never forms "inter" explicitly.
    w_ip, b_ip = params["intra_post"]["w"], params["intra_post"]["b"]
    w_ep, b_ep = params["inter_post"]["w"], params["inter_post"]["b"]
    col_sum = jnp.sum(pooled, axis=1)                           # (B, Cm) f32, exact
    b_ep_eff = b_ep + inv_p * (col_sum @ w_ep.astype(jnp.float32))   # (B, Cm)
    w_post = jnp.concatenate([w_ip, -w_ep], axis=1)             # (Cm, 2Cm) bf16
    b_post = jnp.concatenate(
        [jnp.broadcast_to(b_ip, (b, cm)), b_ep_eff], axis=1).reshape(b, 1, 2 * cm)

    pooled_bf = pooled.astype(jnp.bfloat16)

    out_cl, sim = pl.pallas_call(
        functools.partial(_branch_core_kernel, inv_p=inv_p),
        out_shape=(jax.ShapeDtypeStruct((b, p, 2 * cm), out_dtype),
                   jax.ShapeDtypeStruct((b, p, p), sim_dtype)),
        grid=(b, n, n),
        in_specs=[
            # pooled chunk, rotated so the k==0 chunk is this q tile
            pl.BlockSpec((1, blk, cm), lambda i, j, k: (i, (j + k) % n, 0)),
            _spec((cm, cm), lambda i, j, k: (0, 0), single_buffer=True),      # W1
            _spec((1, cm), lambda i, j, k: (0, 0), single_buffer=True),       # b1
            pl.BlockSpec((cm, blk), lambda i, j, k: (0, (j + k) % n)),        # W2
            pl.BlockSpec((1, blk), lambda i, j, k: (0, (j + k) % n)),         # b2
            _spec((cm, 2 * cm), lambda i, j, k: (0, 0), single_buffer=True),  # Wpost
            pl.BlockSpec((1, 1, 2 * cm), lambda i, j, k: (i, 0, 0)),          # bpost
        ],
        out_specs=(
            pl.BlockSpec((1, blk, 2 * cm), lambda i, j, k: (i, j, 0)),
            pl.BlockSpec((1, blk, blk), lambda i, j, k: (i, j, (j + k) % n)),
        ),
        scratch_shapes=[pltpu.VMEM((blk, cm), jnp.bfloat16),    # cached t
                        pltpu.VMEM((blk, cm), jnp.float32)],    # intra accumulator
        compiler_params=pltpu.CompilerParams(
            dimension_semantics=("parallel", "parallel", "arbitrary"),
            vmem_limit_bytes=vmem_limit),
    )(pooled_bf, params["sim1"]["w"], params["sim1"]["b"], w2, b2,
      w_post, b_post)
    return out_cl, sim


# ----------------------------------------------------------------------------
# Plain-JAX glue: exact adaptive avg pool & align_corners=True bilinear resize
# as separable matrices.
# TODO(synk): pooling / bilinear resize / final concat stay as XLA einsum glue.
# ----------------------------------------------------------------------------
def _adaptive_pool_matrix(out_size, in_size):
    i = jnp.arange(out_size)
    starts = (i * in_size) // out_size
    ends = ((i + 1) * in_size + out_size - 1) // out_size
    j = jnp.arange(in_size)
    mask = (j[None, :] >= starts[:, None]) & (j[None, :] < ends[:, None])
    return mask.astype(jnp.float32) / (ends - starts)[:, None].astype(jnp.float32)


def _bilinear_matrix(out_size, in_size):
    if out_size == 1:
        src = jnp.zeros((1,), jnp.float32)
    else:
        src = jnp.arange(out_size, dtype=jnp.float32) * (in_size - 1) / (out_size - 1)
    i0 = jnp.clip(jnp.floor(src).astype(jnp.int32), 0, in_size - 1)
    i1 = jnp.clip(i0 + 1, 0, in_size - 1)
    w1 = src - i0.astype(jnp.float32)
    w0 = 1.0 - w1
    eye = jnp.eye(in_size, dtype=jnp.float32)
    return w0[:, None] * eye[i0] + w1[:, None] * eye[i1]        # (out, in)


# ----------------------------------------------------------------------------
# ObjectContextBranch / ObjectContext forward
# ----------------------------------------------------------------------------
def object_context_branch(value_cf, params, size, *, tile, vmem_limit,
                          sim_dtype=jnp.bfloat16):
    b, cm, h, w = value_cf.shape
    p = size * size

    ph = _adaptive_pool_matrix(size, h)
    pw = _adaptive_pool_matrix(size, w)
    # pooled value produced directly in the (B, P, Cm) spatial-major layout
    pooled = jnp.einsum("iy,bcyx,jx->bijc", ph, value_cf, pw)
    pooled = pooled.reshape(b, p, cm).astype(jnp.float32)

    out_cl, sim = branch_core(pooled, params, point_num=p, tile=tile,
                              vmem_limit=vmem_limit, sim_dtype=sim_dtype)
    out_cl = out_cl.reshape(b, size, size, 2 * cm)

    if size < h:
        # align_corners=True bilinear upsample; the einsum also restores NCHW.
        ah = _bilinear_matrix(h, size)
        aw = _bilinear_matrix(w, size)
        out_cf = jnp.einsum("hi,bijc,wj->bchw", ah, out_cl, aw)
    else:
        out_cf = jnp.transpose(out_cl, (0, 3, 1, 2)).astype(jnp.float32)
    return out_cf, sim


def object_context(x_nchw, params, *, size0=60, size1=20,
                   reduce_tile=None, branch_tile=None, vmem_limit=None,
                   sim_dtype=jnp.bfloat16):
    cfg = _hw_config()
    reduce_tile = reduce_tile or cfg["reduce_tile"]
    branch_tile = branch_tile or cfg["branch_tile"]
    vmem_limit = vmem_limit or cfg["vmem_limit"]

    b, cin, h, w = x_nchw.shape
    value = reduce_conv(x_nchw.reshape(b, cin, h * w), params["reduce"],
                        tile_n=reduce_tile, vmem_limit=vmem_limit)
    value = value.reshape(b, -1, h, w)                          # (B, Cm, H, W) bf16

    large_fm, large_sim = object_context_branch(
        value, params["ocb0"], size0, tile=branch_tile,
        vmem_limit=vmem_limit, sim_dtype=sim_dtype)
    small_fm, small_sim = object_context_branch(
        value, params["ocb1"], size1, tile=branch_tile,
        vmem_limit=vmem_limit, sim_dtype=sim_dtype)

    # TODO(synk): the final channel concat (and the upsample feeding it) stays
    # XLA glue; writing branch outputs into a pre-allocated concat buffer would
    # need input_output_aliases plumbing in the downstream consumer.
    out = jnp.concatenate(
        [x_nchw, large_fm.astype(x_nchw.dtype), small_fm.astype(x_nchw.dtype)],
        axis=1)
    return out, large_sim, small_sim


# ----------------------------------------------------------------------------
# Deterministic synthetic parameters (Conv1x1 no-bias + BN folded for inference:
# BN scale folded into the weight; only a bias survives; weights stored bf16).
# ----------------------------------------------------------------------------
def _init_cbr(key, cin, cout, *, transpose=False, eps=1e-5):
    kw, kg, kb, km, kv = jax.random.split(key, 5)
    w = jax.random.normal(kw, (cin, cout), jnp.float32) / jnp.sqrt(cin)
    gamma = jax.random.uniform(kg, (cout,), jnp.float32, 0.5, 1.5)
    beta = 0.1 * jax.random.normal(kb, (cout,), jnp.float32)
    mean = 0.1 * jax.random.normal(km, (cout,), jnp.float32)
    var = jax.random.uniform(kv, (cout,), jnp.float32, 0.5, 1.5)
    scale = gamma / jnp.sqrt(var + eps)
    w_folded = w * scale[None, :]                               # (cin, cout)
    bias = beta - mean * scale                                  # (cout,)
    if transpose:   # channels-first consumer (reduce conv): y = W^T x + b
        return {"w_t": w_folded.T.astype(jnp.bfloat16),
                "b": bias.reshape(cout, 1)}
    # spatial-major consumer (branch core): y = x W + b
    return {"w": w_folded.astype(jnp.bfloat16), "b": bias.reshape(1, cout)}


def _init_branch(key, c, size):
    k1, k2, k3, k4 = jax.random.split(key, 4)
    return {"sim1": _init_cbr(k1, c, c),
            "sim2": _init_cbr(k2, c, size * size),
            "intra_post": _init_cbr(k3, c, c),
            "inter_post": _init_cbr(k4, c, c)}


if __name__ == "__main__":
    key = jax.random.PRNGKey(0)
    kx, kp = jax.random.split(key)

    # Small test shapes. The original module hard-codes branch sizes (60, 20);
    # they are scaled to (12, 4) so the test stays tiny while still exercising:
    # the P-chunked branch path (P=144 -> blk=128, 2x2 (q, chunk) grid with
    # rotated chunk schedule and ragged masked-write boundaries), the small
    # single-block branch (P=16), the ragged reduce-conv grid (H*W=1296 over
    # 512-wide lane tiles) and the non-divisible adaptive pool + bilinear resize.
    B, Cin, H, W = 2, 16, 36, 36
    Cm = 32
    size0, size1 = 12, 4

    kr, k0, k1 = jax.random.split(kp, 3)
    params = {
        "reduce": _init_cbr(kr, Cin, Cm, transpose=True),
        "ocb0": _init_branch(k0, Cm, size0),
        "ocb1": _init_branch(k1, Cm, size1),
    }

    x = jax.random.normal(kx, (B, Cin, H, W), jnp.float32)

    _probe_single_buffer()   # resolve pipeline_mode support outside of jit

    fwd = jax.jit(functools.partial(object_context, size0=size0, size1=size1,
                                    reduce_tile=512, branch_tile=128))
    out, large_sim, small_sim = fwd(x, params)
    jax.block_until_ready((out, large_sim, small_sim))

    assert out.shape == (B, Cin + 4 * Cm, H, W)
    assert large_sim.shape == (B, size0 ** 2, size0 ** 2)
    assert small_sim.shape == (B, size1 ** 2, size1 ** 2)
    print("KERNEL_OK")
</pallas_src>

<mosaic_0001>
module attributes {stable_mosaic.version = 11 : i64} {
  func.func @_k(%arg0: i32, %arg1: memref<8x128xf32, #tpu.memory_space<vmem>>, %arg2: memref<8x128xf32, #tpu.memory_space<vmem>>) attributes {dimension_semantics = [#tpu.dimension_semantics<arbitrary>], iteration_bounds = array<i64: 2>, scalar_prefetch = 0 : i64, scratch_operands = 0 : i64, tpu.core_type = #tpu.core_type<tc>, window_params = [{pipeline_mode = #tpu.pipeline_mode<synchronous>, transform_indices = @transform_0, window_bounds = array<i64: 8, 128>}, {pipeline_mode = #tpu.pipeline_mode<synchronous>, transform_indices = @transform_1, window_bounds = array<i64: 8, 128>}]} {
    %c0 = arith.constant 0 : index
    %c0_0 = arith.constant 0 : index
    %0 = vector.load %arg1[%c0, %c0_0] : memref<8x128xf32, #tpu.memory_space<vmem>>, vector<8x128xf32>
    %cst = arith.constant 1.000000e+00 : f32
    %1 = vector.broadcast %cst : f32 to vector<8x128xf32>
    %2 = arith.addf %0, %1 : vector<8x128xf32>
    %c0_1 = arith.constant 0 : index
    %c0_2 = arith.constant 0 : index
    %3 = vector.load %arg2[%c0_1, %c0_2] : memref<8x128xf32, #tpu.memory_space<vmem>>, vector<8x128xf32>
    tpu.vector_store %arg2[%c0_1, %c0_2], %2 {strides = array<i32>} : memref<8x128xf32, #tpu.memory_space<vmem>>, vector<8x128xf32>,
    return
  }
  func.func @transform_0(%arg0: i32) -> (i32, i32) {
    %c0_i32 = arith.constant 0 : i32
    %c0_i32_0 = arith.constant 0 : i32
    %c0_i32_1 = arith.constant 0 : i32
    return %c0_i32, %c0_i32_0 : i32, i32
  }
  func.func @transform_1(%arg0: i32) -> (i32, i32) {
    %c0_i32 = arith.constant 0 : i32
    %c0_i32_0 = arith.constant 0 : i32
    %c0_i32_1 = arith.constant 0 : i32
    return %c0_i32, %c0_i32_0 : i32, i32
  }
}

module attributes {stable_mosaic.version = 11 : i64} {
  func.func @_reduce_conv_kernel(%arg0: i32, %arg1: i32, %arg2: memref<1x16x512xf32, #tpu.memory_space<vmem>>, %arg3: memref<32x16xbf16, #tpu.memory_space<vmem>>, %arg4: memref<32x1xf32, #tpu.memory_space<vmem>>, %arg5: memref<1x32x512xbf16, #tpu.memory_space<vmem>>) attributes {dimension_semantics = [#tpu.dimension_semantics<parallel>, #tpu.dimension_semantics<parallel>], iteration_bounds = array<i64: 2, 3>, scalar_prefetch = 0 : i64, scratch_operands = 0 : i64, tpu.core_type = #tpu.core_type<tc>, window_params = [{transform_indices = @transform_0, window_bounds = array<i64: 1, 16, 512>}, {pipeline_mode = #tpu.pipeline_mode<synchronous>, transform_indices = @transform_1, window_bounds = array<i64: 32, 16>}, {pipeline_mode = #tpu.pipeline_mode<synchronous>, transform_indices = @transform_2, window_bounds = array<i64: 32, 1>}, {transform_indices = @transform_3, window_bounds = array<i64: 1, 32, 512>}]} {
    %c0 = arith.constant 0 : index
    %c0_0 = arith.constant 0 : index
    %c0_1 = arith.constant 0 : index
    %0 = vector.load %arg2[%c0, %c0_0, %c0_1] : memref<1x16x512xf32, #tpu.memory_space<vmem>>, vector<1x16x512xf32>
    %1 = vector.shape_cast %0 : vector<1x16x512xf32> to vector<16x512xf32>
    %2 = arith.truncf %1 : vector<16x512xf32> to vector<16x512xbf16>
    %c0_2 = arith.constant 0 : index
    %c0_3 = arith.constant 0 : index
    %3 = vector.load %arg3[%c0_2, %c0_3] : memref<32x16xbf16, #tpu.memory_space<vmem>>, vector<32x16xbf16>
    %cst = arith.constant dense<0.000000e+00> : vector<32x512xf32>
    %4 = tpu.matmul %3, %2, %cst {dimension_numbers = #tpu.dot_dimension_numbers<[1], [0], [0], [1], [0, 0, 1, 1], [], []>} : vector<32x16xbf16>, vector<16x512xbf16>, vector<32x512xf32> -> vector<32x512xf32>
    %c0_4 = arith.constant 0 : index
    %c0_5 = arith.constant 0 : index
    %5 = vector.load %arg4[%c0_4, %c0_5] : memref<32x1xf32, #tpu.memory_space<vmem>>, vector<32x1xf32>
    %6 = vector.broadcast %5 : vector<32x1xf32> to vector<32x512xf32>
    %7 = arith.addf %4, %6 : vector<32x512xf32>
    %cst_6 = arith.constant 0.000000e+00 : f32
    %8 = vector.broadcast %cst_6 : f32 to vector<32x512xf32>
    %9 = arith.maximumf %7, %8 : vector<32x512xf32>
    %10 = arith.truncf %9 : vector<32x512xf32> to vector<32x512xbf16>
    %c0_7 = arith.constant 0 : index
    %c0_8 = arith.constant 0 : index
    %c0_9 = arith.constant 0 : index
    %11 = vector.load %arg5[%c0_7, %c0_8, %c0_9] : memref<1x32x512xbf16, #tpu.memory_space<vmem>>, vector<1x32x512xbf16>
    %12 = vector.shape_cast %11 : vector<1x32x512xbf16> to vector<32x512xbf16>
    %13 = vector.shape_cast %10 : vector<32x512xbf16> to vector<1x32x512xbf16>
    tpu.vector_store %arg5[%c0_7, %c0_8, %c0_9], %13 {strides = array<i32>} : memref<1x32x512xbf16, #tpu.memory_space<vmem>>, vector<1x32x512xbf16>,
    return
  }
  func.func @transform_0(%arg0: i32, %arg1: i32) -> (i32, i32, i32) {
    %c0_i32 = arith.constant 0 : i32
    %c0_i32_0 = arith.constant 0 : i32
    return %arg0, %c0_i32, %arg1 : i32, i32, i32
  }
  func.func @transform_1(%arg0: i32, %arg1: i32) -> (i32, i32) {
    %c0_i32 = arith.constant 0 : i32
    %c0_i32_0 = arith.constant 0 : i32
    %c0_i32_1 = arith.constant 0 : i32
    return %c0_i32, %c0_i32_0 : i32, i32
  }
  func.func @transform_2(%arg0: i32, %arg1: i32) -> (i32, i32) {
    %c0_i32 = arith.constant 0 : i32
    %c0_i32_0 = arith.constant 0 : i32
    %c0_i32_1 = arith.constant 0 : i32
    return %c0_i32, %c0_i32_0 : i32, i32
  }
  func.func @transform_3(%arg0: i32, %arg1: i32) -> (i32, i32, i32) {
    %c0_i32 = arith.constant 0 : i32
    %c0_i32_0 = arith.constant 0 : i32
    return %arg0, %c0_i32, %arg1 : i32, i32, i32
  }
}

module attributes {stable_mosaic.version = 11 : i64} {
  func.func @_branch_core_kernel(%arg0: i32, %arg1: i32, %arg2: i32, %arg3: memref<1x16x32xbf16, #tpu.memory_space<vmem>>, %arg4: memref<32x32xbf16, #tpu.memory_space<vmem>>, %arg5: memref<1x32xf32, #tpu.memory_space<vmem>>, %arg6: memref<32x16xbf16, #tpu.memory_space<vmem>>, %arg7: memref<1x16xf32, #tpu.memory_space<vmem>>, %arg8: memref<32x64xbf16, #tpu.memory_space<vmem>>, %arg9: memref<1x1x64xf32, #tpu.memory_space<vmem>>, %arg10: memref<1x16x64xbf16, #tpu.memory_space<vmem>>, %arg11: memref<1x16x16xbf16, #tpu.memory_space<vmem>>, %arg12: memref<16x32xbf16, #tpu.memory_space<vmem>>, %arg13: memref<16x32xf32, #tpu.memory_space<vmem>>) attributes {dimension_semantics = [#tpu.dimension_semantics<parallel>, #tpu.dimension_semantics<parallel>, #tpu.dimension_semantics<arbitrary>], iteration_bounds = array<i64: 2, 1, 1>, scalar_prefetch = 0 : i64, scratch_operands = 2 : i64, tpu.core_type = #tpu.core_type<tc>, window_params = [{transform_indices = @transform_0, window_bounds = array<i64: 1, 16, 32>}, {pipeline_mode = #tpu.pipeline_mode<synchronous>, transform_indices = @transform_1, window_bounds = array<i64: 32, 32>}, {pipeline_mode = #tpu.pipeline_mode<synchronous>, transform_indices = @transform_2, window_bounds = array<i64: 1, 32>}, {transform_indices = @transform_3, window_bounds = array<i64: 32, 16>}, {transform_indices = @transform_4, window_bounds = array<i64: 1, 16>}, {pipeline_mode = #tpu.pipeline_mode<synchronous>, transform_indices = @transform_5, window_bounds = array<i64: 32, 64>}, {transform_indices = @transform_6, window_bounds = array<i64: 1, 1, 64>}, {transform_indices = @transform_7, window_bounds = array<i64: 1, 16, 64>}, {transform_indices = @transform_8, window_bounds = array<i64: 1, 16, 16>}]} {
    %c0_i32 = arith.constant 0 : i32
    %0 = arith.cmpi eq, %arg2, %c0_i32 : i32
    %1 = arith.extui %0 : i1 to i32
    %c0_i32_0 = arith.constant 0 : i32
    %2 = arith.cmpi ne, %1, %c0_i32_0 : i32
    scf.if %2 {
      %c0_22 = arith.constant 0 : index
      %c0_23 = arith.constant 0 : index
      %c0_24 = arith.constant 0 : index
      %30 = vector.load %arg3[%c0_22, %c0_23, %c0_24] : memref<1x16x32xbf16, #tpu.memory_space<vmem>>, vector<1x16x32xbf16>
      %31 = vector.shape_cast %30 : vector<1x16x32xbf16> to vector<16x32xbf16>
      %c0_25 = arith.constant 0 : index
      %c0_26 = arith.constant 0 : index
      %32 = vector.load %arg4[%c0_25, %c0_26] : memref<32x32xbf16, #tpu.memory_space<vmem>>, vector<32x32xbf16>
      %cst_27 = arith.constant dense<0.000000e+00> : vector<16x32xf32>
      %33 = tpu.matmul %31, %32, %cst_27 {dimension_numbers = #tpu.dot_dimension_numbers<[1], [0], [0], [1], [0, 0, 1, 1], [], []>} : vector<16x32xbf16>, vector<32x32xbf16>, vector<16x32xf32> -> vector<16x32xf32>
      %c0_28 = arith.constant 0 : index
      %c0_29 = arith.constant 0 : index
      %34 = vector.load %arg5[%c0_28, %c0_29] : memref<1x32xf32, #tpu.memory_space<vmem>>, vector<1x32xf32>
      %35 = vector.broadcast %34 : vector<1x32xf32> to vector<16x32xf32>
      %36 = arith.addf %33, %35 : vector<16x32xf32>
      %cst_30 = arith.constant 0.000000e+00 : f32
      %37 = vector.broadcast %cst_30 : f32 to vector<16x32xf32>
      %38 = arith.maximumf %36, %37 : vector<16x32xf32>
      %39 = arith.truncf %38 : vector<16x32xf32> to vector<16x32xbf16>
      %c0_31 = arith.constant 0 : index
      %c0_32 = arith.constant 0 : index
      %40 = vector.load %arg12[%c0_31, %c0_32] : memref<16x32xbf16, #tpu.memory_space<vmem>>, vector<16x32xbf16>
      tpu.vector_store %arg12[%c0_31, %c0_32], %39 {strides = array<i32>} : memref<16x32xbf16, #tpu.memory_space<vmem>>, vector<16x32xbf16>,
      %cst_33 = arith.constant 0.000000e+00 : f32
      %41 = vector.broadcast %cst_33 : f32 to vector<16x32xf32>
      %c0_34 = arith.constant 0 : index
      %c0_35 = arith.constant 0 : index
      %42 = vector.load %arg13[%c0_34, %c0_35] : memref<16x32xf32, #tpu.memory_space<vmem>>, vector<16x32xf32>
      tpu.vector_store %arg13[%c0_34, %c0_35], %41 {strides = array<i32>} : memref<16x32xf32, #tpu.memory_space<vmem>>, vector<16x32xf32>,
    } else {
    }
    %c0 = arith.constant 0 : index
    %c0_1 = arith.constant 0 : index
    %3 = vector.load %arg12[%c0, %c0_1] : memref<16x32xbf16, #tpu.memory_space<vmem>>, vector<16x32xbf16>
    %c0_2 = arith.constant 0 : index
    %c0_3 = arith.constant 0 : index
    %4 = vector.load %arg6[%c0_2, %c0_3] : memref<32x16xbf16, #tpu.memory_space<vmem>>, vector<32x16xbf16>
    %cst = arith.constant dense<0.000000e+00> : vector<16x16xf32>
    %5 = tpu.matmul %3, %4, %cst {dimension_numbers = #tpu.dot_dimension_numbers<[1], [0], [0], [1], [0, 0, 1, 1], [], []>} : vector<16x32xbf16>, vector<32x16xbf16>, vector<16x16xf32> -> vector<16x16xf32>
    %c0_4 = arith.constant 0 : index
    %c0_5 = arith.constant 0 : index
    %6 = vector.load %arg7[%c0_4, %c0_5] : memref<1x16xf32, #tpu.memory_space<vmem>>, vector<1x16xf32>
    %7 = vector.broadcast %6 : vector<1x16xf32> to vector<16x16xf32>
    %8 = arith.addf %5, %7 : vector<16x16xf32>
    %cst_6 = arith.constant 0.000000e+00 : f32
    %9 = vector.broadcast %cst_6 : f32 to vector<16x16xf32>
    %10 = arith.subf %9, %8 : vector<16x16xf32>
    %11 = math.exp %10 : vector<16x16xf32>
    %cst_7 = arith.constant 1.000000e+00 : f32
    %12 = vector.broadcast %cst_7 : f32 to vector<16x16xf32>
    %13 = arith.addf %12, %11 : vector<16x16xf32>
    %cst_8 = arith.constant 1.000000e+00 : f32
    %14 = vector.broadcast %cst_8 : f32 to vector<16x16xf32>
    %15 = arith.divf %14, %13 : vector<16x16xf32>
    %16 = arith.truncf %15 : vector<16x16xf32> to vector<16x16xbf16>
    %c0_9 = arith.constant 0 : index
    %c0_10 = arith.constant 0 : index
    %c0_11 = arith.constant 0 : index
    %17 = vector.load %arg11[%c0_9, %c0_10, %c0_11] : memref<1x16x16xbf16, #tpu.memory_space<vmem>>, vector<1x16x16xbf16>
    %18 = vector.shape_cast %17 : vector<1x16x16xbf16> to vector<16x16xbf16>
    %19 = vector.shape_cast %16 : vector<16x16xbf16> to vector<1x16x16xbf16>
    tpu.vector_store %arg11[%c0_9, %c0_10, %c0_11], %19 {strides = array<i32>} : memref<1x16x16xbf16, #tpu.memory_space<vmem>>, vector<1x16x16xbf16>,
    %c0_12 = arith.constant 0 : index
    %c0_13 = arith.constant 0 : index
    %20 = vector.load %arg13[%c0_12, %c0_13] : memref<16x32xf32, #tpu.memory_space<vmem>>, vector<16x32xf32>
    %21 = arith.truncf %15 : vector<16x16xf32> to vector<16x16xbf16>
    %c0_14 = arith.constant 0 : index
    %c0_15 = arith.constant 0 : index
    %c0_16 = arith.constant 0 : index
    %22 = vector.load %arg3[%c0_14, %c0_15, %c0_16] : memref<1x16x32xbf16, #tpu.memory_space<vmem>>, vector<1x16x32xbf16>
    %23 = vector.shape_cast %22 : vector<1x16x32xbf16> to vector<16x32xbf16>
    %cst_17 = arith.constant dense<0.000000e+00> : vector<16x32xf32>
    %24 = tpu.matmul %21, %23, %cst_17 {dimension_numbers = #tpu.dot_dimension_numbers<[1], [0], [0], [1], [0, 0, 1, 1], [], []>} : vector<16x16xbf16>, vector<16x32xbf16>, vector<16x32xf32> -> vector<16x32xf32>
    %25 = arith.addf %20, %24 : vector<16x32xf32>
    %c0_18 = arith.constant 0 : index
    %c0_19 = arith.constant 0 : index
    %26 = vector.load %arg13[%c0_18, %c0_19] : memref<16x32xf32, #tpu.memory_space<vmem>>, vector<16x32xf32>
    tpu.vector_store %arg13[%c0_18, %c0_19], %25 {strides = array<i32>} : memref<16x32xf32, #tpu.memory_space<vmem>>, vector<16x32xf32>,
    %c0_i32_20 = arith.constant 0 : i32
    %27 = arith.cmpi eq, %arg2, %c0_i32_20 : i32
    %28 = arith.extui %27 : i1 to i32
    %c0_i32_21 = arith.constant 0 : i32
    %29 = arith.cmpi ne, %28, %c0_i32_21 : i32
    scf.if %29 {
      %c0_22 = arith.constant 0 : index
      %c0_23 = arith.constant 0 : index
      %30 = vector.load %arg13[%c0_22, %c0_23] : memref<16x32xf32, #tpu.memory_space<vmem>>, vector<16x32xf32>
      %cst_24 = arith.constant 6.250000e-02 : f32
      %31 = vector.broadcast %cst_24 : f32 to vector<16x32xf32>
      %32 = arith.mulf %30, %31 : vector<16x32xf32>
      %33 = arith.truncf %32 : vector<16x32xf32> to vector<16x32xbf16>
      %c0_25 = arith.constant 0 : index
      %c0_26 = arith.constant 0 : index
      %34 = vector.load %arg8[%c0_25, %c0_26] : memref<32x64xbf16, #tpu.memory_space<vmem>>, vector<32x64xbf16>
      %cst_27 = arith.constant dense<0.000000e+00> : vector<16x64xf32>
      %35 = tpu.matmul %33, %34, %cst_27 {dimension_numbers = #tpu.dot_dimension_numbers<[1], [0], [0], [1], [0, 0, 1, 1], [], []>} : vector<16x32xbf16>, vector<32x64xbf16>, vector<16x64xf32> -> vector<16x64xf32>
      %c0_28 = arith.constant 0 : index
      %c0_29 = arith.constant 0 : index
      %c0_30 = arith.constant 0 : index
      %36 = vector.load %arg9[%c0_28, %c0_29, %c0_30] : memref<1x1x64xf32, #tpu.memory_space<vmem>>, vector<1x1x64xf32>
      %37 = vector.shape_cast %36 : vector<1x1x64xf32> to vector<1x64xf32>
      %38 = vector.broadcast %37 : vector<1x64xf32> to vector<16x64xf32>
      %39 = arith.addf %35, %38 : vector<16x64xf32>
      %cst_31 = arith.constant 0.000000e+00 : f32
      %40 = vector.broadcast %cst_31 : f32 to vector<16x64xf32>
      %41 = arith.maximumf %39, %40 : vector<16x64xf32>
      %42 = arith.truncf %41 : vector<16x64xf32> to vector<16x64xbf16>
      %c0_32 = arith.constant 0 : index
      %c0_33 = arith.constant 0 : index
      %c0_34 = arith.constant 0 : index
      %43 = vector.load %arg10[%c0_32, %c0_33, %c0_34] : memref<1x16x64xbf16, #tpu.memory_space<vmem>>, vector<1x16x64xbf16>
      %44 = vector.shape_cast %43 : vector<1x16x64xbf16> to vector<16x64xbf16>
      %45 = vector.shape_cast %42 : vector<16x64xbf16> to vector<1x16x64xbf16>
      tpu.vector_store %arg10[%c0_32, %c0_33, %c0_34], %45 {strides = array<i32>} : memref<1x16x64xbf16, #tpu.memory_space<vmem>>, vector<1x16x64xbf16>,
    } else {
    }
    return
  }
  func.func @transform_0(%arg0: i32, %arg1: i32, %arg2: i32) -> (i32, i32, i32) {
    %0 = arith.addi %arg1, %arg2 : i32
    %c1_i32 = arith.constant 1 : i32
    %c0_i32 = arith.constant 0 : i32
    %1 = arith.cmpi eq, %c1_i32, %c0_i32 : i32
    %c1_i32_0 = arith.constant 1 : i32
    %2 = arith.select %1, %c1_i32_0, %c1_i32 : i32
    %3 = arith.remsi %0, %2 : i32
    %c0_i32_1 = arith.constant 0 : i32
    %4 = arith.cmpi ne, %3, %c0_i32_1 : i32
    %c0_i32_2 = arith.constant 0 : i32
    %5 = arith.cmpi slt, %3, %c0_i32_2 : i32
    %c0_i32_3 = arith.constant 0 : i32
    %6 = arith.cmpi slt, %2, %c0_i32_3 : i32
    %7 = arith.xori %5, %6 : i1
    %8 = arith.andi %7, %4 : i1
    %9 = arith.addi %3, %2 : i32
    %10 = arith.select %8, %9, %3 : i32
    %c0_i32_4 = arith.constant 0 : i32
    %c0_i32_5 = arith.constant 0 : i32
    return %arg0, %10, %c0_i32_4 : i32, i32, i32
  }
  func.func @transform_1(%arg0: i32, %arg1: i32, %arg2: i32) -> (i32, i32) {
    %c0_i32 = arith.constant 0 : i32
    %c0_i32_0 = arith.constant 0 : i32
    %c0_i32_1 = arith.constant 0 : i32
    return %c0_i32, %c0_i32_0 : i32, i32
  }
  func.func @transform_2(%arg0: i32, %arg1: i32, %arg2: i32) -> (i32, i32) {
    %c0_i32 = arith.constant 0 : i32
    %c0_i32_0 = arith.constant 0 : i32
    %c0_i32_1 = arith.constant 0 : i32
    return %c0_i32, %c0_i32_0 : i32, i32
  }
  func.func @transform_3(%arg0: i32, %arg1: i32, %arg2: i32) -> (i32, i32) {
    %0 = arith.addi %arg1, %arg2 : i32
    %c1_i32 = arith.constant 1 : i32
    %c0_i32 = arith.constant 0 : i32
    %1 = arith.cmpi eq, %c1_i32, %c0_i32 : i32
    %c1_i32_0 = arith.constant 1 : i32
    %2 = arith.select %1, %c1_i32_0, %c1_i32 : i32
    %3 = arith.remsi %0, %2 : i32
    %c0_i32_1 = arith.constant 0 : i32
    %4 = arith.cmpi ne, %3, %c0_i32_1 : i32
    %c0_i32_2 = arith.constant 0 : i32
    %5 = arith.cmpi slt, %3, %c0_i32_2 : i32
    %c0_i32_3 = arith.constant 0 : i32
    %6 = arith.cmpi slt, %2, %c0_i32_3 : i32
    %7 = arith.xori %5, %6 : i1
    %8 = arith.andi %7, %4 : i1
    %9 = arith.addi %3, %2 : i32
    %10 = arith.select %8, %9, %3 : i32
    %c0_i32_4 = arith.constant 0 : i32
    %c0_i32_5 = arith.constant 0 : i32
    return %c0_i32_4, %10 : i32, i32
  }
  func.func @transform_4(%arg0: i32, %arg1: i32, %arg2: i32) -> (i32, i32) {
    %0 = arith.addi %arg1, %arg2 : i32
    %c1_i32 = arith.constant 1 : i32
    %c0_i32 = arith.constant 0 : i32
    %1 = arith.cmpi eq, %c1_i32, %c0_i32 : i32
    %c1_i32_0 = arith.constant 1 : i32
    %2 = arith.select %1, %c1_i32_0, %c1_i32 : i32
    %3 = arith.remsi %0, %2 : i32
    %c0_i32_1 = arith.constant 0 : i32
    %4 = arith.cmpi ne, %3, %c0_i32_1 : i32
    %c0_i32_2 = arith.constant 0 : i32
    %5 = arith.cmpi slt, %3, %c0_i32_2 : i32
    %c0_i32_3 = arith.constant 0 : i32
    %6 = arith.cmpi slt, %2, %c0_i32_3 : i32
    %7 = arith.xori %5, %6 : i1
    %8 = arith.andi %7, %4 : i1
    %9 = arith.addi %3, %2 : i32
    %10 = arith.select %8, %9, %3 : i32
    %c0_i32_4 = arith.constant 0 : i32
    %c0_i32_5 = arith.constant 0 : i32
    return %c0_i32_4, %10 : i32, i32
  }
  func.func @transform_5(%arg0: i32, %arg1: i32, %arg2: i32) -> (i32, i32) {
    %c0_i32 = arith.constant 0 : i32
    %c0_i32_0 = arith.constant 0 : i32
    %c0_i32_1 = arith.constant 0 : i32
    return %c0_i32, %c0_i32_0 : i32, i32
  }
  func.func @transform_6(%arg0: i32, %arg1: i32, %arg2: i32) -> (i32, i32, i32) {
    %c0_i32 = arith.constant 0 : i32
    %c0_i32_0 = arith.constant 0 : i32
    %c0_i32_1 = arith.constant 0 : i32
    return %arg0, %c0_i32, %c0_i32_0 : i32, i32, i32
  }
  func.func @transform_7(%arg0: i32, %arg1: i32, %arg2: i32) -> (i32, i32, i32) {
    %c0_i32 = arith.constant 0 : i32
    %c0_i32_0 = arith.constant 0 : i32
    return %arg0, %arg1, %c0_i32 : i32, i32, i32
  }
  func.func @transform_8(%arg0: i32, %arg1: i32, %arg2: i32) -> (i32, i32, i32) {
    %0 = arith.addi %arg1, %arg2 : i32
    %c1_i32 = arith.constant 1 : i32
    %c0_i32 = arith.constant 0 : i32
    %1 = arith.cmpi eq, %c1_i32, %c0_i32 : i32
    %c1_i32_0 = arith.constant 1 : i32
    %2 = arith.select %1, %c1_i32_0, %c1_i32 : i32
    %3 = arith.remsi %0, %2 : i32
    %c0_i32_1 = arith.constant 0 : i32
    %4 = arith.cmpi ne, %3, %c0_i32_1 : i32
    %c0_i32_2 = arith.constant 0 : i32
    %5 = arith.cmpi slt, %3, %c0_i32_2 : i32
    %c0_i32_3 = arith.constant 0 : i32
    %6 = arith.cmpi slt, %2, %c0_i32_3 : i32
    %7 = arith.xori %5, %6 : i1
    %8 = arith.andi %7, %4 : i1
    %9 = arith.addi %3, %2 : i32
    %10 = arith.select %8, %9, %3 : i32
    %c0_i32_4 = arith.constant 0 : i32
    return %arg0, %arg1, %10 : i32, i32, i32
  }
}

module attributes {stable_mosaic.version = 11 : i64} {
  func.func @_branch_core_kernel(%arg0: i32, %arg1: i32, %arg2: i32, %arg3: memref<1x128x32xbf16, #tpu.memory_space<vmem>>, %arg4: memref<32x32xbf16, #tpu.memory_space<vmem>>, %arg5: memref<1x32xf32, #tpu.memory_space<vmem>>, %arg6: memref<32x128xbf16, #tpu.memory_space<vmem>>, %arg7: memref<1x128xf32, #tpu.memory_space<vmem>>, %arg8: memref<32x64xbf16, #tpu.memory_space<vmem>>, %arg9: memref<1x1x64xf32, #tpu.memory_space<vmem>>, %arg10: memref<1x128x64xbf16, #tpu.memory_space<vmem>>, %arg11: memref<1x128x128xbf16, #tpu.memory_space<vmem>>, %arg12: memref<128x32xbf16, #tpu.memory_space<vmem>>, %arg13: memref<128x32xf32, #tpu.memory_space<vmem>>) attributes {dimension_semantics = [#tpu.dimension_semantics<parallel>, #tpu.dimension_semantics<parallel>, #tpu.dimension_semantics<arbitrary>], iteration_bounds = array<i64: 2, 2, 2>, scalar_prefetch = 0 : i64, scratch_operands = 2 : i64, tpu.core_type = #tpu.core_type<tc>, window_params = [{transform_indices = @transform_0, window_bounds = array<i64: 1, 128, 32>}, {pipeline_mode = #tpu.pipeline_mode<synchronous>, transform_indices = @transform_1, window_bounds = array<i64: 32, 32>}, {pipeline_mode = #tpu.pipeline_mode<synchronous>, transform_indices = @transform_2, window_bounds = array<i64: 1, 32>}, {transform_indices = @transform_3, window_bounds = array<i64: 32, 128>}, {transform_indices = @transform_4, window_bounds = array<i64: 1, 128>}, {pipeline_mode = #tpu.pipeline_mode<synchronous>, transform_indices = @transform_5, window_bounds = array<i64: 32, 64>}, {transform_indices = @transform_6, window_bounds = array<i64: 1, 1, 64>}, {transform_indices = @transform_7, window_bounds = array<i64: 1, 128, 64>}, {transform_indices = @transform_8, window_bounds = array<i64: 1, 128, 128>}]} {
    %c0_i32 = arith.constant 0 : i32
    %0 = arith.cmpi eq, %arg2, %c0_i32 : i32
    %1 = arith.extui %0 : i1 to i32
    %c0_i32_0 = arith.constant 0 : i32
    %2 = arith.cmpi ne, %1, %c0_i32_0 : i32
    scf.if %2 {
      %c0_21 = arith.constant 0 : index
      %c0_22 = arith.constant 0 : index
      %c0_23 = arith.constant 0 : index
      %30 = vector.load %arg3[%c0_21, %c0_22, %c0_23] : memref<1x128x32xbf16, #tpu.memory_space<vmem>>, vector<1x128x32xbf16>
      %31 = vector.shape_cast %30 : vector<1x128x32xbf16> to vector<128x32xbf16>
      %c0_24 = arith.constant 0 : index
      %c0_25 = arith.constant 0 : index
      %32 = vector.load %arg4[%c0_24, %c0_25] : memref<32x32xbf16, #tpu.memory_space<vmem>>, vector<32x32xbf16>
      %cst_26 = arith.constant dense<0.000000e+00> : vector<128x32xf32>
      %33 = tpu.matmul %31, %32, %cst_26 {dimension_numbers = #tpu.dot_dimension_numbers<[1], [0], [0], [1], [0, 0, 1, 1], [], []>} : vector<128x32xbf16>, vector<32x32xbf16>, vector<128x32xf32> -> vector<128x32xf32>
      %c0_27 = arith.constant 0 : index
      %c0_28 = arith.constant 0 : index
      %34 = vector.load %arg5[%c0_27, %c0_28] : memref<1x32xf32, #tpu.memory_space<vmem>>, vector<1x32xf32>
      %35 = vector.broadcast %34 : vector<1x32xf32> to vector<128x32xf32>
      %36 = arith.addf %33, %35 : vector<128x32xf32>
      %cst_29 = arith.constant 0.000000e+00 : f32
      %37 = vector.broadcast %cst_29 : f32 to vector<128x32xf32>
      %38 = arith.maximumf %36, %37 : vector<128x32xf32>
      %39 = arith.truncf %38 : vector<128x32xf32> to vector<128x32xbf16>
      %c0_30 = arith.constant 0 : index
      %c0_31 = arith.constant 0 : index
      %40 = vector.load %arg12[%c0_30, %c0_31] : memref<128x32xbf16, #tpu.memory_space<vmem>>, vector<128x32xbf16>
      tpu.vector_store %arg12[%c0_30, %c0_31], %39 {strides = array<i32>} : memref<128x32xbf16, #tpu.memory_space<vmem>>, vector<128x32xbf16>,
      %cst_32 = arith.constant 0.000000e+00 : f32
      %41 = vector.broadcast %cst_32 : f32 to vector<128x32xf32>
      %c0_33 = arith.constant 0 : index
      %c0_34 = arith.constant 0 : index
      %42 = vector.load %arg13[%c0_33, %c0_34] : memref<128x32xf32, #tpu.memory_space<vmem>>, vector<128x32xf32>
      tpu.vector_store %arg13[%c0_33, %c0_34], %41 {strides = array<i32>} : memref<128x32xf32, #tpu.memory_space<vmem>>, vector<128x32xf32>,
    } else {
    }
    %c0 = arith.constant 0 : index
    %c0_1 = arith.constant 0 : index
    %3 = vector.load %arg12[%c0, %c0_1] : memref<128x32xbf16, #tpu.memory_space<vmem>>, vector<128x32xbf16>
    %c0_2 = arith.constant 0 : index
    %c0_3 = arith.constant 0 : index
    %4 = vector.load %arg6[%c0_2, %c0_3] : memref<32x128xbf16, #tpu.memory_space<vmem>>, vector<32x128xbf16>
    %cst = arith.constant dense<0.000000e+00> : vector<128x128xf32>
    %5 = tpu.matmul %3, %4, %cst {dimension_numbers = #tpu.dot_dimension_numbers<[1], [0], [0], [1], [0, 0, 1, 1], [], []>} : vector<128x32xbf16>, vector<32x128xbf16>, vector<128x128xf32> -> vector<128x128xf32>
    %c0_4 = arith.constant 0 : index
    %c0_5 = arith.constant 0 : index
    %6 = vector.load %arg7[%c0_4, %c0_5] : memref<1x128xf32, #tpu.memory_space<vmem>>, vector<1x128xf32>
    %7 = vector.broadcast %6 : vector<1x128xf32> to vector<128x128xf32>
    %8 = arith.addf %5, %7 : vector<128x128xf32>
    %cst_6 = arith.constant 0.000000e+00 : f32
    %9 = vector.broadcast %cst_6 : f32 to vector<128x128xf32>
    %10 = arith.subf %9, %8 : vector<128x128xf32>
    %11 = math.exp %10 : vector<128x128xf32>
    %cst_7 = arith.constant 1.000000e+00 : f32
    %12 = vector.broadcast %cst_7 : f32 to vector<128x128xf32>
    %13 = arith.addf %12, %11 : vector<128x128xf32>
    %cst_8 = arith.constant 1.000000e+00 : f32
    %14 = vector.broadcast %cst_8 : f32 to vector<128x128xf32>
    %15 = arith.divf %14, %13 : vector<128x128xf32>
    %16 = arith.truncf %15 : vector<128x128xf32> to vector<128x128xbf16>
    %c0_9 = arith.constant 0 : index
    %c0_10 = arith.constant 0 : index
    %c0_11 = arith.constant 0 : index
    %17 = vector.load %arg11[%c0_9, %c0_10, %c0_11] : memref<1x128x128xbf16, #tpu.memory_space<vmem>>, vector<1x128x128xbf16>
    %18 = vector.shape_cast %17 : vector<1x128x128xbf16> to vector<128x128xbf16>
    %19 = vector.shape_cast %16 : vector<128x128xbf16> to vector<1x128x128xbf16>
    tpu.vector_store %arg11[%c0_9, %c0_10, %c0_11], %19 {strides = array<i32>} : memref<1x128x128xbf16, #tpu.memory_space<vmem>>, vector<1x128x128xbf16>,
    %c0_12 = arith.constant 0 : index
    %c0_13 = arith.constant 0 : index
    %20 = vector.load %arg13[%c0_12, %c0_13] : memref<128x32xf32, #tpu.memory_space<vmem>>, vector<128x32xf32>
    %21 = arith.truncf %15 : vector<128x128xf32> to vector<128x128xbf16>
    %c0_14 = arith.constant 0 : index
    %c0_15 = arith.constant 0 : index
    %c0_16 = arith.constant 0 : index
    %22 = vector.load %arg3[%c0_14, %c0_15, %c0_16] : memref<1x128x32xbf16, #tpu.memory_space<vmem>>, vector<1x128x32xbf16>
    %23 = vector.shape_cast %22 : vector<1x128x32xbf16> to vector<128x32xbf16>
    %cst_17 = arith.constant dense<0.000000e+00> : vector<128x32xf32>
    %24 = tpu.matmul %21, %23, %cst_17 {dimension_numbers = #tpu.dot_dimension_numbers<[1], [0], [0], [1], [0, 0, 1, 1], [], []>} : vector<128x128xbf16>, vector<128x32xbf16>, vector<128x32xf32> -> vector<128x32xf32>
    %25 = arith.addf %20, %24 : vector<128x32xf32>
    %c0_18 = arith.constant 0 : index
    %c0_19 = arith.constant 0 : index
    %26 = vector.load %arg13[%c0_18, %c0_19] : memref<128x32xf32, #tpu.memory_space<vmem>>, vector<128x32xf32>
    tpu.vector_store %arg13[%c0_18, %c0_19], %25 {strides = array<i32>} : memref<128x32xf32, #tpu.memory_space<vmem>>, vector<128x32xf32>,
    %c1_i32 = arith.constant 1 : i32
    %27 = arith.cmpi eq, %arg2, %c1_i32 : i32
    %28 = arith.extui %27 : i1 to i32
    %c0_i32_20 = arith.constant 0 : i32
    %29 = arith.cmpi ne, %28, %c0_i32_20 : i32
    scf.if %29 {
      %c0_21 = arith.constant 0 : index
      %c0_22 = arith.constant 0 : index
      %30 = vector.load %arg13[%c0_21, %c0_22] : memref<128x32xf32, #tpu.memory_space<vmem>>, vector<128x32xf32>
      %cst_23 = arith.constant 0.0069444445 : f32
      %31 = vector.broadcast %cst_23 : f32 to vector<128x32xf32>
      %32 = arith.mulf %30, %31 : vector<128x32xf32>
      %33 = arith.truncf %32 : vector<128x32xf32> to vector<128x32xbf16>
      %c0_24 = arith.constant 0 : index
      %c0_25 = arith.constant 0 : index
      %34 = vector.load %arg8[%c0_24, %c0_25] : memref<32x64xbf16, #tpu.memory_space<vmem>>, vector<32x64xbf16>
      %cst_26 = arith.constant dense<0.000000e+00> : vector<128x64xf32>
      %35 = tpu.matmul %33, %34, %cst_26 {dimension_numbers = #tpu.dot_dimension_numbers<[1], [0], [0], [1], [0, 0, 1, 1], [], []>} : vector<128x32xbf16>, vector<32x64xbf16>, vector<128x64xf32> -> vector<128x64xf32>
      %c0_27 = arith.constant 0 : index
      %c0_28 = arith.constant 0 : index
      %c0_29 = arith.constant 0 : index
      %36 = vector.load %arg9[%c0_27, %c0_28, %c0_29] : memref<1x1x64xf32, #tpu.memory_space<vmem>>, vector<1x1x64xf32>
      %37 = vector.shape_cast %36 : vector<1x1x64xf32> to vector<1x64xf32>
      %38 = vector.broadcast %37 : vector<1x64xf32> to vector<128x64xf32>
      %39 = arith.addf %35, %38 : vector<128x64xf32>
      %cst_30 = arith.constant 0.000000e+00 : f32
      %40 = vector.broadcast %cst_30 : f32 to vector<128x64xf32>
      %41 = arith.maximumf %39, %40 : vector<128x64xf32>
      %42 = arith.truncf %41 : vector<128x64xf32> to vector<128x64xbf16>
      %c0_31 = arith.constant 0 : index
      %c0_32 = arith.constant 0 : index
      %c0_33 = arith.constant 0 : index
      %43 = vector.load %arg10[%c0_31, %c0_32, %c0_33] : memref<1x128x64xbf16, #tpu.memory_space<vmem>>, vector<1x128x64xbf16>
      %44 = vector.shape_cast %43 : vector<1x128x64xbf16> to vector<128x64xbf16>
      %45 = vector.shape_cast %42 : vector<128x64xbf16> to vector<1x128x64xbf16>
      tpu.vector_store %arg10[%c0_31, %c0_32, %c0_33], %45 {strides = array<i32>} : memref<1x128x64xbf16, #tpu.memory_space<vmem>>, vector<1x128x64xbf16>,
    } else {
    }
    return
  }
  func.func @transform_0(%arg0: i32, %arg1: i32, %arg2: i32) -> (i32, i32, i32) {
    %0 = arith.addi %arg1, %arg2 : i32
    %c2_i32 = arith.constant 2 : i32
    %c0_i32 = arith.constant 0 : i32
    %1 = arith.cmpi eq, %c2_i32, %c0_i32 : i32
    %c1_i32 = arith.constant 1 : i32
    %2 = arith.select %1, %c1_i32, %c2_i32 : i32
    %3 = arith.remsi %0, %2 : i32
    %c0_i32_0 = arith.constant 0 : i32
    %4 = arith.cmpi ne, %3, %c0_i32_0 : i32
    %c0_i32_1 = arith.constant 0 : i32
    %5 = arith.cmpi slt, %3, %c0_i32_1 : i32
    %c0_i32_2 = arith.constant 0 : i32
    %6 = arith.cmpi slt, %2, %c0_i32_2 : i32
    %7 = arith.xori %5, %6 : i1
    %8 = arith.andi %7, %4 : i1
    %9 = arith.addi %3, %2 : i32
    %10 = arith.select %8, %9, %3 : i32
    %c0_i32_3 = arith.constant 0 : i32
    %c0_i32_4 = arith.constant 0 : i32
    return %arg0, %10, %c0_i32_3 : i32, i32, i32
  }
  func.func @transform_1(%arg0: i32, %arg1: i32, %arg2: i32) -> (i32, i32) {
    %c0_i32 = arith.constant 0 : i32
    %c0_i32_0 = arith.constant 0 : i32
    %c0_i32_1 = arith.constant 0 : i32
    return %c0_i32, %c0_i32_0 : i32, i32
  }
  func.func @transform_2(%arg0: i32, %arg1: i32, %arg2: i32) -> (i32, i32) {
    %c0_i32 = arith.constant 0 : i32
    %c0_i32_0 = arith.constant 0 : i32
    %c0_i32_1 = arith.constant 0 : i32
    return %c0_i32, %c0_i32_0 : i32, i32
  }
  func.func @transform_3(%arg0: i32, %arg1: i32, %arg2: i32) -> (i32, i32) {
    %0 = arith.addi %arg1, %arg2 : i32
    %c2_i32 = arith.constant 2 : i32
    %c0_i32 = arith.constant 0 : i32
    %1 = arith.cmpi eq, %c2_i32, %c0_i32 : i32
    %c1_i32 = arith.constant 1 : i32
    %2 = arith.select %1, %c1_i32, %c2_i32 : i32
    %3 = arith.remsi %0, %2 : i32
    %c0_i32_0 = arith.constant 0 : i32
    %4 = arith.cmpi ne, %3, %c0_i32_0 : i32
    %c0_i32_1 = arith.constant 0 : i32
    %5 = arith.cmpi slt, %3, %c0_i32_1 : i32
    %c0_i32_2 = arith.constant 0 : i32
    %6 = arith.cmpi slt, %2, %c0_i32_2 : i32
    %7 = arith.xori %5, %6 : i1
    %8 = arith.andi %7, %4 : i1
    %9 = arith.addi %3, %2 : i32
    %10 = arith.select %8, %9, %3 : i32
    %c0_i32_3 = arith.constant 0 : i32
    %c0_i32_4 = arith.constant 0 : i32
    return %c0_i32_3, %10 : i32, i32
  }
  func.func @transform_4(%arg0: i32, %arg1: i32, %arg2: i32) -> (i32, i32) {
    %0 = arith.addi %arg1, %arg2 : i32
    %c2_i32 = arith.constant 2 : i32
    %c0_i32 = arith.constant 0 : i32
    %1 = arith.cmpi eq, %c2_i32, %c0_i32 : i32
    %c1_i32 = arith.constant 1 : i32
    %2 = arith.select %1, %c1_i32, %c2_i32 : i32
    %3 = arith.remsi %0, %2 : i32
    %c0_i32_0 = arith.constant 0 : i32
    %4 = arith.cmpi ne, %3, %c0_i32_0 : i32
    %c0_i32_1 = arith.constant 0 : i32
    %5 = arith.cmpi slt, %3, %c0_i32_1 : i32
    %c0_i32_2 = arith.constant 0 : i32
    %6 = arith.cmpi slt, %2, %c0_i32_2 : i32
    %7 = arith.xori %5, %6 : i1
    %8 = arith.andi %7, %4 : i1
    %9 = arith.addi %3, %2 : i32
    %10 = arith.select %8, %9, %3 : i32
    %c0_i32_3 = arith.constant 0 : i32
    %c0_i32_4 = arith.constant 0 : i32
    return %c0_i32_3, %10 : i32, i32
  }
  func.func @transform_5(%arg0: i32, %arg1: i32, %arg2: i32) -> (i32, i32) {
    %c0_i32 = arith.constant 0 : i32
    %c0_i32_0 = arith.constant 0 : i32
    %c0_i32_1 = arith.constant 0 : i32
    return %c0_i32, %c0_i32_0 : i32, i32
  }
  func.func @transform_6(%arg0: i32, %arg1: i32, %arg2: i32) -> (i32, i32, i32) {
    %c0_i32 = arith.constant 0 : i32
    %c0_i32_0 = arith.constant 0 : i32
    %c0_i32_1 = arith.constant 0 : i32
    return %arg0, %c0_i32, %c0_i32_0 : i32, i32, i32
  }
  func.func @transform_7(%arg0: i32, %arg1: i32, %arg2: i32) -> (i32, i32, i32) {
    %c0_i32 = arith.constant 0 : i32
    %c0_i32_0 = arith.constant 0 : i32
    return %arg0, %arg1, %c0_i32 : i32, i32, i32
  }
  func.func @transform_8(%arg0: i32, %arg1: i32, %arg2: i32) -> (i32, i32, i32) {
    %0 = arith.addi %arg1, %arg2 : i32
    %c2_i32 = arith.constant 2 : i32
    %c0_i32 = arith.constant 0 : i32
    %1 = arith.cmpi eq, %c2_i32, %c0_i32 : i32
    %c1_i32 = arith.constant 1 : i32
    %2 = arith.select %1, %c1_i32, %c2_i32 : i32
    %3 = arith.remsi %0, %2 : i32
    %c0_i32_0 = arith.constant 0 : i32
    %4 = arith.cmpi ne, %3, %c0_i32_0 : i32
    %c0_i32_1 = arith.constant 0 : i32
    %5 = arith.cmpi slt, %3, %c0_i32_1 : i32
    %c0_i32_2 = arith.constant 0 : i32
    %6 = arith.cmpi slt, %2, %c0_i32_2 : i32
    %7 = arith.xori %5, %6 : i1
    %8 = arith.andi %7, %4 : i1
    %9 = arith.addi %3, %2 : i32
    %10 = arith.select %8, %9, %3 : i32
    %c0_i32_3 = arith.constant 0 : i32
    return %arg0, %arg1, %10 : i32, i32, i32
  }
}

</mosaic_0001>

<bundles_post_ra>
// kernel: tpu_custom_call.1
= control target key start
LH: loop header
LB: loop body
LE: loop exit
PB: predicated region body
PF: predicated region fallthrough
CT: control target
= control target key end

     0   :  { %6 = vsyncpa [#allocation3], 0  ;;  %s305_s0 = inlined_call_operand.hbm [shape: f32[8,128], index: 0, kind: input, shape index: {}]   ;;  %s306_s1 = inlined_call_operand.hbm [shape: f32[8,128], index: 1, kind: output, shape index: {}]  }
   0x1   :  { %7 = vsyncpa [#allocation4], 0  ;;  %s258_s6 = smov 0  }
   0x2 LB: > { %s145_s7 = sadd.s32 4294967295, %s244_s6   ;;  %p146_p0 = scmp.ge.s32.totalorder %s244_s6, 1  ;;  %s244_s6 = sphi %s258_s6, %s13_s6  }
   0x3   : > { %p60_p1 = scmp.lt.s32.totalorder %s244_s6, 3  ;;  %p270_p3 = scmp.eq.s32.totalorder %s145_s7, 0 }
   0x4   : > { %s246_s10 = smov [#allocation2]  }
   0x5   : > { %p266_p2 = pnand %p146_p0, %p60_p1  ;;  %s73_s11 = sshll.u32 %s246_s10, 4  ;;  %s74_s11 = int_to_ptr.vmem [resolvable:$true] %s73_s11 }
   0x6   : > { %s191_s12 = scalar_lea.vmem %s74_s11, 128  ;;  %p199_p10 = scmp.lt.s32.totalorder %s74_s11, %s74_s11 }
   0x7   : > { %p162_p4 = pneg %p266_p2  ;;  %p192_p7 = scmp.ne.s32.totalorder %s74_s11, %s191_s12 }
   0x8   : > { %p200_p11 = scmp.lt.s32.totalorder %s191_s12, %s191_s12 }
   0x9   : > { %p163_p5 = pnand %p270_p3, %p162_p4 }
   0xa   : > { %p201_p12 = por %p200_p11, %p199_p10 }
   0xb   : > { %p182_p6 = pneg %p163_p5 }
   0xd   : > { %p194_p8 = pnand %p192_p7, %p182_p6 }
   0xf   : > { %p195_p9 = pneg %p194_p8 }
  0x11   : > { %p202_p13 = pnand %p201_p12, %p195_p9 }
  0x13   : > { %205 = shalt.err (!%p202_p13)
}
  0x14   : > { %165 = dma.hbm_to_vmem [thread:$0]  (!%p163_p5), %s305_s0, 128, %s74_s11, [#allocation3]  }
  0x15   : > { %86 = sbr.rel (%p266_p2) target bundleno = 42 (0x2a), region = 24 }
  0x1a   : > { %235 = dma.done.wait (%p270_p3), [#allocation3], 128  }
  0x1b   : > { %237 = vsyncadd (%p270_p3), [#allocation3], 4294967168  ;;  %s247_s15 = smov [#allocation5]   ;;  %v96_v0 = vld [vmem:[#allocation2] sm:$0xff]  ;;  %p287_p0 = scmp.eq.s32.totalorder %s145_s7, 1 }
  0x1c   : > { %s106_s16 = sshll.u32 %s247_s15, 4  ;;  %v97_v1 = vadd.f32 1.0, %v96_v0  ;;  %s107_s16 = int_to_ptr.vmem [resolvable:$true] %s106_s16 }
  0x1d   : > { %s206_s18 = scalar_lea.vmem %s107_s16, 128  ;;  %p213_p5 = scmp.lt.s32.totalorder %s107_s16, %s107_s16 }
  0x1e   : > { %98 = vst [vmem:[#allocation5] sm:$0xff] %v97_v1  ;;  %p207_p1 = scmp.ne.s32.totalorder %s107_s16, %s206_s18  ;;  %p214_p6 = scmp.lt.s32.totalorder %s206_s18, %s206_s18 }
  0x20   : > { %p208_p2 = pnand %p207_p1, %p287_p0  ;;  %p215_p7 = por %p214_p6, %p213_p5 }
  0x22   : > { %p209_p4 = pneg %p208_p2 }
  0x24   : > { %p216_p3 = pnand %p215_p7, %p209_p4 }
  0x26   : > { %219 = shalt.err (!%p216_p3)
}
  0x27   : > { %159 = dma.vmem_to_hbm [thread:$0]  (%p287_p0), %s107_s16, 128, %s306_s1, [#allocation4]  }
  0x28   : > { %239 = dma.done.wait (%p287_p0), [#allocation4], 128  }
  0x29   : > { %241 = vsyncadd (%p287_p0), [#allocation4], 4294967168 }
  0x2a PF: > { %s13_s6 = sadd.s32 1, %s244_s6  }
  0x2b   : > { %p10_p8 = scmp.ge.s32.totalorder %s13_s6, 4  }
  0x2d   :  { %12 = sbr.rel (!%p10_p8) target bundleno = 2 (0x2), region = 53 }
  0x32   :  { %119 = vsyncpa [#allocation3], 1 }
  0x33   :  { %121 = vsyncpa [#allocation3 + $0x1], 1 }
  0x34   :  { %122 = vsyncpa [#allocation4], 1 }
  0x35   :  { %124 = vsyncpa [#allocation4 + $0x1], 1 }

// kernel: neg.2
= control target key start
LH: loop header
LB: loop body
LE: loop exit
PB: predicated region body
PF: predicated region fallthrough
CT: control target
= control target key end

     0   :  { %2 = vsyncpa [#allocation1], 0  ;;  %s86_s6 = smov [#allocation0]   ;;  %s115_s0 = inlined_call_operand.hbm [shape: bf16[32,32], index: 0, kind: input, shape index: {}]   ;;  %s116_s1 = inlined_call_operand.vmem [shape: bf16[32,32], index: 1, kind: output, shape index: {}]  }
   0x1   :  { %s6_s7 = sshll.u32 %s86_s6, 4  ;;  %s7_s7 = int_to_ptr.vmem [resolvable:$true] %s6_s7 }
   0x2   :  { %s72_s8 = scalar_lea.vmem %s7_s7, 256  ;;  %p77_p1 = scmp.lt.s32.totalorder %s7_s7, %s7_s7 }
   0x3   :  { %p73_p0 = scmp.ne.s32.totalorder %s7_s7, %s72_s8  ;;  %p78_p2 = scmp.lt.s32.totalorder %s72_s8, %s72_s8 }
   0x5   :  { %p79_p3 = por %p78_p2, %p77_p1 }
   0x7   :  { %p80_p4 = pnand %p79_p3, %p73_p0 }
   0x9   :  { %83 = shalt.err (!%p80_p4)
}
   0xa   :  { %s87_s9 = smov 64   ;;  %s88_s10 = smov 4  }
   0xb   :  { %12 = dma.hbm_to_vmem [thread:$0]  %s115_s0, 256, %s7_s7, [#allocation1], %s87_s9, %s87_s9, %s88_s10  }
   0xc   :  { %84 = dma.done.wait [#allocation1], 256  }
   0xd   :  { %85 = vsyncadd [#allocation1], 4294967040  ;;  %v14_v0 = vld [vmem:[#allocation0] sm:$0xff]   ;;  %v35_v1 = vld [vmem:[#allocation0 + $0x8] sm:$0xff]   ;;  %v89_v10 = vmov 0.0  }
   0xe   :  { %v15_v2 = vunpack.c.l.bf16 %v14_v0  ;;  %v25_v3 = vunpack.c.h.bf16 %v14_v0  ;;  %v36_v4 = vunpack.c.l.bf16 %v35_v1  ;;  %v47_v5 = vunpack.c.h.bf16 %v35_v1 }
  0x10   :  { %v19_v6 = vxor.u32 2147483648, %v15_v2  ;;  %v29_v7 = vxor.u32 2147483648, %v25_v3  ;;  %v40_v8 = vxor.u32 2147483648, %v36_v4  ;;  %v51_v9 = vxor.u32 2147483648, %v47_v5 }
  0x12   :  { %v21_v11 = vpack.c.bf16 %v89_v10, %v19_v6  ;;  %v32_v12 = vpack.c.bf16 %v89_v10, %v29_v7  ;;  %v43_v13 = vpack.c.bf16 %v89_v10, %v40_v8  ;;  %v54_v14 = vpack.c.bf16 %v89_v10, %v51_v9 }
  0x14   :  { %22 = vst [vmem:[%s116_s1] sm:$0xf] %v21_v11  ;;  %57 = vst [vmem:[%s116_s1 + $0x4] sm:$0xf] %v32_v12 }
  0x15   :  { %58 = vst [vmem:[%s116_s1 + $0x8] sm:$0xf] %v43_v13  ;;  %59 = vst [vmem:[%s116_s1 + $0xc] sm:$0xf] %v54_v14 }
  0x16   :  { %56 = vsyncpa [#allocation1], 1 }

// kernel: object_context.3
= control target key start
LH: loop header
LB: loop body
LE: loop exit
PB: predicated region body
PF: predicated region fallthrough
CT: control target
= control target key end

     0   :  { %s2848_s0 = inlined_call_operand.vmem [shape: f32[2,16,1296], index: 0, kind: input, shape index: {}]   ;;  %s2849_s1 = inlined_call_operand.vmem [shape: bf16[32,16], index: 1, kind: input, shape index: {}]   ;;  %s2850_s2 = inlined_call_operand.vmem [shape: f32[32,1], index: 2, kind: input, shape index: {}]   ;;  %s2851_s3 = inlined_call_operand.vmem [shape: bf16[2,32,1296], index: 3, kind: output, shape index: {}]  }
   0x1   :  { %2853 = sst [smem:[#allocation5_spill]] %s2848_s0 }
   0x2   :  { %s2255_s12 = smov 0   ;;  %s2257_s13 = smov 0  }
   0x3   :  { %s2259_s14 = smov 0   ;;  %s2261_s15 = smov 0  }
   0x4   :  { %s2263_s16 = smov 0   ;;  %s2265_s17 = smov 0  }
   0x5   :  { %s2267_s18 = smov 0  }
   0x6 LB: > { %s22_s19 = sadd.s32 1, %s2124_s16  ;;  %s25_s20 = sadd.s32 1, %s2128_s17  ;;  %s2132_s18 = sphi %s2267_s18, %s13_s18   ;;  %s2128_s17 = sphi %s2265_s17, %s2876_s17   ;;  %s2124_s16 = sphi %s2263_s16, %s2875_s16   ;;  %s2120_s15 = sphi %s2261_s15, %s2874_s15   ;;  %s2116_s14 = sphi %s2259_s14, %s2873_s14   ;;  %s2112_s13 = sphi %s2257_s13, %s2872_s13   ;;  %s2108_s12 = sphi %s2255_s12, %s2871_s12  }
   0x7   : > { %p23_p0 = scmp.ge.s32.totalorder %s22_s19, 3  ;;  %s1530_s21 = sadd.s32 4294967295, %s2132_s18  }
   0x8   : > { %p41_p1 = scmp.ne.s32.totalorder %s2112_s13, %s2108_s12  ;;  %p42_p2 = scmp.eq.s32.totalorder %s2132_s18, 0 }
   0x9   : > { %s2878_s19 = smov (%p23_p0, %s22_s19), 0  ;;  %s2880_s20 = smov (!%p23_p0, %s25_s20), %s2128_s17 }
   0xa   : > { %p27_p3 = scmp.ge.s32.totalorder %s2880_s20, 2  ;;  %p115_p4 = scmp.eq.s32.totalorder %s1530_s21, 5 }
   0xb   : > { %s30_s22 = ssub.s32 %s2124_s16, %s2878_s19  ;;  %p43_p5 = por %p42_p2, %p41_p1 }
   0xc   : > { %s2882_s20 = smov (%p27_p3, %s2880_s20), 0  ;;  %p2303_p6 = por %p115_p4, %p41_p1 }
   0xd   : > { %2854 = sst [smem:[#allocation4_spill]] %s2882_s20  ;;  %s29_s24 = ssub.s32 %s2128_s17, %s2882_s20 }
   0xe   : > { %s31_s25 = sor.u32 %s30_s22, %s29_s24  ;;  %s34_s26 = sadd.s32 1, %s2112_s13 }
   0xf   : > { %p32_p7 = scmp.eq.s32.totalorder %s31_s25, 0  ;;  %p1533_p8 = scmp.ge.s32.totalorder %s2132_s18, 6 }
  0x11   : > { %s2311_s27 = scalar_select %p32_p7, %s2112_s13, %s34_s26  }
  0x12   : > { %143 = sbr.rel (%p1533_p8) target bundleno = 93 (0x5d), region = 24 }
  0x17   : > { %146 = sbr.rel (!%p43_p5) target bundleno = 93 (0x5d), region = 28  ;;  %s148_s28 = sand.u32 (%p43_p5), 1, %s2112_s13  }
  0x18   : > { %s1535_s29 = sshll.u32 (%p43_p5), %s2124_s16, 2  ;;  %s1534_s30 = sshll.u32 (%p43_p5), %s148_s28, 6 }
  0x19   : > { %s152_s4 = ssub.s32 (%p43_p5), 11, %s1535_s29  ;;  %s1627_s5 = smul.u32 (%p43_p5), 22, %s2128_s17 }
  0x1a   : > { %p153_p9 = scmp.lt.s32.totalorder (%p43_p5), %s152_s4, 4  ;;  %s2856_s0 = sld [smem:[#allocation5_spill]] (%p43_p5) }
  0x1b   : > { %s158_s6 = sadd.s32 (%p43_p5), %s1627_s5, %s1535_s29  ;;  %s2324_s22 = scalar_lea.vmem (%p43_p5), [#allocation2], %s1534_s30  }
  0x1c   : > { %s2884_s4 = smov (!%p153_p9, %s152_s4), 4  ;;  %s1538_s8 = sshll.u32 %s158_s6, 3 }
  0x1d   : > { %s1536_s7 = sshll.u32 %s2884_s4, 8  ;;  %s2322_s21 = sshll.u32 %s2884_s4, 3 }
  0x1e   : > { %p1540_p10 = scmp.eq.s32.totalorder %s1536_s7, 0 }
  0x1f   : > { %p165_p11 = scmp.lt.u32.totalorder (!%p1540_p10), %s2322_s21, 8 }
  0x20   : > { %s2320_s11 = scalar_lea.vmem %s2856_s0, %s1538_s8   ;;  %164 = sbr.rel (%p1540_p10) target bundleno = 93 (0x5d), region = 32 }
  0x25   : > { %168 = sbr.rel (%p165_p11) target bundleno = 84 (0x54), region = 36  ;;  %s2328_s24 = sand.u32 (!%p165_p11), 7, %s2322_s21  }
  0x26   : > { %p187_p12 = scmp.eq.s32.totalorder (!%p165_p11), %s2328_s24, 0  ;;  %p1541_p13 = scmp.ne.s32.totalorder (!%p165_p11), %s2328_s24, 0 }
  0x2a   : > { %190 = sbr.rel (%p1541_p13) target bundleno = 60 (0x3c), region = 51  ;;  %s191_s25 = sshrl.u32 (!%p1541_p13), %s2322_s21, 3 }
  0x2b   : > { %s192_s26 = sshrl.u32 (!%p1541_p13), %s191_s25, 5  ;;  %s2333_s28 = sand.u32 (!%p1541_p13), 31, %s191_s25  }
  0x2c   : > { %s1611_s29 = sshll.u32 (!%p1541_p13), %s192_s26, 12  ;;  %p1548_p0 = scmp.le.s32.totalorder (!%p1541_p13), %s2333_s28, 0 }
  0x2d   : > { %s343_s30 = sshra.s32 (!%p1541_p13), %s1611_s29, 4 }
  0x2e   : > { %s2336_s4 = scalar_lea.vmem (!%p1541_p13), %s2320_s11, %s343_s30   ;;  %s347_s5 = scalar_lea.vmem (!%p1541_p13), %s2324_s22, %s343_s30 [#allocation2]  }
  0x2f   : > { %1405 = sbr.rel (%p1548_p0) target bundleno = 60 (0x3c), region = 240  ;;  %s2134_s6 = smov (!%p1548_p0), %s347_s5  }
  0x30   : > { %s2138_s7 = smov (!%p1548_p0), %s2336_s4   ;;  %s2142_s8 = smov (!%p1548_p0), 0  }
  0x31   : > { %s2146_s9 = smov (!%p1548_p0), 0  }
  0x34 LB: >> { %v359_v0 = vld [vmem:[%s2140_s7] sm:$0xff]  ;;  %v361_v1 = vld [vmem:[%s2140_s7 + $0x58] sm:$0xff]  ;;  %s363_s10 = sadd.s32 1, %s2144_s8  ;;  %s353_s9 = sadd.s32 1, %s2148_s9   ;;  %s2148_s9 = sphi %s2146_s9, %s353_s9   ;;  %s2144_s8 = sphi %s2142_s8, %s2143_s8   ;;  %s2140_s7 = sphi %s2138_s7, %s368_s7   ;;  %s2136_s6 = sphi %s2134_s6, %s369_s6  }
  0x35   : >> { %360 = vst [vmem:[%s2136_s6] sm:$0xff] %v359_v0  ;;  %362 = vst [vmem:[%s2136_s6 + $0x20] sm:$0xff] %v361_v1  ;;  %p364_p1 = scmp.ge.s32.totalorder %s363_s10, %s2333_s28  ;;  %p352_p2 = scmp.ge.s32.totalorder %s353_s9, %s2333_s28 }
  0x37   : >> { %s2886_s10 = smov (%p364_p1, %s363_s10), 0  ;;  %355 = sbr.rel (!%p352_p2) target bundleno = 52 (0x34), region = 246 }
  0x38   : >> { %s1549_s25 = sshll.u32 %s2886_s10, 3  ;;  %s2143_s8 = smov %s2886_s10  }
  0x39   : >> { %s368_s7 = scalar_lea.vmem %s2336_s4, %s1549_s25   ;;  %s369_s6 = scalar_lea.vmem %s347_s5, %s1549_s25 [#allocation2]  }
  0x3c PF: > { %372 = sbr.rel (%p187_p12) target bundleno = 84 (0x54), region = 69  ;;  %s374_s26 = ssub.s32 (!%p187_p12), %s2322_s21, %s2328_s24 }
  0x3d   : > { %s378_s29 = sshrl.u32 (!%p187_p12), %s2322_s21, 3  ;;  %s2350_s30 = scalar_lea.vmem (!%p187_p12), %s2320_s11, %s374_s26 }
  0x3e   : > { %s2353_s6 = scalar_lea.vmem (!%p187_p12), %s2324_s22, %s374_s26 [#allocation2]  ;;  %s379_s7 = sshrl.u32 (!%p187_p12), %s378_s29, 5 }
  0x3f   : > { %s2355_s8 = sand.u32 (!%p187_p12), 31, %s378_s29   ;;  %s1613_s28 = sshll.u32 (!%p187_p12), %s379_s7, 12 }
  0x40   : > { %s530_s4 = sshra.s32 (!%p187_p12), %s1613_s28, 4  ;;  %p1557_p3 = scmp.le.s32.totalorder (!%p187_p12), %s2355_s8, 0 }
  0x41   : > { %s2358_s5 = scalar_lea.vmem %s2320_s11, %s530_s4   ;;  %s534_s9 = scalar_lea.vmem %s2324_s22, %s530_s4 [#allocation2]  }
  0x42   : > { %1433 = sbr.rel (%p1557_p3) target bundleno = 79 (0x4f), region = 262  ;;  %s2150_s10 = smov (!%p1557_p3), %s534_s9  }
  0x43   : > { %s2154_s25 = smov (!%p1557_p3), %s2358_s5   ;;  %s2158_s0 = smov (!%p1557_p3), 0  }
  0x44   : > { %s2162_s20 = smov (!%p1557_p3), 0  }
  0x47 LB: >> { %v546_v2 = vld [vmem:[%s2156_s25] sm:$0xff]  ;;  %v548_v3 = vld [vmem:[%s2156_s25 + $0x58] sm:$0xff]  ;;  %s550_s26 = sadd.s32 1, %s2160_s0  ;;  %s540_s20 = sadd.s32 1, %s2164_s20   ;;  %s2164_s20 = sphi %s2162_s20, %s540_s20   ;;  %s2160_s0 = sphi %s2158_s0, %s2159_s0   ;;  %s2156_s25 = sphi %s2154_s25, %s555_s25   ;;  %s2152_s10 = sphi %s2150_s10, %s556_s10  }
  0x48   : >> { %547 = vst [vmem:[%s2152_s10] sm:$0xff] %v546_v2  ;;  %549 = vst [vmem:[%s2152_s10 + $0x20] sm:$0xff] %v548_v3  ;;  %p551_p4 = scmp.ge.s32.totalorder %s550_s26, %s2355_s8  ;;  %p539_p5 = scmp.ge.s32.totalorder %s540_s20, %s2355_s8 }
  0x4a   : >> { %s2888_s26 = smov (%p551_p4, %s550_s26), 0  ;;  %542 = sbr.rel (!%p539_p5) target bundleno = 71 (0x47), region = 268 }
  0x4b   : >> { %s1558_s29 = sshll.u32 %s2888_s26, 3  ;;  %s2159_s0 = smov %s2888_s26  }
  0x4c   : >> { %s555_s25 = scalar_lea.vmem %s2358_s5, %s1558_s29   ;;  %s556_s10 = scalar_lea.vmem %s534_s9, %s1558_s29 [#allocation2]  }
  0x4f PF: > { %s2230_s7 = smov 1  }
  0x50   : > { %s557_s0 = sshll.u32 %s2230_s7, %s2328_s24 }
  0x51   : > { %s1560_s28 = sadd.s32 4294967295, %s557_s0 }
  0x52   : > { %v567_v4 = vld [vmem:[%s2350_s30] sm:%s1560_s28]  ;;  %v569_v5 = vld [vmem:[%s2350_s30 + $0x58] sm:%s1560_s28] }
  0x53   : > { %568 = vst [vmem:[%s2353_s6] sm:%s1560_s28] %v567_v4  ;;  %570 = vst [vmem:[%s2353_s6 + $0x20] sm:%s1560_s28] %v569_v5 }
  0x54 PF: > { %p1561_p7 = scmp.ge.u32.totalorder %s2322_s21, 8 }
  0x55   : > { %s2231_s20 = smov (!%p1561_p7), 1  }
  0x56   : > { %171 = sbr.rel (%p1561_p7) target bundleno = 93 (0x5d), region = 40  ;;  %s172_s8 = sshll.u32 (!%p1561_p7), %s2231_s20, %s2322_s21 }
  0x57   : > { %s1562_s4 = sadd.s32 (!%p1561_p7), 4294967295, %s172_s8 }
  0x5b   : > { %v182_v6 = vld [vmem:[%s2320_s11] sm:%s1562_s4]  ;;  %v184_v7 = vld [vmem:[%s2320_s11 + $0x58] sm:%s1562_s4] }
  0x5c   : > { %183 = vst [vmem:[%s2324_s22] sm:%s1562_s4] %v182_v6  ;;  %185 = vst [vmem:[%s2324_s22 + $0x20] sm:%s1562_s4] %v184_v7 }
  0x5d PF: > { %p1563_p8 = scmp.ge.s32.totalorder %s2132_s18, 1  ;;  %p573_p9 = scmp.lt.s32.totalorder %s2132_s18, 7 }
  0x5f   : > { %p574_p10 = pnand %p1563_p8, %p573_p9 }
  0x60   : > { %s580_s24 = sand.u32 (!%p574_p10), 1, %s2108_s12  }
  0x61   : > { %577 = sbr.rel (%p574_p10) target bundleno = 475 (0x1db), region = 94  ;;  %s2380_s30 = sshll.u32 (!%p574_p10), %s580_s24, 6 }
  0x62   : > { %s582_s22 = scalar_lea.vmem (!%p574_p10), [#allocation2], %s2380_s30  ;;  %s2402_s28 = scalar_lea.vmem (!%p574_p10), [#allocation3], %s2380_s30  }
  0x66   : > { %v2232_v8 = vmov 0   ;;  %v629_v9 = vld [vmem:[%s2850_s2] sm:$0xff]  ;;  %v614_v10 = vld [vmem:[%s582_s22 + $0x8] sm:$0xff]  ;;  %v616_v12 = vld [vmem:[%s582_s22 + $0x18] sm:$0xff]  ;;  %vm663_vm0 = vcmask 130048   ;;  %s1581_s20 = sshll.u32 (%p2303_p6), %s2116_s14, 2 }
  0x67   : > { %702 = vmatprep.mubr.bf16.mxu0 %v2232_v8  ;;  %755 = vmatprep.mubr.bf16.mxu1 %v2232_v8  ;;  %v618_v11 = vld [vmem:[%s582_s22 + $0x28] sm:$0xff]  ;;  %v620_v15 = vld [vmem:[%s582_s22 + $0x38] sm:$0xff]  ;;  %v613_v16 = vld [vmem:[%s582_s22] sm:$0xff]  ;;  %s1628_s8 = smul.u32 (%p2303_p6), 44, %s2120_s15  ;;  %s856_s4 = ssub.s32 (%p2303_p6), 11, %s1581_s20 }
  0x68   : > { %1946 = vset.pattern.permute.xlu0 %v2232_v8  ;;  %1947 = vset.pattern.permute.xlu1 %v2232_v8  ;;  %v630_v13 = vld [vmem:[%s2850_s2 + $0x8] sm:$0xff]  ;;  %v622_v14 = vpack.c.bf16 %v618_v11, %v614_v10  ;;  %v617_v17 = vld [vmem:[%s582_s22 + $0x20] sm:$0xff]  ;;  %v624_v18 = vpack.c.bf16 %v620_v15, %v616_v12  ;;  %v615_v20 = vld [vmem:[%s582_s22 + $0x10] sm:$0xff]  ;;  %p857_p11 = scmp.lt.s32.totalorder (%p2303_p6), %s856_s4, 4 }
  0x69   : > { %635 = vperm.xlu0 %1946, %v629_v9   ;;  %v621_v19 = vpack.c.bf16 %v617_v17, %v613_v16  ;;  %v619_v21 = vld [vmem:[%s582_s22 + $0x30] sm:$0xff]  ;;  %v1948_v24 = vld [vmem:[%s2849_s1] sm:$0xff]   ;;  %v632_v25 = vld [vmem:[%s2850_s2 + $0x18] sm:$0xff]  ;;  %s862_s24 = sadd.s32 (%p2303_p6), %s1628_s8, %s1581_s20 }
  0x6a   : > { %v631_v22 = vld [vmem:[%s2850_s2 + $0x10] sm:$0xff]  ;;  %684 = vmatprep.subr.bf16.mxu0 %v622_v14  ;;  %v623_v23 = vpack.c.bf16 %v619_v21, %v615_v20  ;;  %737 = vmatprep.subr.bf16.mxu1 %v624_v18  ;;  %v1949_v26 = vld [vmem:[%s2849_s1 + $0x8] sm:$0xff]   ;;  %s1584_s30 = sshll.u32 (%p2303_p6), %s862_s24, 2 }
  0x6b   : > { %645 = vperm.xlu1 %1947, %v631_v22   ;;  %685 = vmatpush1.bf16.msra.mxu0 %v621_v19  ;;  %s2419_s22 = scalar_lea.vmem (%p2303_p6), %s2851_s3, %s1584_s30  }
  0x6c   : > { %738 = vmatpush1.bf16.msra.mxu1 %v623_v23 }
  0x6d   : > { %640 = vperm.xlu0 %1946, %v630_v13  }
  0x6e   : > { %1568 = vmatmul.mubr.msk.bf16.vlgmr.msra.gmra.mxu0 %vm663_vm0, %v1948_v24 }
  0x6f   : > { %650 = vperm.xlu1 %1947, %v632_v25   ;;  %1570 = vmatmul.mubr.msk.bf16.vlgmr.msra.gmra.mxu1 %vm663_vm0, %v1948_v24 }
  0x70   : > { %712 = vmatprep.mubr.bf16.mxu0 %v2232_v8  ;;  %765 = vmatprep.mubr.bf16.mxu1 %v2232_v8 }
  0x76   : > { %1569 = vmatmul.mubr.msk.bf16.gmra.mxu0 %vm663_vm0, %v1949_v26 }
  0x77   : > { %1571 = vmatmul.mubr.msk.bf16.gmra.mxu1 %vm663_vm0, %v1949_v26 }
  0xe4   : > { %v636_v27 = vpop.permute.xlu0 %635 }
  0xe6   : > { %v646_v45 = vpop.permute.xlu1 %645 }
  0xe8   : > { %v641_v33 = vpop.permute.xlu0 %640 }
  0xea   : > { %v651_v1 = vpop.permute.xlu1 %650 }
 0x12e   : > { %v704_v28 = vpop.f32.mrf.mxu0 }
 0x12f   : > { %v705_v29 = vadd.f32 %v704_v28, %v636_v27  ;;  %v757_v30 = vpop.f32.mrf.mxu1 }
 0x130   : > { %v758_v31 = vadd.f32 %v757_v30, %v636_v27  ;;  %v706_v32 = vpop.f32.mrf.mxu0 }
 0x131   : > { %v707_v34 = vadd.f32 %v706_v32, %v636_v27  ;;  %v759_v35 = vpop.f32.mrf.mxu1  ;;  %v776_v38 = vmax.f32 %v705_v29, 0.0 }
 0x132   : > { %v760_v36 = vadd.f32 %v759_v35, %v636_v27  ;;  %v708_v37 = vpop.f32.mrf.mxu0  ;;  %v778_v42 = vmax.f32 %v758_v31, 0.0 }
 0x133   : > { %v777_v39 = vmax.f32 %v707_v34, 0.0  ;;  %v709_v40 = vadd.f32 %v708_v37, %v641_v33  ;;  %v761_v41 = vpop.f32.mrf.mxu1 }
 0x134   : > { %v779_v43 = vmax.f32 %v760_v36, 0.0  ;;  %v762_v44 = vadd.f32 %v761_v41, %v641_v33  ;;  %v710_v46 = vpop.f32.mrf.mxu0 }
 0x135   : > { %v1615_v47 = vpack.c.bf16 %v777_v39, %v776_v38  ;;  %v711_v48 = vadd.f32 %v710_v46, %v641_v33  ;;  %v763_v49 = vpop.f32.mrf.mxu1  ;;  %v780_v53 = vmax.f32 %v709_v40, 0.0 }
 0x136   : > { %v1616_v50 = vpack.c.bf16 %v779_v43, %v778_v42  ;;  %v764_v51 = vadd.f32 %v763_v49, %v641_v33  ;;  %v714_v52 = vpop.f32.mrf.mxu0  ;;  %v782_v57 = vmax.f32 %v762_v44, 0.0 }
 0x137   : > { %840 = vst [vmem:[%s2402_s28] sm:$0xff] %v1615_v47  ;;  %v781_v54 = vmax.f32 %v711_v48, 0.0  ;;  %v715_v55 = vadd.f32 %v714_v52, %v646_v45  ;;  %v767_v56 = vpop.f32.mrf.mxu1 }
 0x138   : > { %841 = vst [vmem:[%s2402_s28 + $0x8] sm:$0xff] %v1616_v50  ;;  %v783_v58 = vmax.f32 %v764_v51, 0.0  ;;  %v768_v59 = vadd.f32 %v767_v56, %v646_v45  ;;  %v716_v60 = vpop.f32.mrf.mxu0 }
 0x139   : > { %v1617_v61 = vpack.c.bf16 %v781_v54, %v780_v53  ;;  %v717_v62 = vadd.f32 %v716_v60, %v646_v45  ;;  %v769_v63 = vpop.f32.mrf.mxu1  ;;  %v784_v4 = vmax.f32 %v715_v55, 0.0 }
 0x13a   : > { %v1618_v0 = vpack.c.bf16 %v783_v58, %v782_v57  ;;  %v770_v2 = vadd.f32 %v769_v63, %v646_v45  ;;  %v718_v3 = vpop.f32.mrf.mxu0  ;;  %v786_v8 = vmax.f32 %v768_v59, 0.0 }
 0x13b   : > { %842 = vst [vmem:[%s2402_s28 + $0x10] sm:$0xff] %v1617_v61  ;;  %v785_v5 = vmax.f32 %v717_v62, 0.0  ;;  %v719_v6 = vadd.f32 %v718_v3, %v651_v1  ;;  %v771_v7 = vpop.f32.mrf.mxu1 }
 0x13c   : > { %843 = vst [vmem:[%s2402_s28 + $0x18] sm:$0xff] %v1618_v0  ;;  %v787_v9 = vmax.f32 %v770_v2, 0.0  ;;  %v772_v10 = vadd.f32 %v771_v7, %v651_v1  ;;  %v720_v11 = vpop.f32.mrf.mxu0 }
 0x13d   : > { %v1619_v12 = vpack.c.bf16 %v785_v5, %v784_v4  ;;  %v721_v13 = vadd.f32 %v720_v11, %v651_v1  ;;  %v773_v14 = vpop.f32.mrf.mxu1  ;;  %v788_v17 = vmax.f32 %v719_v6, 0.0 }
 0x13e   : > { %v1620_v15 = vpack.c.bf16 %v787_v9, %v786_v8  ;;  %v774_v16 = vadd.f32 %v773_v14, %v651_v1  ;;  %v790_v19 = vmax.f32 %v772_v10, 0.0 }
 0x13f   : > { %844 = vst [vmem:[%s2402_s28 + $0x20] sm:$0xff] %v1619_v12  ;;  %v789_v18 = vmax.f32 %v721_v13, 0.0 }
 0x140   : > { %845 = vst [vmem:[%s2402_s28 + $0x28] sm:$0xff] %v1620_v15  ;;  %v791_v20 = vmax.f32 %v774_v16, 0.0  ;;  %854 = sbr.rel (!%p2303_p6) target bundleno = 475 (0x1db), region = 102 }
 0x141   : > { %v1621_v21 = vpack.c.bf16 %v789_v18, %v788_v17 }
 0x142   : > { %v1622_v22 = vpack.c.bf16 %v791_v20, %v790_v19 }
 0x143   : > { %846 = vst [vmem:[%s2402_s28 + $0x30] sm:$0xff] %v1621_v21 }
 0x144   : > { %847 = vst [vmem:[%s2402_s28 + $0x38] sm:$0xff] %v1622_v22 }
 0x145   : > { %s2890_s4 = smov (!%p857_p11, %s856_s4), 4 }
 0x146   : > { %s1582_s6 = sshll.u32 %s2890_s4, 8  ;;  %s2421_s5 = sshll.u32 %s2890_s4, 2 }
 0x147   : > { %p1586_p12 = scmp.eq.s32.totalorder %s1582_s6, 0 }
 0x148   : > { %p869_p6 = scmp.lt.u32.totalorder (!%p1586_p12), %s2421_s5, 8 }
 0x149   : > { %868 = sbr.rel (%p1586_p12) target bundleno = 475 (0x1db), region = 106 }
 0x14e   : > { %872 = sbr.rel (%p869_p6) target bundleno = 464 (0x1d0), region = 110  ;;  %s2425_s14 = sand.u32 (!%p869_p6), 7, %s2421_s5  }
 0x14f   : > { %p895_p13 = scmp.eq.s32.totalorder (!%p869_p6), %s2425_s14, 0  ;;  %p1587_p0 = scmp.ne.s32.totalorder (!%p869_p6), %s2425_s14, 0 }
 0x153   : > { %898 = sbr.rel (%p1587_p0) target bundleno = 398 (0x18e), region = 125  ;;  %s899_s15 = sshrl.u32 (!%p1587_p0), %s2421_s5, 3 }
 0x154   : > { %s2432_s23 = sshrl.u32 (!%p1587_p0), %s899_s15, 4 }
 0x155   : > { %p1588_p1 = scmp.le.s32.totalorder (!%p1587_p0), %s2432_s23, 0 }
 0x158   : > { %1447 = sbr.rel (%p1588_p1) target bundleno = 382 (0x17e), region = 273  ;;  %s2857_s12 = smov (!%p1588_p1), %s2419_s22 }
 0x159   : > { %s2858_s9 = smov (!%p1588_p1), %s2402_s28  ;;  %s2441_s10 = smov (!%p1588_p1), 0  }
 0x15a   : > { %s2443_s25 = smov (!%p1588_p1), 0  }
 0x15d LB: >> { %v2458_v23 = vld [vmem:[%s2172_s9 + $0x78] sm:$0xff]  ;;  %v932_v24 = vld [vmem:[%s2172_s9 + $0x50] sm:$0xff]  ;;  %v936_v26 = vld [vmem:[%s2172_s9 + $0x60] sm:$0xff]  ;;  %s1040_s26 = sadd.s32 1, %s2176_s10  ;;  %s906_s25 = sadd.s32 1, %s2180_s25   ;;  %s2180_s25 = sphi %s2443_s25, %s906_s25   ;;  %s2176_s10 = sphi %s2441_s10, %s2860_s10   ;;  %s2172_s9 = sphi %s2858_s9, %s1045_s9   ;;  %s2168_s12 = sphi %s2857_s12, %s1046_s12  }
 0x15e   : >> { %v934_v25 = vld [vmem:[%s2172_s9 + $0x58] sm:$0xff]  ;;  %943 = vst [vmem:[%s2168_s12 + $0x78] sm:$0xff] %v2458_v23  ;;  %933 = vst [vmem:[%s2168_s12 + $0x50] sm:$0xff] %v932_v24  ;;  %v938_v27 = vld [vmem:[%s2172_s9 + $0x68] sm:$0xff]  ;;  %p2503_p2 = scmp.ge.s32.totalorder %s1040_s26, %s2432_s23  ;;  %p905_p3 = scmp.ge.s32.totalorder %s906_s25, %s2432_s23 }
 0x15f   : >> { %935 = vst [vmem:[%s2168_s12 + $0x58] sm:$0xff] %v934_v25  ;;  %v2469_v28 = vld [vmem:[%s2172_s9 + $0x70] sm:$0xff]  ;;  %971 = vst [vmem:[%s2168_s12 + $0x94] sm:$0xff] %v2458_v23  ;;  %v972_v29 = vld [vmem:[%s2172_s9 + $0x80] sm:$0xff] }
 0x160   : >> { %999 = vst [vmem:[%s2168_s12 + $0xb0] sm:$0xff] %v2458_v23  ;;  %937 = vst [vmem:[%s2168_s12 + $0x60] sm:$0xff] %v936_v26  ;;  %v974_v30 = vld [vmem:[%s2172_s9 + $0x88] sm:$0xff]  ;;  %v924_v32 = vld [vmem:[%s2172_s9 + $0x30] sm:$0xff]  ;;  %s2892_s26 = smov (%p2503_p2, %s1040_s26), 0 }
 0x161   : >> { %939 = vst [vmem:[%s2168_s12 + $0x68] sm:$0xff] %v938_v27  ;;  %941 = vst [vmem:[%s2168_s12 + $0x70] sm:$0xff] %v2469_v28  ;;  %v922_v31 = vld [vmem:[%s2172_s9 + $0x28] sm:$0xff]  ;;  %v926_v33 = vld [vmem:[%s2172_s9 + $0x38] sm:$0xff]  ;;  %s1589_s7 = sshll.u32 %s2892_s26, 7  ;;  %s2860_s10 = smov %s2892_s26 }
 0x162   : >> { %965 = vst [vmem:[%s2168_s12 + $0x7c] sm:$0xff] %v936_v26  ;;  %967 = vst [vmem:[%s2168_s12 + $0x84] sm:$0xff] %v938_v27  ;;  %v928_v34 = vld [vmem:[%s2172_s9 + $0x40] sm:$0xff]  ;;  %v930_v35 = vld [vmem:[%s2172_s9 + $0x48] sm:$0xff] }
 0x163   : >> { %969 = vst [vmem:[%s2168_s12 + $0x8c] sm:$0xff] %v2469_v28  ;;  %973 = vst [vmem:[%s2168_s12 + $0x9c] sm:$0xff] %v972_v29  ;;  %v1004_v36 = vld [vmem:[%s2172_s9 + $0x90] sm:$0xff]  ;;  %v1006_v37 = vld [vmem:[%s2172_s9 + $0x98] sm:$0xff] }
 0x164   : >> { %975 = vst [vmem:[%s2168_s12 + $0xa4] sm:$0xff] %v974_v30  ;;  %923 = vst [vmem:[%s2168_s12 + $0x28] sm:$0xff] %v922_v31  ;;  %v912_v38 = vld [vmem:[%s2172_s9] sm:$0xff]  ;;  %v914_v39 = vld [vmem:[%s2172_s9 + $0x8] sm:$0xff] }
 0x165   : >> { %961 = vst [vmem:[%s2168_s12 + $0x6c] sm:$0xff] %v932_v24  ;;  %963 = vst [vmem:[%s2168_s12 + $0x74] sm:$0xff] %v934_v25  ;;  %v916_v40 = vld [vmem:[%s2172_s9 + $0x10] sm:$0xff]  ;;  %v918_v41 = vld [vmem:[%s2172_s9 + $0x18] sm:$0xff] }
 0x166   : >> { %989 = vst [vmem:[%s2168_s12 + $0x88] sm:$0xff] %v932_v24  ;;  %991 = vst [vmem:[%s2168_s12 + $0x90] sm:$0xff] %v934_v25  ;;  %v920_v42 = vld [vmem:[%s2172_s9 + $0x20] sm:$0xff]  ;;  %v1038_v44 = vld [vmem:[%s2172_s9 + $0xa8] sm:$0xff] }
 0x167   : >> { %1001 = vst [vmem:[%s2168_s12 + $0xb8] sm:$0xff] %v972_v29  ;;  %1003 = vst [vmem:[%s2168_s12 + $0xc0] sm:$0xff] %v974_v30  ;;  %v1036_v43 = vld [vmem:[%s2172_s9 + $0xa0] sm:$0xff]  ;;  %s1045_s9 = scalar_lea.vmem %s2402_s28, %s1589_s7 [#allocation3]  }
 0x168   : >> { %1031 = vst [vmem:[%s2168_s12 + $0xdc] sm:$0xff] %v974_v30  ;;  %925 = vst [vmem:[%s2168_s12 + $0x30] sm:$0xff] %v924_v32 }
 0x169   : >> { %927 = vst [vmem:[%s2168_s12 + $0x38] sm:$0xff] %v926_v33  ;;  %929 = vst [vmem:[%s2168_s12 + $0x40] sm:$0xff] %v928_v34 }
 0x16a   : >> { %955 = vst [vmem:[%s2168_s12 + $0x54] sm:$0xff] %v926_v33  ;;  %957 = vst [vmem:[%s2168_s12 + $0x5c] sm:$0xff] %v928_v34 }
 0x16b   : >> { %993 = vst [vmem:[%s2168_s12 + $0x98] sm:$0xff] %v936_v26  ;;  %995 = vst [vmem:[%s2168_s12 + $0xa0] sm:$0xff] %v938_v27 }
 0x16c   : >> { %997 = vst [vmem:[%s2168_s12 + $0xa8] sm:$0xff] %v2469_v28  ;;  %983 = vst [vmem:[%s2168_s12 + $0x70] sm:$0xff] %v926_v33 }
 0x16d   : >> { %985 = vst [vmem:[%s2168_s12 + $0x78] sm:$0xff] %v928_v34  ;;  %1011 = vst [vmem:[%s2168_s12 + $0x8c] sm:$0xff] %v926_v33 }
 0x16e   : >> { %1021 = vst [vmem:[%s2168_s12 + $0xb4] sm:$0xff] %v936_v26  ;;  %1023 = vst [vmem:[%s2168_s12 + $0xbc] sm:$0xff] %v938_v27 }
 0x16f   : >> { %931 = vst [vmem:[%s2168_s12 + $0x48] sm:$0xff] %v930_v35  ;;  %959 = vst [vmem:[%s2168_s12 + $0x64] sm:$0xff] %v930_v35 }
 0x170   : >> { %987 = vst [vmem:[%s2168_s12 + $0x80] sm:$0xff] %v930_v35  ;;  %1005 = vst [vmem:[%s2168_s12 + $0xc8] sm:$0xff] %v1004_v36 }
 0x171   : >> { %1007 = vst [vmem:[%s2168_s12 + $0xd0] sm:$0xff] %v1006_v37  ;;  %1013 = vst [vmem:[%s2168_s12 + $0x94] sm:$0xff] %v928_v34 }
 0x172   : >> { %1015 = vst [vmem:[%s2168_s12 + $0x9c] sm:$0xff] %v930_v35  ;;  %1017 = vst [vmem:[%s2168_s12 + $0xa4] sm:$0xff] %v932_v24 }
 0x173   : >> { %1019 = vst [vmem:[%s2168_s12 + $0xac] sm:$0xff] %v934_v25  ;;  %1033 = vst [vmem:[%s2168_s12 + $0xe4] sm:$0xff] %v1004_v36 }
 0x174   : >> { %1035 = vst [vmem:[%s2168_s12 + $0xec] sm:$0xff] %v1006_v37  ;;  %913 = vst [vmem:[%s2168_s12] sm:$0xff] %v912_v38 }
 0x175   : >> { %915 = vst [vmem:[%s2168_s12 + $0x8] sm:$0xff] %v914_v39  ;;  %917 = vst [vmem:[%s2168_s12 + $0x10] sm:$0xff] %v916_v40 }
 0x176   : >> { %945 = vst [vmem:[%s2168_s12 + $0x2c] sm:$0xff] %v916_v40  ;;  %951 = vst [vmem:[%s2168_s12 + $0x44] sm:$0xff] %v922_v31 }
 0x177   : >> { %953 = vst [vmem:[%s2168_s12 + $0x4c] sm:$0xff] %v924_v32  ;;  %979 = vst [vmem:[%s2168_s12 + $0x60] sm:$0xff] %v922_v31 }
 0x178   : >> { %981 = vst [vmem:[%s2168_s12 + $0x68] sm:$0xff] %v924_v32  ;;  %1009 = vst [vmem:[%s2168_s12 + $0x84] sm:$0xff] %v924_v32 }
 0x179   : >> { %1025 = vst [vmem:[%s2168_s12 + $0xc4] sm:$0xff] %v2469_v28  ;;  %1027 = vst [vmem:[%s2168_s12 + $0xcc] sm:$0xff] %v2458_v23  ;;  %908 = sbr.rel (!%p905_p3) target bundleno = 349 (0x15d), region = 279 }
 0x17a   : >> { %1029 = vst [vmem:[%s2168_s12 + $0xd4] sm:$0xff] %v972_v29  ;;  %919 = vst [vmem:[%s2168_s12 + $0x18] sm:$0xff] %v918_v41 }
 0x17b   : >> { %921 = vst [vmem:[%s2168_s12 + $0x20] sm:$0xff] %v920_v42  ;;  %947 = vst [vmem:[%s2168_s12 + $0x34] sm:$0xff] %v918_v41 }
 0x17c   : >> { %949 = vst [vmem:[%s2168_s12 + $0x3c] sm:$0xff] %v920_v42  ;;  %977 = vst [vmem:[%s2168_s12 + $0x58] sm:$0xff] %v920_v42 }
 0x17d   : >> { %1037 = vst [vmem:[%s2168_s12 + $0xf4] sm:$0xff] %v1036_v43  ;;  %1039 = vst [vmem:[%s2168_s12 + $0xfc] sm:$0xff] %v1038_v44  ;;  %s1046_s12 = scalar_lea.vmem %s2419_s22, %s1589_s7  }
 0x17e PF: > { %s2585_s0 = sand.u32 15, %s899_s15   ;;  %s1623_s20 = sshll.u32 %s2432_s23, 11 }
 0x17f   : > { %s1051_s8 = sshra.s32 %s1623_s20, 4  ;;  %p1594_p4 = scmp.le.s32.totalorder %s2585_s0, 0 }
 0x180   : > { %s2589_s4 = scalar_lea.vmem %s2402_s28, %s1051_s8 [#allocation3]   ;;  %s2592_s24 = scalar_lea.vmem %s2419_s22, %s1051_s8  }
 0x181   : > { %1461 = sbr.rel (%p1594_p4) target bundleno = 398 (0x18e), region = 284  ;;  %s2861_s30 = smov (!%p1594_p4), %s2592_s24 }
 0x182   : > { %s2862_s11 = smov (!%p1594_p4), %s2589_s4  ;;  %s2601_s21 = smov (!%p1594_p4), 0  }
 0x183   : > { %s2194_s6 = smov (!%p1594_p4), 0  }
 0x186 LB: >> { %v1067_v45 = vld [vmem:[%s2188_s11] sm:$0xff]  ;;  %v1069_v46 = vld [vmem:[%s2188_s11 + $0x10] sm:$0xff]  ;;  %s1075_s15 = sadd.s32 1, %s2192_s21  ;;  %s1061_s6 = sadd.s32 1, %s2196_s6   ;;  %s2196_s6 = sphi %s2194_s6, %s1061_s6   ;;  %s2192_s21 = sphi %s2601_s21, %s2863_s21   ;;  %s2188_s11 = sphi %s2862_s11, %s1080_s11   ;;  %s2184_s30 = sphi %s2861_s30, %s1081_s30  }
 0x187   : >> { %v1071_v47 = vld [vmem:[%s2188_s11 + $0x20] sm:$0xff]  ;;  %1068 = vst [vmem:[%s2184_s30] sm:$0xff] %v1067_v45  ;;  %1070 = vst [vmem:[%s2184_s30 + $0x2c] sm:$0xff] %v1069_v46  ;;  %v1073_v48 = vld [vmem:[%s2188_s11 + $0x30] sm:$0xff]  ;;  %p1076_p5 = scmp.ge.s32.totalorder %s1075_s15, %s2585_s0  ;;  %p1060_p7 = scmp.ge.s32.totalorder %s1061_s6, %s2585_s0 }
 0x188   : >> { %1072 = vst [vmem:[%s2184_s30 + $0x58] sm:$0xff] %v1071_v47  ;;  %1074 = vst [vmem:[%s2184_s30 + $0x84] sm:$0xff] %v1073_v48 }
 0x189   : >> { %s2894_s15 = smov (%p1076_p5, %s1075_s15), 0  ;;  %1063 = sbr.rel (!%p1060_p7) target bundleno = 390 (0x186), region = 290 }
 0x18a   : >> { %s1595_s23 = sshll.u32 %s2894_s15, 3  ;;  %s2863_s21 = smov %s2894_s15 }
 0x18b   : >> { %s1080_s11 = scalar_lea.vmem %s2589_s4, %s1595_s23 [#allocation3]   ;;  %s1081_s30 = scalar_lea.vmem %s2592_s24, %s1595_s23  }
 0x18e PF: > { %1084 = sbr.rel (%p895_p13) target bundleno = 464 (0x1d0), region = 143  ;;  %s1086_s12 = ssub.s32 (!%p895_p13), %s2421_s5, %s2425_s14 }
 0x18f   : > { %s1090_s9 = sshrl.u32 (!%p895_p13), %s2421_s5, 3  ;;  %s2622_s10 = scalar_lea.vmem (!%p895_p13), %s2402_s28, %s1086_s12 [#allocation3] }
 0x190   : > { %s2625_s25 = scalar_lea.vmem (!%p895_p13), %s2419_s22, %s1086_s12  ;;  %s2629_s26 = sshrl.u32 (!%p895_p13), %s1090_s9, 4 }
 0x191   : > { %p1597_p8 = scmp.le.s32.totalorder (!%p895_p13), %s2629_s26, 0 }
 0x193   : > { %1475 = sbr.rel (%p1597_p8) target bundleno = 441 (0x1b9), region = 295  ;;  %s2864_s29 = smov (!%p1597_p8), %s2419_s22 }
 0x194   : > { %s2865_s7 = smov (!%p1597_p8), %s2402_s28  ;;  %s2638_s0 = smov (!%p1597_p8), 0  }
 0x195   : > { %s2640_s20 = smov (!%p1597_p8), 0  }
 0x198 LB: >> { %v2655_v49 = vld [vmem:[%s2204_s7 + $0x78] sm:$0xff]  ;;  %v1123_v50 = vld [vmem:[%s2204_s7 + $0x50] sm:$0xff]  ;;  %v1127_v52 = vld [vmem:[%s2204_s7 + $0x60] sm:$0xff]  ;;  %s1231_s8 = sadd.s32 1, %s2208_s0  ;;  %s1097_s20 = sadd.s32 1, %s2212_s20   ;;  %s2212_s20 = sphi %s2640_s20, %s1097_s20   ;;  %s2208_s0 = sphi %s2638_s0, %s2867_s0   ;;  %s2204_s7 = sphi %s2865_s7, %s1236_s7   ;;  %s2200_s29 = sphi %s2864_s29, %s1237_s29  }
 0x199   : >> { %v1125_v51 = vld [vmem:[%s2204_s7 + $0x58] sm:$0xff]  ;;  %1134 = vst [vmem:[%s2200_s29 + $0x78] sm:$0xff] %v2655_v49  ;;  %1124 = vst [vmem:[%s2200_s29 + $0x50] sm:$0xff] %v1123_v50  ;;  %v1129_v53 = vld [vmem:[%s2204_s7 + $0x68] sm:$0xff]  ;;  %p2700_p9 = scmp.ge.s32.totalorder %s1231_s8, %s2629_s26  ;;  %p1096_p10 = scmp.ge.s32.totalorder %s1097_s20, %s2629_s26 }
 0x19a   : >> { %1126 = vst [vmem:[%s2200_s29 + $0x58] sm:$0xff] %v1125_v51  ;;  %v2666_v54 = vld [vmem:[%s2204_s7 + $0x70] sm:$0xff]  ;;  %1162 = vst [vmem:[%s2200_s29 + $0x94] sm:$0xff] %v2655_v49  ;;  %v1163_v55 = vld [vmem:[%s2204_s7 + $0x80] sm:$0xff] }
 0x19b   : >> { %1190 = vst [vmem:[%s2200_s29 + $0xb0] sm:$0xff] %v2655_v49  ;;  %1128 = vst [vmem:[%s2200_s29 + $0x60] sm:$0xff] %v1127_v52  ;;  %v1165_v56 = vld [vmem:[%s2204_s7 + $0x88] sm:$0xff]  ;;  %v1115_v58 = vld [vmem:[%s2204_s7 + $0x30] sm:$0xff]  ;;  %s2896_s8 = smov (%p2700_p9, %s1231_s8), 0 }
 0x19c   : >> { %1130 = vst [vmem:[%s2200_s29 + $0x68] sm:$0xff] %v1129_v53  ;;  %1132 = vst [vmem:[%s2200_s29 + $0x70] sm:$0xff] %v2666_v54  ;;  %v1113_v57 = vld [vmem:[%s2204_s7 + $0x28] sm:$0xff]  ;;  %v1117_v59 = vld [vmem:[%s2204_s7 + $0x38] sm:$0xff]  ;;  %s1598_s24 = sshll.u32 %s2896_s8, 7  ;;  %s2867_s0 = smov %s2896_s8 }
 0x19d   : >> { %1156 = vst [vmem:[%s2200_s29 + $0x7c] sm:$0xff] %v1127_v52  ;;  %1158 = vst [vmem:[%s2200_s29 + $0x84] sm:$0xff] %v1129_v53  ;;  %v1119_v60 = vld [vmem:[%s2204_s7 + $0x40] sm:$0xff]  ;;  %v1121_v61 = vld [vmem:[%s2204_s7 + $0x48] sm:$0xff] }
 0x19e   : >> { %1160 = vst [vmem:[%s2200_s29 + $0x8c] sm:$0xff] %v2666_v54  ;;  %1164 = vst [vmem:[%s2200_s29 + $0x9c] sm:$0xff] %v1163_v55  ;;  %v1195_v62 = vld [vmem:[%s2204_s7 + $0x90] sm:$0xff]  ;;  %v1197_v63 = vld [vmem:[%s2204_s7 + $0x98] sm:$0xff] }
 0x19f   : >> { %1166 = vst [vmem:[%s2200_s29 + $0xa4] sm:$0xff] %v1165_v56  ;;  %1114 = vst [vmem:[%s2200_s29 + $0x28] sm:$0xff] %v1113_v57  ;;  %v1103_v0 = vld [vmem:[%s2204_s7] sm:$0xff]  ;;  %v1105_v1 = vld [vmem:[%s2204_s7 + $0x8] sm:$0xff] }
 0x1a0   : >> { %1152 = vst [vmem:[%s2200_s29 + $0x6c] sm:$0xff] %v1123_v50  ;;  %1154 = vst [vmem:[%s2200_s29 + $0x74] sm:$0xff] %v1125_v51  ;;  %v1107_v2 = vld [vmem:[%s2204_s7 + $0x10] sm:$0xff]  ;;  %v1109_v3 = vld [vmem:[%s2204_s7 + $0x18] sm:$0xff] }
 0x1a1   : >> { %1180 = vst [vmem:[%s2200_s29 + $0x88] sm:$0xff] %v1123_v50  ;;  %1182 = vst [vmem:[%s2200_s29 + $0x90] sm:$0xff] %v1125_v51  ;;  %v1111_v4 = vld [vmem:[%s2204_s7 + $0x20] sm:$0xff]  ;;  %v1229_v6 = vld [vmem:[%s2204_s7 + $0xa8] sm:$0xff] }
 0x1a2   : >> { %1192 = vst [vmem:[%s2200_s29 + $0xb8] sm:$0xff] %v1163_v55  ;;  %1194 = vst [vmem:[%s2200_s29 + $0xc0] sm:$0xff] %v1165_v56  ;;  %v1227_v5 = vld [vmem:[%s2204_s7 + $0xa0] sm:$0xff]  ;;  %s1236_s7 = scalar_lea.vmem %s2402_s28, %s1598_s24 [#allocation3]  }
 0x1a3   : >> { %1222 = vst [vmem:[%s2200_s29 + $0xdc] sm:$0xff] %v1165_v56  ;;  %1116 = vst [vmem:[%s2200_s29 + $0x30] sm:$0xff] %v1115_v58 }
 0x1a4   : >> { %1118 = vst [vmem:[%s2200_s29 + $0x38] sm:$0xff] %v1117_v59  ;;  %1120 = vst [vmem:[%s2200_s29 + $0x40] sm:$0xff] %v1119_v60 }
 0x1a5   : >> { %1146 = vst [vmem:[%s2200_s29 + $0x54] sm:$0xff] %v1117_v59  ;;  %1148 = vst [vmem:[%s2200_s29 + $0x5c] sm:$0xff] %v1119_v60 }
 0x1a6   : >> { %1184 = vst [vmem:[%s2200_s29 + $0x98] sm:$0xff] %v1127_v52  ;;  %1186 = vst [vmem:[%s2200_s29 + $0xa0] sm:$0xff] %v1129_v53 }
 0x1a7   : >> { %1188 = vst [vmem:[%s2200_s29 + $0xa8] sm:$0xff] %v2666_v54  ;;  %1174 = vst [vmem:[%s2200_s29 + $0x70] sm:$0xff] %v1117_v59 }
 0x1a8   : >> { %1176 = vst [vmem:[%s2200_s29 + $0x78] sm:$0xff] %v1119_v60  ;;  %1202 = vst [vmem:[%s2200_s29 + $0x8c] sm:$0xff] %v1117_v59 }
 0x1a9   : >> { %1212 = vst [vmem:[%s2200_s29 + $0xb4] sm:$0xff] %v1127_v52  ;;  %1214 = vst [vmem:[%s2200_s29 + $0xbc] sm:$0xff] %v1129_v53 }
 0x1aa   : >> { %1122 = vst [vmem:[%s2200_s29 + $0x48] sm:$0xff] %v1121_v61  ;;  %1150 = vst [vmem:[%s2200_s29 + $0x64] sm:$0xff] %v1121_v61 }
 0x1ab   : >> { %1178 = vst [vmem:[%s2200_s29 + $0x80] sm:$0xff] %v1121_v61  ;;  %1196 = vst [vmem:[%s2200_s29 + $0xc8] sm:$0xff] %v1195_v62 }
 0x1ac   : >> { %1198 = vst [vmem:[%s2200_s29 + $0xd0] sm:$0xff] %v1197_v63  ;;  %1204 = vst [vmem:[%s2200_s29 + $0x94] sm:$0xff] %v1119_v60 }
 0x1ad   : >> { %1206 = vst [vmem:[%s2200_s29 + $0x9c] sm:$0xff] %v1121_v61  ;;  %1208 = vst [vmem:[%s2200_s29 + $0xa4] sm:$0xff] %v1123_v50 }
 0x1ae   : >> { %1210 = vst [vmem:[%s2200_s29 + $0xac] sm:$0xff] %v1125_v51  ;;  %1224 = vst [vmem:[%s2200_s29 + $0xe4] sm:$0xff] %v1195_v62 }
 0x1af   : >> { %1226 = vst [vmem:[%s2200_s29 + $0xec] sm:$0xff] %v1197_v63  ;;  %1104 = vst [vmem:[%s2200_s29] sm:$0xff] %v1103_v0 }
 0x1b0   : >> { %1106 = vst [vmem:[%s2200_s29 + $0x8] sm:$0xff] %v1105_v1  ;;  %1108 = vst [vmem:[%s2200_s29 + $0x10] sm:$0xff] %v1107_v2 }
 0x1b1   : >> { %1136 = vst [vmem:[%s2200_s29 + $0x2c] sm:$0xff] %v1107_v2  ;;  %1142 = vst [vmem:[%s2200_s29 + $0x44] sm:$0xff] %v1113_v57 }
 0x1b2   : >> { %1144 = vst [vmem:[%s2200_s29 + $0x4c] sm:$0xff] %v1115_v58  ;;  %1170 = vst [vmem:[%s2200_s29 + $0x60] sm:$0xff] %v1113_v57 }
 0x1b3   : >> { %1172 = vst [vmem:[%s2200_s29 + $0x68] sm:$0xff] %v1115_v58  ;;  %1200 = vst [vmem:[%s2200_s29 + $0x84] sm:$0xff] %v1115_v58 }
 0x1b4   : >> { %1216 = vst [vmem:[%s2200_s29 + $0xc4] sm:$0xff] %v2666_v54  ;;  %1218 = vst [vmem:[%s2200_s29 + $0xcc] sm:$0xff] %v2655_v49  ;;  %1099 = sbr.rel (!%p1096_p10) target bundleno = 408 (0x198), region = 301 }
 0x1b5   : >> { %1220 = vst [vmem:[%s2200_s29 + $0xd4] sm:$0xff] %v1163_v55  ;;  %1110 = vst [vmem:[%s2200_s29 + $0x18] sm:$0xff] %v1109_v3 }
 0x1b6   : >> { %1112 = vst [vmem:[%s2200_s29 + $0x20] sm:$0xff] %v1111_v4  ;;  %1138 = vst [vmem:[%s2200_s29 + $0x34] sm:$0xff] %v1109_v3 }
 0x1b7   : >> { %1140 = vst [vmem:[%s2200_s29 + $0x3c] sm:$0xff] %v1111_v4  ;;  %1168 = vst [vmem:[%s2200_s29 + $0x58] sm:$0xff] %v1111_v4 }
 0x1b8   : >> { %1228 = vst [vmem:[%s2200_s29 + $0xf4] sm:$0xff] %v1227_v5  ;;  %1230 = vst [vmem:[%s2200_s29 + $0xfc] sm:$0xff] %v1229_v6  ;;  %s1237_s29 = scalar_lea.vmem %s2419_s22, %s1598_s24  }
 0x1b9 PF: > { %s2782_s30 = sand.u32 15, %s1090_s9   ;;  %s1625_s11 = sshll.u32 %s2629_s26, 11 }
 0x1ba   : > { %s1242_s21 = sshra.s32 %s1625_s11, 4  ;;  %p1603_p11 = scmp.le.s32.totalorder %s2782_s30, 0 }
 0x1bb   : > { %s2786_s6 = scalar_lea.vmem %s2402_s28, %s1242_s21 [#allocation3]   ;;  %s2789_s15 = scalar_lea.vmem %s2419_s22, %s1242_s21  }
 0x1bc   : > { %1489 = sbr.rel (%p1603_p11) target bundleno = 457 (0x1c9), region = 306  ;;  %s2868_s23 = smov (!%p1603_p11), %s2789_s15 }
 0x1bd   : > { %s2869_s12 = smov (!%p1603_p11), %s2786_s6  ;;  %s2222_s29 = smov (!%p1603_p11), 0  }
 0x1be   : > { %s2226_s7 = smov (!%p1603_p11), 0  }
 0x1c1 LB: >> { %v1258_v7 = vld [vmem:[%s2220_s12] sm:$0xff]  ;;  %v1260_v8 = vld [vmem:[%s2220_s12 + $0x10] sm:$0xff]  ;;  %s1266_s9 = sadd.s32 1, %s2224_s29  ;;  %s1252_s7 = sadd.s32 1, %s2228_s7   ;;  %s2228_s7 = sphi %s2226_s7, %s1252_s7   ;;  %s2224_s29 = sphi %s2222_s29, %s2223_s29   ;;  %s2220_s12 = sphi %s2869_s12, %s1271_s12   ;;  %s2216_s23 = sphi %s2868_s23, %s1272_s23  }
 0x1c2   : >> { %v1262_v9 = vld [vmem:[%s2220_s12 + $0x20] sm:$0xff]  ;;  %1259 = vst [vmem:[%s2216_s23] sm:$0xff] %v1258_v7  ;;  %1261 = vst [vmem:[%s2216_s23 + $0x2c] sm:$0xff] %v1260_v8  ;;  %v1264_v10 = vld [vmem:[%s2220_s12 + $0x30] sm:$0xff]  ;;  %p1267_p12 = scmp.ge.s32.totalorder %s1266_s9, %s2782_s30  ;;  %p1251_p6 = scmp.ge.s32.totalorder %s1252_s7, %s2782_s30 }
 0x1c3   : >> { %1263 = vst [vmem:[%s2216_s23 + $0x58] sm:$0xff] %v1262_v9  ;;  %1265 = vst [vmem:[%s2216_s23 + $0x84] sm:$0xff] %v1264_v10 }
 0x1c4   : >> { %s2898_s9 = smov (%p1267_p12, %s1266_s9), 0  ;;  %1254 = sbr.rel (!%p1251_p6) target bundleno = 449 (0x1c1), region = 312 }
 0x1c5   : >> { %s1604_s26 = sshll.u32 %s2898_s9, 3  ;;  %s2223_s29 = smov %s2898_s9  }
 0x1c6   : >> { %s1271_s12 = scalar_lea.vmem %s2786_s6, %s1604_s26 [#allocation3]   ;;  %s1272_s23 = scalar_lea.vmem %s2789_s15, %s1604_s26  }
 0x1c9 PF: > { %s2233_s0 = smov 1  }
 0x1ca   : > { %s1273_s20 = sshll.u32 %s2233_s0, %s2425_s14 }
 0x1cb   : > { %s1606_s8 = sadd.s32 4294967295, %s1273_s20 }
 0x1cc   : > { %v1283_v11 = vld [vmem:[%s2622_s10] sm:%s1606_s8]  ;;  %v1285_v12 = vld [vmem:[%s2622_s10 + $0x10] sm:%s1606_s8] }
 0x1cd   : > { %1284 = vst [vmem:[%s2625_s25] sm:%s1606_s8] %v1283_v11  ;;  %1286 = vst [vmem:[%s2625_s25 + $0x2c] sm:%s1606_s8] %v1285_v12 }
 0x1ce   : > { %v1287_v13 = vld [vmem:[%s2622_s10 + $0x20] sm:%s1606_s8]  ;;  %v1289_v14 = vld [vmem:[%s2622_s10 + $0x30] sm:%s1606_s8] }
 0x1cf   : > { %1288 = vst [vmem:[%s2625_s25 + $0x58] sm:%s1606_s8] %v1287_v13  ;;  %1290 = vst [vmem:[%s2625_s25 + $0x84] sm:%s1606_s8] %v1289_v14 }
 0x1d0 PF: > { %p1607_p13 = scmp.ge.u32.totalorder %s2421_s5, 8 }
 0x1d1   : > { %s2234_s4 = smov (!%p1607_p13), 1  }
 0x1d2   : > { %875 = sbr.rel (%p1607_p13) target bundleno = 475 (0x1db), region = 114  ;;  %s876_s14 = sshll.u32 (!%p1607_p13), %s2234_s4, %s2421_s5 }
 0x1d3   : > { %s1608_s24 = sadd.s32 (!%p1607_p13), 4294967295, %s876_s14 }
 0x1d7   : > { %v886_v15 = vld [vmem:[%s2402_s28] sm:%s1608_s24]  ;;  %v888_v16 = vld [vmem:[%s2402_s28 + $0x10] sm:%s1608_s24] }
 0x1d8   : > { %887 = vst [vmem:[%s2419_s22] sm:%s1608_s24] %v886_v15  ;;  %889 = vst [vmem:[%s2419_s22 + $0x2c] sm:%s1608_s24] %v888_v16 }
 0x1d9   : > { %v890_v17 = vld [vmem:[%s2402_s28 + $0x20] sm:%s1608_s24]  ;;  %v892_v18 = vld [vmem:[%s2402_s28 + $0x30] sm:%s1608_s24] }
 0x1da   : > { %891 = vst [vmem:[%s2419_s22 + $0x58] sm:%s1608_s24] %v890_v17  ;;  %893 = vst [vmem:[%s2419_s22 + $0x84] sm:%s1608_s24] %v892_v18 }
 0x1db PF: > { %s13_s18 = sadd.s32 1, %s2132_s18   ;;  %s2870_s5 = sld [smem:[#allocation4_spill]] }
 0x1dc   : > { %p10_p0 = scmp.ge.s32.totalorder %s13_s18, 8   ;;  %s2871_s12 = smov %s2112_s13 }
 0x1dd   : > { %s2872_s13 = smov %s2311_s27  ;;  %s2873_s14 = smov %s2124_s16 }
 0x1de   : > { %s2874_s15 = smov %s2128_s17  ;;  %s2875_s16 = smov %s2878_s19 }
 0x1df   :  { %12 = sbr.rel (!%p10_p0) target bundleno = 6 (0x6), region = 323 }
 0x1e1   : > { %s2876_s17 = smov %s2870_s5 }

// kernel: object_context.5
= control target key start
LH: loop header
LB: loop body
LE: loop exit
PB: predicated region body
PF: predicated region fallthrough
CT: control target
= control target key end

     0   :  { %14 = vsyncpa [#allocation5], 0  ;;  %s1331_s0 = inlined_call_operand.vmem [shape: bf16[2,16,32], index: 0, kind: input, shape index: {}]   ;;  %s1332_s1 = inlined_call_operand.vmem [shape: bf16[32,32], index: 1, kind: input, shape index: {}]   ;;  %s1333_s2 = inlined_call_operand.vmem [shape: f32[1,32], index: 2, kind: input, shape index: {}]   ;;  %s1334_s3 = inlined_call_operand.vmem [shape: bf16[32,16], index: 3, kind: input, shape index: {}]   ;;  %s1335_s4 = inlined_call_operand.vmem [shape: f32[1,16], index: 4, kind: input, shape index: {}]   ;;  %s1336_s5 = inlined_call_operand.vmem [shape: bf16[32,64], index: 5, kind: input, shape index: {}]   ;;  %s1337_s6 = inlined_call_operand.vmem [shape: f32[2,1,64], index: 6, kind: input, shape index: {}]   ;;  %s1338_s7 = inlined_call_operand.vmem [shape: bf16[2,16,64], index: 7, kind: output, shape index: {0}]   ;;  %s1339_s8 = inlined_call_operand.hbm [shape: bf16[2,16,16], index: 8, kind: output, shape index: {1}]  }
   0x1   :  { %16 = vsyncpa [#allocation5 + $0x1], 0  ;;  %s1146_s27 = smov 0   ;;  %s1148_s28 = smov 0  }
   0x2   :  { %s1150_s29 = smov 0   ;;  %s1152_s30 = smov 0  }
   0x3   :  { %s1154_s9 = smov 0   ;;  %s1156_s10 = smov 0  }
   0x4 LB: > { %s855_s11 = sadd.s32 4294967295, %s1094_s10   ;;  %s856_s12 = sadd.s32 4294967294, %s1094_s10   ;;  %s1094_s10 = sphi %s1156_s10, %s22_s10   ;;  %s1090_s9 = sphi %s1154_s9, %s1348_s9   ;;  %s1086_s30 = sphi %s1152_s30, %s1347_s30   ;;  %s1082_s29 = sphi %s1150_s29, %s1346_s29   ;;  %s1078_s28 = sphi %s1148_s28, %s1345_s28   ;;  %s1074_s27 = sphi %s1146_s27, %s1344_s27  }
   0x5   : > { %s41_s13 = sadd.s32 1, %s1090_s9  ;;  %s235_s14 = sadd.s32 1, %s1082_s29 }
   0x6   : > { %p43_p0 = scmp.ge.s32.totalorder %s41_s13, 2  ;;  %p245_p1 = scmp.ne.s32.totalorder %s1082_s29, %s1078_s28 }
   0x7   : > { %p246_p2 = scmp.eq.s32.totalorder %s855_s11, 1  ;;  %p251_p3 = scmp.ne.s32.totalorder %s1078_s28, %s1074_s27 }
   0x8   : > { %s1350_s13 = smov (%p43_p0, %s41_s13), 0  ;;  %p252_p5 = scmp.eq.s32.totalorder %s856_s12, 1 }
   0x9   : > { %p1186_p4 = por %p246_p2, %p245_p1  ;;  %s230_s16 = ssub.s32 %s1090_s9, %s1350_s13 }
   0xa   : > { %p859_p6 = scmp.ge.s32.totalorder %s1094_s10, 1  ;;  %p233_p7 = scmp.eq.s32.totalorder %s230_s16, 0 }
   0xb   : > { %p1193_p8 = por %p252_p5, %p251_p3  ;;  %p299_p9 = scmp.lt.s32.totalorder %s1094_s10, 3 }
   0xc   : > { %s1199_s18 = scalar_select %p233_p7, %s1082_s29, %s235_s14  }
   0xd   : > { %p300_p10 = pnand %p859_p6, %p299_p9 }
   0xe   : > { %p345_p11 = scmp.lt.s32.totalorder (!%p300_p10), %s1086_s30, 1  ;;  %s342_s26 = sand.u32 (!%p300_p10), 1, %s1078_s28  }
   0xf   : > { %303 = sbr.rel (%p300_p10) target bundleno = 890 (0x37a), region = 48  ;;  %s900_s21 = sshll.u32 (!%p300_p10), %s1086_s30, 7 }
  0x10   : > { %s1271_s14 = scalar_lea.hbm (!%p300_p10), %s1339_s8, %s900_s21  ;;  %s1277_s16 = scalar_lea.sflag (!%p300_p10), [#allocation5], %s342_s26 }
  0x14   : > { %v1001_v0 = vld [vmem:[%s1332_s1 + $0x8] sm:$0xff]   ;;  %v1096_v1 = vmov 0.0   ;;  %v1002_v2 = vld [vmem:[%s1332_s1] sm:$0xff]   ;;  %vm1097_vm0 = vmmov 0   ;;  %vm399_vm1 = vcmask 261120   ;;  %s1220_s23 = scalar_select %p345_p11, %s1086_s30, 1 }
  0x15   : > { %912 = vmatprep.subr.bf16.mxu0 %v1096_v1  ;;  %920 = vmatprep.subr.bf16.mxu1 %v1096_v1  ;;  %457 = vst.msk [vmem:[#allocation3] sm:$0xff] %vm399_vm1, %v1096_v1  ;;  %458 = vst.msk [vmem:[#allocation3 + $0x8] sm:$0xff] %vm399_vm1, %v1096_v1  ;;  %v1004_v4 = vld [vmem:[%s1334_s3 + $0x8] sm:$0xff]   ;;  %v1005_v5 = vld [vmem:[%s1334_s3] sm:$0xff]   ;;  %vm454_vm2 = vcmask 257024   ;;  %vm554_vm3 = vcmask 125952  }
  0x16   : > { %913 = vmatpush3.bf16.msra.mxu0 %v1001_v0  ;;  %916 = vmatprep.mubr.msk.bf16.mxu0 %vm1097_vm0, %v1096_v1  ;;  %s1340_s24 = sshll.u32 %s1220_s23, 3  ;;  %v865_v6 = vld [vmem:[%s1333_s2] ss:$0 sm:$0xff]  ;;  %vm567_vm4 = vcmask 130048   ;;  %v1008_v39 = vld [vmem:[%s1336_s5 + $0x8] sm:$0xff]   ;;  %s1098_s30 = smov [#allocation4]  }
  0x17   : > { %914 = vmatprep.subr.bf16.mxu0 %v1096_v1  ;;  %924 = vmatprep.mubr.msk.bf16.mxu1 %vm1097_vm0, %v1096_v1  ;;  %s349_s11 = scalar_lea.vmem %s1331_s0, %s1340_s24  ;;  %v872_v19 = vld [vmem:[%s1335_s4] ss:$0 sm:$0xff] }
  0x18   : > { %v1003_v3 = vld [vmem:[%s349_s11] sm:$0xff]   ;;  %921 = vmatpush3.bf16.msra.mxu1 %v1004_v4 }
  0x19   : > { %922 = vmatprep.subr.bf16.mxu1 %v1096_v1  ;;  %v1007_v18 = vld [vmem:[%s349_s11] sm:$0xff]   ;;  %s860_s11 = sshll.u32 %s342_s26, 3 }
  0x1a   : > { %915 = vmatpush3.bf16.msra.mxu0 %v1002_v2  ;;  %s1252_s12 = scalar_lea.vmem [#allocation4], %s860_s11  ;;  %v1009_v40 = vld [vmem:[%s1336_s5] sm:$0xff]  }
  0x1b   : > { %928 = vmatprep.subr.bf16.mxu0 %v1096_v1  ;;  %s733_s22 = sshll.u32 %s1252_s12, 4  ;;  %s1273_s22 = int_to_ptr.vmem [resolvable:$true] %s733_s22 }
  0x1c   : > { %923 = vmatpush3.bf16.msra.mxu1 %v1005_v5  ;;  %v557_v41 = vld [vmem:[#allocation3] sm:$0xff]  ;;  %v558_v45 = vld [vmem:[#allocation3 + $0x8] sm:$0xff]  ;;  %s1018_s19 = scalar_lea.vmem %s1273_s22, 128 }
  0x1d   : > { %917 = vmatmul.mubr.msk.bf16.vlgmr.msra.gmra.mxu0 %vm399_vm1, %v1003_v3  ;;  %934 = vmatprep.subr.bf16.mxu1 %v1096_v1  ;;  %p1019_p12 = scmp.ne.s32.totalorder %s1273_s22, %s1018_s19 }
  0x1e   : > { %930 = vmatprep.mubr.msk.bf16.mxu0 %vm1097_vm0, %v1096_v1  ;;  %929 = vmatpush3.bf16.msra.mxu0 %v1007_v18 }
  0x1f   : > { %p1020_p13 = pnand %p1019_p12, %p1186_p4 }
  0x21   : > { %p1021_p0 = pneg %p1020_p13 }
  0xdd   : > { %v437_v7 = vpop.f32.mrf.mxu0 }
  0xde   : > { %v438_v8 = vadd.f32 %v865_v6, %v437_v7 }
  0xdf   : > { %v918_v9 = vpop.f32.mrf.mxu0 }
  0xe0   : > { %v444_v10 = vmax.f32 %v438_v8, 0.0 }
  0xe1   : > { %v440_v11 = vpop.f32.mrf.mxu0 }
  0xe2   : > { %v894_v12 = vpack.c.bf16 %v444_v10, %v444_v10  ;;  %v441_v13 = vadd.f32 %v865_v6, %v440_v11 }
  0xe3   : > { %v919_v14 = vpop.f32.mrf.mxu0 }
  0xe4   : > { %455 = vst.msk [vmem:[#allocation2] sm:$0xf] %vm454_vm2, %v894_v12  ;;  %v445_v15 = vmax.f32 %v441_v13, 0.0 }
  0xe6   : > { %v895_v16 = vpack.c.bf16 %v445_v15, %v445_v15 }
  0xe8   : > { %456 = vst.msk [vmem:[#allocation2 + $0x4] sm:$0xf] %vm454_vm2, %v895_v16 }
  0xef   : > { %v1006_v17 = vld [vmem:[#allocation2] sm:$0xff]  }
  0xf0   : > { %925 = vmatmul.mubr.msk.bf16.vlgmr.msra.gmra.mxu1 %vm399_vm1, %v1006_v17 }
  0xf1   : > { %938 = vmatprep.mubr.msk.bf16.mxu1 %vm1097_vm0, %v1096_v1  ;;  %935 = vmatpush3.bf16.msra.mxu1 %v1008_v39 }
  0xf2   : > { %936 = vmatprep.subr.bf16.mxu1 %v1096_v1 }
  0xf5   : > { %937 = vmatpush3.bf16.msra.mxu1 %v1009_v40 }
 0x1b0   : > { %v527_v20 = vpop.f32.mrf.mxu1 }
 0x1b1   : > { %v528_v21 = vadd.f32 %v872_v19, %v527_v20 }
 0x1b2   : > { %v926_v22 = vpop.f32.mrf.mxu1 }
 0x1b3   : > { %v534_v23 = vsub.f32 0.0, %v528_v21 }
 0x1b4   : > { %v530_v24 = vpop.f32.mrf.mxu1 }
 0x1b5   : > { %v536_v25 = vmul.f32 1.442695, %v534_v23  ;;  %v531_v26 = vadd.f32 %v872_v19, %v530_v24 }
 0x1b6   : > { %v927_v27 = vpop.f32.mrf.mxu1 }
 0x1b7   : > { %1010 = vpow2.f32 %v536_v25  ;;  %v535_v28 = vsub.f32 0.0, %v531_v26 }
 0x1b9   : > { %v538_v29 = vmul.f32 1.442695, %v535_v28 }
 0x1bb   : > { %1012 = vpow2.f32 %v538_v29 }
 0x1c4   : > { %v1011_v30 = vpop.eup %1010 }
 0x1c5   : > { %v540_v31 = vadd.f32 1.0, %v1011_v30 }
 0x1c7   : > { %1014 = vrcp.f32 %v540_v31 }
 0x1c8   : > { %v1013_v32 = vpop.eup %1012 }
 0x1c9   : > { %v541_v33 = vadd.f32 1.0, %v1013_v32 }
 0x1cb   : > { %1016 = vrcp.f32 %v541_v33 }
 0x1d4   : > { %v1015_v34 = vpop.eup %1014 }
 0x1d5   : > { %v896_v35 = vpack.c.bf16 %v1015_v34, %v1015_v34 }
 0x1d7   : > { %555 = vst.msk [vmem:[%s1252_s12] sm:$0xf] %vm554_vm3, %v896_v35 }
 0x1d8   : > { %v1017_v36 = vpop.eup %1016 }
 0x1d9   : > { %v546_v37 = vpack.c.bf16 %v1017_v36, %v1015_v34  ;;  %v897_v38 = vpack.c.bf16 %v1017_v36, %v1017_v36 }
 0x1db   : > { %931 = vmatmul.mubr.msk.bf16.vlgmr.msra.gmra.mxu0 %vm567_vm4, %v546_v37  ;;  %556 = vst.msk [vmem:[%s1252_s12 + $0x4] sm:$0xf] %vm554_vm3, %v897_v38  ;;  %s1022_s12 = sshll.u32 %s1098_s30, 4  ;;  %s1023_s12 = int_to_ptr.vmem [resolvable:$false] %s1022_s12 }
 0x1dc   : > { %s1024_s20 = scalar_lea.vmem %s1023_s12, 256  ;;  %p1025_p1 = scmp.lt.s32.totalorder %s1273_s22, %s1023_s12 }
 0x1dd   : > { %p1026_p2 = scmp.lt.s32.totalorder %s1024_s20, %s1018_s19 }
 0x1df   : > { %p1027_p3 = por %p1026_p2, %p1025_p1 }
 0x1e1   : > { %p1028_p5 = pnand %p1027_p3, %p1021_p0 }
 0x29b   : > { %v605_v42 = vpop.f32.mrf.mxu0 }
 0x29c   : > { %v612_v43 = vadd.f32 %v605_v42, %v557_v41 }
 0x29d   : > { %v932_v44 = vpop.f32.mrf.mxu0 }
 0x29e   : > { %614 = vst.msk [vmem:[#allocation3] sm:$0xff] %vm399_vm1, %v612_v43 }
 0x29f   : > { %v608_v46 = vpop.f32.mrf.mxu0 }
 0x2a0   : > { %v613_v47 = vadd.f32 %v608_v46, %v558_v45 }
 0x2a1   : > { %v933_v48 = vpop.f32.mrf.mxu0 }
 0x2a2   : > { %615 = vst.msk [vmem:[#allocation3 + $0x8] sm:$0xff] %vm399_vm1, %v613_v47 }
 0x2a5   : > { %v619_v49 = vld [vmem:[#allocation3] sm:$0xff] }
 0x2a6   : > { %v621_v51 = vmul.f32 0.0625, %v619_v49 }
 0x2a9   : > { %v620_v50 = vld [vmem:[#allocation3 + $0x8] sm:$0xff] }
 0x2aa   : > { %v622_v52 = vmul.f32 0.0625, %v620_v50 }
 0x2ac   : > { %v623_v53 = vpack.c.bf16 %v622_v52, %v621_v51 }
 0x2ae   : > { %939 = vmatmul.mubr.msk.bf16.vlgmr.msra.gmra.mxu1 %vm399_vm1, %v623_v53 }
 0x2af   : > { %1031 = shalt.err (!%p1028_p5)
}
 0x2b0   : > { %s1032_s26 = scalar_lea.hbm %s1271_s14, 128  ;;  %s1036_s11 = scalar_lea.hbm %s1339_s8, 256 }
 0x2b1   : > { %p1033_p6 = scmp.ne.s32.totalorder %s1271_s14, %s1032_s26  ;;  %p1037_p10 = scmp.lt.s32.totalorder %s1271_s14, %s1339_s8 }
 0x2b2   : > { %p1038_p11 = scmp.lt.s32.totalorder %s1036_s11, %s1032_s26 }
 0x2b3   : > { %p1034_p7 = pnand %p1033_p6, %p1186_p4 }
 0x2b4   : > { %p1039_p12 = por %p1038_p11, %p1037_p10 }
 0x2b5   : > { %p1035_p9 = pneg %p1034_p7 }
 0x2b7   : > { %p1040_p13 = pnand %p1039_p12, %p1035_p9 }
 0x2b9   : > { %1043 = shalt.err (!%p1040_p13)
}
 0x2ba   : > { %s1099_s19 = smov 64   ;;  %s1100_s12 = smov 4   ;;  %vm701_vm5 = vcmask 519168  }
 0x2bb   : > { %942 = dma.vmem_to_hbm [thread:$0]  (%p1186_p4), %s1273_s22, 128, %s1271_s14, %s1277_s16, %s1099_s19, %s1099_s19, %s1100_s12  }
 0x2bc   : > { %s352_s25 = scalar_lea.vmem %s1337_s6, %s1220_s23  ;;  %s1343_s24 = sshll.u32 %s1220_s23, 3 }
 0x2bd   : > { %v881_v54 = vld [vmem:[%s352_s25] ss:$0 sm:$0xff]  ;;  %s361_s30 = scalar_lea.vmem %s1338_s7, %s1343_s24 }
 0x36e   : > { %v684_v55 = vpop.f32.mrf.mxu1 }
 0x36f   : > { %v685_v56 = vadd.f32 %v881_v54, %v684_v55 }
 0x370   : > { %v940_v57 = vpop.f32.mrf.mxu1 }
 0x371   : > { %v691_v58 = vmax.f32 %v685_v56, 0.0 }
 0x372   : > { %v687_v59 = vpop.f32.mrf.mxu1 }
 0x373   : > { %v898_v60 = vpack.c.bf16 %v691_v58, %v691_v58  ;;  %v688_v61 = vadd.f32 %v881_v54, %v687_v59 }
 0x374   : > { %v941_v62 = vpop.f32.mrf.mxu1 }
 0x375   : > { %702 = vst.msk [vmem:[%s361_s30] sm:$0xf] %vm701_vm5, %v898_v60  ;;  %v692_v63 = vmax.f32 %v688_v61, 0.0 }
 0x377   : > { %v899_v0 = vpack.c.bf16 %v692_v63, %v692_v63 }
 0x379   : > { %703 = vst.msk [vmem:[%s361_s30 + $0x4] sm:$0xf] %vm701_vm5, %v899_v0 }
 0x37a PF: > { %p948_p4 = scmp.ge.s32.totalorder %s1094_s10, 2  ;;  %s760_s15 = sand.u32 1, %s1074_s27  }
 0x37b   : > { %s761_s23 = scalar_lea.sflag [#allocation5], %s760_s15 }
 0x37c   : > { %p945_p0 = pnand %p948_p4, %p1193_p8 }
 0x37e   : > { %p946_p1 = pneg %p945_p0 }
 0x380   : > { %1069 = dma.done.wait (%p946_p1), %s761_s23, 128  }
 0x381   : > { %1071 = vsyncadd (%p946_p1), %s761_s23, 4294967168  ;;  %s22_s10 = sadd.s32 1, %s1094_s10   ;;  %s1344_s27 = smov %s1078_s28 }
 0x382   : > { %p19_p2 = scmp.ge.s32.totalorder %s22_s10, 4   ;;  %s1345_s28 = smov %s1082_s29 }
 0x383   : > { %s1346_s29 = smov %s1199_s18  ;;  %s1347_s30 = smov %s1090_s9 }
 0x384   : > { %s1348_s9 = smov %s1350_s13  ;;  %21 = sbr.rel (!%p19_p2) target bundleno = 4 (0x4), region = 106 }
 0x389   :  { %766 = vsyncpa [#allocation5], 1 }
 0x38a   :  { %768 = vsyncpa [#allocation5 + $0x1], 1 }

// kernel: object_context.4
= control target key start
LH: loop header
LB: loop body
LE: loop exit
PB: predicated region body
PF: predicated region fallthrough
CT: control target
= control target key end

     0   :  { %s3918_s0 = inlined_call_operand.vmem [shape: bf16[2,256,32], index: 0, kind: input, shape index: {}]   ;;  %s3919_s1 = inlined_call_operand.vmem [shape: bf16[32,32], index: 1, kind: input, shape index: {}]   ;;  %s3920_s2 = inlined_call_operand.vmem [shape: f32[1,32], index: 2, kind: input, shape index: {}]   ;;  %s3921_s3 = inlined_call_operand.vmem [shape: bf16[32,256], index: 3, kind: input, shape index: {}]   ;;  %s3922_s4 = inlined_call_operand.vmem [shape: f32[1,256], index: 4, kind: input, shape index: {}]   ;;  %s3923_s5 = inlined_call_operand.vmem [shape: bf16[32,64], index: 5, kind: input, shape index: {}]   ;;  %s3924_s6 = inlined_call_operand.vmem [shape: f32[2,1,64], index: 6, kind: input, shape index: {}]   ;;  %s3925_s7 = inlined_call_operand.vmem [shape: bf16[2,144,64], index: 7, kind: output, shape index: {0}]   ;;  %s3926_s8 = inlined_call_operand.hbm [shape: bf16[2,144,144], index: 8, kind: output, shape index: {1}]  }
   0x1   :  { %3943 = sst [smem:[#allocation24_spill]] %s3920_s2 }
   0x2   :  { %3944 = sst [smem:[#allocation25_spill]] %s3921_s3 }
   0x3   :  { %3945 = sst [smem:[#allocation26_spill]] %s3923_s5 }
   0x4   :  { %3946 = sst [smem:[#allocation27_spill]] %s3925_s7 }
   0x5   :  { %3947 = sst [smem:[#allocation28_spill]] %s3926_s8 }
   0x6   :  { %14 = vsyncpa [#allocation7], 0 }
   0x7   :  { %16 = vsyncpa [#allocation7 + $0x1], 0  ;;  %s3327_s27 = smov 0   ;;  %s3329_s28 = smov 0  }
   0x8   :  { %s3331_s29 = smov 0   ;;  %s3333_s30 = smov 0  }
   0x9   :  { %s3335_s9 = smov 0   ;;  %s3337_s10 = smov 0  }
   0xa   :  { %s3339_s11 = smov 0   ;;  %s3341_s12 = smov 0  }
   0xb   :  { %s3343_s13 = smov 0   ;;  %s3345_s14 = smov 0  }
   0xc   :  { %s3347_s15 = smov 0   ;;  %s3349_s16 = smov 0  }
   0xd   :  { %s3351_s17 = smov 0   ;;  %s3353_s18 = smov 0  }
   0xe LB: > { %3948 = sst [smem:[#allocation9_spill]] %s3191_s27  ;;  %s34_s21 = sadd.s32 1, %s3231_s15  ;;  %s3243_s18 = sphi %s3353_s18, %s22_s18   ;;  %s3239_s17 = sphi %s3351_s17, %s3995_s17   ;;  %s3235_s16 = sphi %s3349_s16, %s3994_s16   ;;  %s3231_s15 = sphi %s3347_s15, %s4002_s15   ;;  %s3227_s14 = sphi %s3345_s14, %s3992_s14   ;;  %s3223_s13 = sphi %s3343_s13, %s3991_s13   ;;  %s3219_s12 = sphi %s3341_s12, %s4001_s12   ;;  %s3215_s11 = sphi %s3339_s11, %s4000_s11   ;;  %s3211_s10 = sphi %s3337_s10, %s3999_s10   ;;  %s3207_s9 = sphi %s3335_s9, %s3987_s9   ;;  %s3203_s30 = sphi %s3333_s30, %s3986_s30   ;;  %s3199_s29 = sphi %s3331_s29, %s3985_s29   ;;  %s3195_s28 = sphi %s3329_s28, %s3998_s28   ;;  %s3191_s27 = sphi %s3327_s27, %s3997_s27  }
   0xf   : > { %3949 = sst [smem:[#allocation10_spill]] %s3199_s29  ;;  %s37_s22 = sadd.s32 1, %s3235_s16 }
  0x10   : > { %3950 = sst [smem:[#allocation11_spill]] %s3207_s9  ;;  %p35_p0 = scmp.ge.s32.totalorder %s34_s21, 2 }
  0x11   : > { %3951 = sst [smem:[#allocation12_spill]] %s3215_s11  ;;  %s41_s23 = sadd.s32 1, %s3239_s17 }
  0x12   : > { %3952 = sst [smem:[#allocation13_spill]] %s3231_s15  ;;  %s141_s24 = sadd.s32 %s3231_s15, %s3235_s16 }
  0x13   : > { %3953 = sst [smem:[#allocation14_spill]] %s3235_s16  ;;  %s4004_s21 = smov (%p35_p0, %s34_s21), 0 }
  0x14   : > { %3954 = sst [smem:[#allocation15_spill]] %s3239_s17  ;;  %s4006_s22 = smov (!%p35_p0, %s37_s22), %s3235_s16 }
  0x15   : > { %3955 = sst [smem:[#allocation16_spill]] %s3243_s18  ;;  %s143_s26 = ssub.s32 0, %s141_s24 }
  0x16   : > { %3956 = sst [smem:[#allocation17_spill]] %s4004_s21  ;;  %p39_p1 = scmp.ge.s32.totalorder %s4006_s22, 2 }
  0x17   : > { %s2356_s8 = smin.u32 %s143_s26, %s141_s24  ;;  %p177_p2 = scmp.ne.s32.totalorder %s3215_s11, %s3211_s10 }
  0x18   : > { %s145_s7 = sand.u32 1, %s2356_s8   ;;  %s4008_s22 = smov (%p39_p1, %s4006_s22), 0 }
  0x19   : > { %3957 = sst [smem:[#allocation18_spill]] %s4008_s22  ;;  %s4010_s23 = smov (!%p39_p1, %s41_s23), %s3239_s17 }
  0x1a   : > { %s154_s20 = sadd.s32 %s4008_s22, %s4004_s21  ;;  %p43_p3 = scmp.ge.s32.totalorder %s4010_s23, 2 }
  0x1b   : > { %p2358_p4 = scmp.lt.s32.totalorder %s145_s7, 0  ;;  %s152_s25 = sadd.s32 2, %s145_s7 }
  0x1c   : > { %s4012_s23 = smov (%p43_p3, %s4010_s23), 0  ;;  %s156_s24 = ssub.s32 0, %s154_s20 }
  0x1d   : > { %3958 = sst [smem:[#allocation19_spill]] %s4012_s23  ;;  %p178_p5 = scmp.eq.s32.totalorder %s3243_s18, 0 }
  0x1e   : > { %s4014_s25 = smov (!%p2358_p4, %s152_s25), %s145_s7  ;;  %s2359_s8 = smin.u32 %s156_s24, %s154_s20 }
  0x1f   : > { %p3420_p6 = por %p178_p5, %p177_p2  ;;  %s158_s19 = sand.u32 1, %s2359_s8  }
  0x20   : > { %s292_s21 = ssub.s32 %s3239_s17, %s4012_s23  ;;  %s293_s15 = ssub.s32 %s3235_s16, %s4008_s22 }
  0x21   : > { %s294_s5 = sor.u32 %s293_s15, %s292_s21  ;;  %s297_s2 = sadd.s32 1, %s3207_s9 }
  0x22   : > { %p2361_p7 = scmp.lt.s32.totalorder %s158_s19, 0  ;;  %s165_s7 = sadd.s32 2, %s158_s19 }
  0x23   : > { %p295_p8 = scmp.eq.s32.totalorder %s294_s5, 0  ;;  %p307_p9 = scmp.ne.s32.totalorder %s3207_s9, %s3203_s30 }
  0x24   : > { %s4016_s7 = smov (!%p2361_p7, %s165_s7), %s158_s19  ;;  %s3961_s8 = sadd.s32 4294967295, %s3243_s18  }
  0x25   : > { %s3432_s20 = scalar_select %p295_p8, %s3207_s9, %s297_s2  }
  0x26   : > { %s167_s24 = ssub.s32 %s4014_s25, %s4016_s7  ;;  %p308_p10 = scmp.eq.s32.totalorder %s3961_s8, 7 }
  0x27   : > { %3960 = sst [smem:[#allocation20_spill]] %s3432_s20  ;;  %p168_p11 = scmp.eq.s32.totalorder %s167_s24, 0 }
  0x28   : > { %s350_s23 = sor.u32 %s294_s5, %s167_s24  ;;  %p3437_p12 = por %p308_p10, %p307_p9 }
  0x29   : > { %p351_p13 = scmp.eq.s32.totalorder %s350_s23, 0  ;;  %s3963_s21 = sadd.s32 1, %s3215_s11 }
  0x2a   : > { %s3444_s22 = scalar_select %p168_p11, %s3215_s11, %s3963_s21  }
  0x2b   : > { %s353_s17 = sadd.s32 1, %s3199_s29  ;;  %p363_p0 = scmp.ne.s32.totalorder %s3199_s29, %s3195_s28 }
  0x2c   : > { %3964 = sst [smem:[#allocation21_spill]] %s3444_s22  ;;  %p369_p2 = scmp.ne.s32.totalorder %s3195_s28, %s3191_s27 }
  0x2d   : > { %s3450_s16 = scalar_select %p351_p13, %s3199_s29, %s353_s17  }
  0x2e   : > { %p3452_p1 = por %p363_p0, %p308_p10  ;;  %s3967_s19 = sadd.s32 4294967294, %s3243_s18  }
  0x2f   : > { %3965 = sst [smem:[#allocation22_spill]] %s3450_s16  ;;  %p370_p3 = scmp.eq.s32.totalorder %s3967_s19, 7 }
  0x30   : > { %p2375_p5 = scmp.ge.s32.totalorder %s3243_s18, 8 }
  0x31   : > { %p3460_p4 = por %p370_p3, %p369_p2 }
  0x32   : > { %395 = sbr.rel (%p2375_p5) target bundleno = 67 (0x43), region = 28 }
  0x33   : > { %s3968_s5 = scalar_select %p3460_p4, 1, 0 }
  0x35   : > { %3969 = sst [smem:[#allocation23_spill]] %s3968_s5 }
  0x37   : > { %437 = sbr.rel (!%p3420_p6) target bundleno = 67 (0x43), region = 36  ;;  %s439_s17 = sand.u32 (%p3420_p6), 1, %s3215_s11  }
  0x38   : > { %s2380_s23 = sshll.u32 (%p3420_p6), %s4014_s25, 2  ;;  %s2376_s7 = sshll.u32 (%p3420_p6), %s439_s17, 4 }
  0x39   : > { %s3970_s3 = sld [smem:[#allocation25_spill]] (%p3420_p6)  ;;  %s441_s19 = scalar_lea.vmem (%p3420_p6), [#allocation4], %s2376_s7 }
  0x3f   : > { %s456_s21 = scalar_lea.vmem %s3970_s3, %s2380_s23 }
  0x40   : > { %v473_v0 = vld [vmem:[%s456_s21] sm:$0xf]  ;;  %v475_v1 = vld [vmem:[%s456_s21 + $0x8] sm:$0xf]  ;;  %v477_v2 = vld [vmem:[%s456_s21 + $0x10] sm:$0xf] }
  0x41   : > { %474 = vst [vmem:[%s441_s19] sm:$0xf] %v473_v0  ;;  %476 = vst [vmem:[%s441_s19 + $0x4] sm:$0xf] %v475_v1  ;;  %v479_v3 = vld [vmem:[%s456_s21 + $0x18] sm:$0xf] }
  0x42   : > { %478 = vst [vmem:[%s441_s19 + $0x8] sm:$0xf] %v477_v2  ;;  %480 = vst [vmem:[%s441_s19 + $0xc] sm:$0xf] %v479_v3 }
  0x43 PF: > { %p2381_p6 = scmp.ge.s32.totalorder %s3243_s18, 1  ;;  %p549_p7 = scmp.lt.s32.totalorder %s3243_s18, 9 }
  0x45   : > { %p550_p8 = pnand %p2381_p6, %p549_p7 }
  0x46   : > { %s556_s25 = sand.u32 (!%p550_p8), 1, %s3211_s10   ;;  %s624_s26 = sand.u32 (!%p550_p8), 1, %s3203_s30  }
  0x47   : > { %553 = sbr.rel (%p550_p8) target bundleno = 1102 (0x44e), region = 85  ;;  %s3476_s17 = sshll.u32 (!%p550_p8), %s556_s25, 4 }
  0x48   : > { %s2383_s23 = sshll.u32 (!%p550_p8), %s624_s26, 6  ;;  %s3936_s7 = sand.u32 (!%p550_p8), 1, %s3195_s28  }
  0x49   : > { %s634_s24 = sadd.s32 (!%p550_p8), %s3219_s12, %s3223_s13  ;;  %s2384_s8 = sshll.u32 (!%p550_p8), %s3936_s7, 6 }
  0x4a   : > { %p635_p9 = scmp.lt.s32.totalorder (!%p550_p8), %s634_s24, 0  ;;  %s636_s21 = ssub.s32 (!%p550_p8), 0, %s634_s24 }
  0x4b   : > { %s2385_s19 = smin.u32 (!%p550_p8), %s636_s21, %s634_s24  ;;  %p648_p10 = scmp.lt.s32.totalorder (!%p550_p8), %s3227_s14, 1 }
  0x4c   : > { %s638_s3 = sand.u32 1, %s2385_s19   ;;  %s558_s16 = scalar_lea.vmem [#allocation4], %s3476_s17 }
  0x4d   : > { %s639_s22 = ssub.s32 0, %s638_s3  ;;  %s3509_s29 = scalar_lea.vmem [#allocation5], %s2383_s23  }
  0x4e   : > { %s4018_s22 = smov (!%p635_p9, %s639_s22), %s638_s3  ;;  %s3511_s5 = scalar_lea.vmem [#allocation6], %s2384_s8 }
  0x4f   : > { %s3485_s11 = scalar_select %p648_p10, %s3227_s14, 1 }
  0x50   : > { %p2387_p11 = scmp.lt.s32.totalorder %s4018_s22, 0  ;;  %s645_s30 = sadd.s32 2, %s4018_s22 }
  0x51   : > { %s2389_s3 = sshll.u32 %s3485_s11, 5  ;;  %p2394_p2 = scmp.ne.s32.totalorder %s3219_s12, 0 }
  0x52   : > { %s4020_s30 = smov (!%p2387_p11, %s645_s30), %s4018_s22  ;;  %s3971_s23 = sld [smem:[#allocation24_spill]] (!%p2394_p2) }
  0x53   : > { %s2388_s24 = sshll.u32 %s4020_s30, 4  ;;  %p696_p13 = scmp.lt.s32.totalorder %s4020_s30, 1 }
  0x54   : > { %p650_p0 = scmp.lt.s32.totalorder %s2388_s24, 31 }
  0x55   : > { %s3497_s21 = scalar_select %p696_p13, %s4020_s30, 1 }
  0x56   : > { %s4022_s24 = smov (!%p650_p0, %s2388_s24), 31  ;;  %742 = sbr.rel (%p2394_p2) target bundleno = 314 (0x13a), region = 93 }
  0x57   : > { %s698_s20 = scalar_lea.vmem %s3922_s4, %s3497_s21  ;;  %s653_s9 = sadd.s32 %s2389_s3, %s4022_s24 }
  0x58   : > { %s2390_s10 = sshll.u32 %s653_s9, 2 }
  0x59   : > { %s3506_s26 = scalar_lea.vmem %s3918_s0, %s2390_s10 }
  0x5b   : > { %v2977_v4 = vld [vmem:[%s3919_s1 + $0x8] sm:$0xff]   ;;  %vm822_vm0 = vcmask 261120   ;;  %v2978_v5 = vld [vmem:[%s3919_s1] sm:$0xff]   ;;  %v3277_v7 = vmov 0.0   ;;  %v2983_v11 = vld [vmem:[%s3506_s26 + $0x10] sm:$0xff]   ;;  %vm1024_vm1 = vcmask 257024  }
  0x5c   : > { %2673 = vmatprep.subr.bf16.mxu0 %v2977_v4  ;;  %2765 = vmatprep.subr.bf16.mxu1 %v2977_v4  ;;  %v2979_v6 = vld [vmem:[%s3506_s26] sm:$0xff]   ;;  %1041 = vst.msk [vmem:[#allocation3] sm:$0xff] %vm822_vm0, %v3277_v7  ;;  %1042 = vst.msk [vmem:[#allocation3 + $0x8] sm:$0xff] %vm822_vm0, %v3277_v7  ;;  %v2981_v9 = vld [vmem:[%s3506_s26 + $0x8] sm:$0xff]  }
  0x5d   : > { %1043 = vst.msk [vmem:[#allocation3 + $0x10] sm:$0xff] %vm822_vm0, %v3277_v7  ;;  %1044 = vst.msk [vmem:[#allocation3 + $0x18] sm:$0xff] %vm822_vm0, %v3277_v7  ;;  %2674 = vmatpush3.bf16.msra.mxu0 %v2977_v4  ;;  %2767 = vmatpush3.bf16.msra.mxu1 %v2977_v4  ;;  %v2980_v8 = vld [vmem:[%s3506_s26 + $0x20] sm:$0xff]   ;;  %v2982_v10 = vld [vmem:[%s3506_s26 + $0x28] sm:$0xff]  }
  0x5e   : > { %1045 = vst.msk [vmem:[#allocation3 + $0x20] sm:$0xff] %vm822_vm0, %v3277_v7  ;;  %1046 = vst.msk [vmem:[#allocation3 + $0x28] sm:$0xff] %vm822_vm0, %v3277_v7  ;;  %2675 = vmatprep.subr.bf16.mxu0 %v2978_v5  ;;  %2766 = vmatprep.subr.bf16.mxu1 %v2978_v5  ;;  %v2984_v12 = vld [vmem:[%s3506_s26 + $0x30] sm:$0xff]   ;;  %v2985_v13 = vld [vmem:[%s3506_s26 + $0x18] sm:$0xff]  }
  0x5f   : > { %1047 = vst.msk [vmem:[#allocation3 + $0x30] sm:$0xff] %vm822_vm0, %v3277_v7  ;;  %1048 = vst.msk [vmem:[#allocation3 + $0x38] sm:$0xff] %vm822_vm0, %v3277_v7  ;;  %2677 = vmatprep.mubr.msk.bf16.mxu0 %vm822_vm0, %v2979_v6  ;;  %2685 = vmatprep.mubr.msk.bf16.mxu1 %vm822_vm0, %v2980_v8  ;;  %v2986_v14 = vld [vmem:[%s3506_s26 + $0x38] sm:$0xff]   ;;  %v3555_v15 = vld [vmem:[%s3971_s23] ss:$0 sm:$0xff] }
  0x60   : > { %1049 = vst.msk [vmem:[#allocation3 + $0x40] sm:$0xff] %vm822_vm0, %v3277_v7  ;;  %1050 = vst.msk [vmem:[#allocation3 + $0x48] sm:$0xff] %vm822_vm0, %v3277_v7 }
  0x61   : > { %1051 = vst.msk [vmem:[#allocation3 + $0x50] sm:$0xff] %vm822_vm0, %v3277_v7  ;;  %1052 = vst.msk [vmem:[#allocation3 + $0x58] sm:$0xff] %vm822_vm0, %v3277_v7  ;;  %2676 = vmatpush3.bf16.msra.mxu0 %v2978_v5  ;;  %2768 = vmatpush3.bf16.msra.mxu1 %v2978_v5 }
  0x62   : > { %1053 = vst.msk [vmem:[#allocation3 + $0x60] sm:$0xff] %vm822_vm0, %v3277_v7  ;;  %1054 = vst.msk [vmem:[#allocation3 + $0x68] sm:$0xff] %vm822_vm0, %v3277_v7 }
  0x63   : > { %1055 = vst.msk [vmem:[#allocation3 + $0x70] sm:$0xff] %vm822_vm0, %v3277_v7  ;;  %1056 = vst.msk [vmem:[#allocation3 + $0x78] sm:$0xff] %vm822_vm0, %v3277_v7 }
  0x64   : > { %2678 = vmatmul.mubr.msk.bf16.vlgmr.msra.gmra.mxu0 %vm822_vm0, %v2981_v9  ;;  %2686 = vmatmul.mubr.msk.bf16.vlgmr.msra.gmra.mxu1 %vm822_vm0, %v2982_v10 }
  0x65   : > { %2681 = vmatprep.mubr.msk.bf16.mxu0 %vm822_vm0, %v2983_v11  ;;  %2689 = vmatprep.mubr.msk.bf16.mxu1 %vm822_vm0, %v2984_v12 }
  0x6c   : > { %2682 = vmatmul.mubr.msk.bf16.gmra.mxu0 %vm822_vm0, %v2985_v13  ;;  %2690 = vmatmul.mubr.msk.bf16.gmra.mxu1 %vm822_vm0, %v2986_v14 }
 0x124   : > { %v2679_v16 = vpop.f32.mrf.mxu0  ;;  %v2687_v17 = vpop.f32.mrf.mxu1 }
 0x125   : > { %v890_v18 = vadd.f32 %v2679_v16, %v3555_v15  ;;  %v922_v19 = vadd.f32 %v2687_v17, %v3555_v15 }
 0x126   : > { %v881_v20 = vpop.f32.mrf.mxu0  ;;  %v913_v21 = vpop.f32.mrf.mxu1 }
 0x127   : > { %v946_v22 = vmax.f32 %v890_v18, 0.0  ;;  %v954_v23 = vmax.f32 %v922_v19, 0.0  ;;  %v882_v24 = vadd.f32 %v3555_v15, %v881_v20  ;;  %v914_v25 = vadd.f32 %v3555_v15, %v913_v21 }
 0x128   : > { %v2680_v26 = vpop.f32.mrf.mxu0  ;;  %v2688_v27 = vpop.f32.mrf.mxu1 }
 0x129   : > { %v2531_v28 = vpack.c.bf16 %v946_v22, %v946_v22  ;;  %v2539_v29 = vpack.c.bf16 %v954_v23, %v954_v23  ;;  %v944_v30 = vmax.f32 %v882_v24, 0.0  ;;  %v952_v31 = vmax.f32 %v914_v25, 0.0 }
 0x12a   : > { %v893_v32 = vadd.f32 %v2680_v26, %v3555_v15  ;;  %v925_v33 = vadd.f32 %v2688_v27, %v3555_v15  ;;  %v884_v34 = vpop.f32.mrf.mxu0  ;;  %v916_v35 = vpop.f32.mrf.mxu1 }
 0x12b   : > { %1027 = vst.msk [vmem:[#allocation2 + $0x8] sm:$0xf] %vm1024_vm1, %v2531_v28  ;;  %1035 = vst.msk [vmem:[#allocation2 + $0x28] sm:$0xf] %vm1024_vm1, %v2539_v29  ;;  %v2529_v36 = vpack.c.bf16 %v944_v30, %v944_v30  ;;  %v2537_v37 = vpack.c.bf16 %v952_v31, %v952_v31  ;;  %v885_v38 = vadd.f32 %v3555_v15, %v884_v34 }
 0x12c   : > { %v917_v39 = vadd.f32 %v3555_v15, %v916_v35  ;;  %v947_v40 = vmax.f32 %v893_v32, 0.0  ;;  %v955_v41 = vmax.f32 %v925_v33, 0.0  ;;  %v2683_v42 = vpop.f32.mrf.mxu0  ;;  %v2691_v43 = vpop.f32.mrf.mxu1 }
 0x12d   : > { %1025 = vst.msk [vmem:[#allocation2] sm:$0xf] %vm1024_vm1, %v2529_v36  ;;  %1033 = vst.msk [vmem:[#allocation2 + $0x20] sm:$0xf] %vm1024_vm1, %v2537_v37  ;;  %v945_v44 = vmax.f32 %v885_v38, 0.0  ;;  %v906_v46 = vadd.f32 %v2683_v42, %v3555_v15  ;;  %v938_v47 = vadd.f32 %v2691_v43, %v3555_v15 }
 0x12e   : > { %v953_v45 = vmax.f32 %v917_v39, 0.0  ;;  %v2532_v48 = vpack.c.bf16 %v947_v40, %v947_v40  ;;  %v2540_v49 = vpack.c.bf16 %v955_v41, %v955_v41  ;;  %v897_v50 = vpop.f32.mrf.mxu0  ;;  %v929_v51 = vpop.f32.mrf.mxu1 }
 0x12f   : > { %v2530_v52 = vpack.c.bf16 %v945_v44, %v945_v44  ;;  %v950_v54 = vmax.f32 %v906_v46, 0.0  ;;  %v958_v55 = vmax.f32 %v938_v47, 0.0  ;;  %v898_v56 = vadd.f32 %v3555_v15, %v897_v50 }
 0x130   : > { %v2538_v53 = vpack.c.bf16 %v953_v45, %v953_v45  ;;  %1028 = vst.msk [vmem:[#allocation2 + $0xc] sm:$0xf] %vm1024_vm1, %v2532_v48  ;;  %1036 = vst.msk [vmem:[#allocation2 + $0x2c] sm:$0xf] %vm1024_vm1, %v2540_v49  ;;  %v930_v57 = vadd.f32 %v3555_v15, %v929_v51  ;;  %v2684_v58 = vpop.f32.mrf.mxu0  ;;  %v2692_v59 = vpop.f32.mrf.mxu1 }
 0x131   : > { %1026 = vst.msk [vmem:[#allocation2 + $0x4] sm:$0xf] %vm1024_vm1, %v2530_v52  ;;  %v2535_v60 = vpack.c.bf16 %v950_v54, %v950_v54  ;;  %v2543_v61 = vpack.c.bf16 %v958_v55, %v958_v55  ;;  %v909_v62 = vadd.f32 %v2684_v58, %v3555_v15  ;;  %v941_v63 = vadd.f32 %v2692_v59, %v3555_v15 }
 0x132   : > { %1034 = vst.msk [vmem:[#allocation2 + $0x24] sm:$0xf] %vm1024_vm1, %v2538_v53  ;;  %v948_v0 = vmax.f32 %v898_v56, 0.0  ;;  %v956_v1 = vmax.f32 %v930_v57, 0.0  ;;  %v900_v2 = vpop.f32.mrf.mxu0  ;;  %v932_v3 = vpop.f32.mrf.mxu1 }
 0x133   : > { %1031 = vst.msk [vmem:[#allocation2 + $0x18] sm:$0xf] %vm1024_vm1, %v2535_v60  ;;  %1039 = vst.msk [vmem:[#allocation2 + $0x38] sm:$0xf] %vm1024_vm1, %v2543_v61  ;;  %v951_v4 = vmax.f32 %v909_v62, 0.0  ;;  %v959_v5 = vmax.f32 %v941_v63, 0.0  ;;  %v901_v6 = vadd.f32 %v3555_v15, %v900_v2  ;;  %v933_v7 = vadd.f32 %v3555_v15, %v932_v3 }
 0x134   : > { %v2533_v8 = vpack.c.bf16 %v948_v0, %v948_v0  ;;  %v2541_v9 = vpack.c.bf16 %v956_v1, %v956_v1 }
 0x135   : > { %v2536_v10 = vpack.c.bf16 %v951_v4, %v951_v4  ;;  %v2544_v11 = vpack.c.bf16 %v959_v5, %v959_v5  ;;  %v949_v12 = vmax.f32 %v901_v6, 0.0  ;;  %v957_v13 = vmax.f32 %v933_v7, 0.0 }
 0x136   : > { %1029 = vst.msk [vmem:[#allocation2 + $0x10] sm:$0xf] %vm1024_vm1, %v2533_v8  ;;  %1037 = vst.msk [vmem:[#allocation2 + $0x30] sm:$0xf] %vm1024_vm1, %v2541_v9 }
 0x137   : > { %1032 = vst.msk [vmem:[#allocation2 + $0x1c] sm:$0xf] %vm1024_vm1, %v2536_v10  ;;  %1040 = vst.msk [vmem:[#allocation2 + $0x3c] sm:$0xf] %vm1024_vm1, %v2544_v11  ;;  %v2534_v14 = vpack.c.bf16 %v949_v12, %v949_v12  ;;  %v2542_v16 = vpack.c.bf16 %v957_v13, %v957_v13 }
 0x139   : > { %1030 = vst.msk [vmem:[#allocation2 + $0x14] sm:$0xf] %vm1024_vm1, %v2534_v14  ;;  %1038 = vst.msk [vmem:[#allocation2 + $0x34] sm:$0xf] %vm1024_vm1, %v2542_v16 }
 0x13a PF: > { %v2987_v15 = vld [vmem:[%s558_s16 + $0x8] sm:$0xff]   ;;  %v2988_v17 = vld [vmem:[%s558_s16] sm:$0xff]   ;;  %vm1136_vm2 = vcmask 261120   ;;  %p2473_p3 = scmp.ne.s32.totalorder %s3219_s12, 1 }
 0x13b   : > { %2693 = vmatprep.subr.bf16.mxu0 %v2987_v15  ;;  %v2989_v18 = vld [vmem:[#allocation2] sm:$0xff]   ;;  %v2990_v19 = vld [vmem:[#allocation2 + $0x8] sm:$0xff]   ;;  %v2997_v26 = vld [vmem:[%s3506_s26 + $0x38] sm:$0xff]   ;;  %s3973_s19 = scalar_lea.vmem (!%p2473_p3), %s3924_s6, %s3485_s11 }
 0x13c   : > { %2694 = vmatpush3.bf16.msra.mxu0 %v2987_v15  ;;  %2697 = vmatprep.mubr.msk.bf16.mxu0 %vm1136_vm2, %v2989_v18  ;;  %v2993_v22 = vld [vmem:[#allocation2 + $0x20] sm:$0xff]   ;;  %v2994_v23 = vld [vmem:[#allocation2 + $0x28] sm:$0xff]   ;;  %v2998_v27 = vld [vmem:[%s3506_s26 + $0x30] sm:$0xff]  }
 0x13d   : > { %2695 = vmatprep.subr.bf16.mxu0 %v2988_v17  ;;  %2769 = vmatprep.subr.bf16.mxu1 %v2997_v26  ;;  %v2999_v28 = vld [vmem:[%s3506_s26 + $0x28] sm:$0xff]   ;;  %v3000_v29 = vld [vmem:[%s3506_s26 + $0x20] sm:$0xff]   ;;  %v3001_v30 = vld [vmem:[%s3506_s26 + $0x18] sm:$0xff]  }
 0x13e   : > { %v2992_v21 = vld [vmem:[#allocation2 + $0x18] sm:$0xff]   ;;  %2777 = vmatpush3.bf16.msra.mxu1 %v2997_v26  ;;  %v3002_v31 = vld [vmem:[%s3506_s26 + $0x10] sm:$0xff]   ;;  %v3003_v32 = vld [vmem:[%s3506_s26 + $0x8] sm:$0xff]  }
 0x13f   : > { %v2996_v25 = vld [vmem:[#allocation2 + $0x38] sm:$0xff]   ;;  %2770 = vmatprep.subr.bf16.mxu1 %v2998_v27  ;;  %v3004_v33 = vld [vmem:[%s3506_s26] sm:$0xff]   ;;  %s3972_s26 = sld [smem:[#allocation26_spill]] (!%p2473_p3) }
 0x140   : > { %2696 = vmatpush3.bf16.msra.mxu0 %v2988_v17  ;;  %v2991_v20 = vld [vmem:[#allocation2 + $0x10] sm:$0xff]   ;;  %v3614_v34 = vld [vmem:[%s698_s20] ss:$0 sm:$0xff] }
 0x141   : > { %v2995_v24 = vld [vmem:[#allocation2 + $0x30] sm:$0xff]   ;;  %2713 = vmatprep.subr.bf16.mxu0 %v2997_v26 }
 0x142   : > { %2778 = vmatpush3.bf16.msra.mxu1 %v2998_v27 }
 0x143   : > { %2698 = vmatmul.mubr.msk.bf16.vlgmr.msra.gmra.mxu0 %vm1136_vm2, %v2990_v19  ;;  %2771 = vmatprep.subr.bf16.mxu1 %v2999_v28 }
 0x144   : > { %2701 = vmatprep.mubr.msk.bf16.mxu0 %vm1136_vm2, %v2991_v20  ;;  %2714 = vmatpush3.bf16.msra.mxu0 %v2997_v26 }
 0x145   : > { %2715 = vmatprep.subr.bf16.mxu0 %v2998_v27 }
 0x146   : > { %2779 = vmatpush3.bf16.msra.mxu1 %v2999_v28 }
 0x147   : > { %2772 = vmatprep.subr.bf16.mxu1 %v3000_v29 }
 0x148   : > { %2716 = vmatpush3.bf16.msra.mxu0 %v2998_v27 }
 0x149   : > { %2717 = vmatprep.subr.bf16.mxu0 %v2999_v28 }
 0x14a   : > { %2780 = vmatpush3.bf16.msra.mxu1 %v3000_v29 }
 0x14b   : > { %2702 = vmatmul.mubr.msk.bf16.gmra.mxu0 %vm1136_vm2, %v2992_v21  ;;  %2773 = vmatprep.subr.bf16.mxu1 %v3001_v30 }
 0x14c   : > { %2705 = vmatprep.mubr.msk.bf16.mxu0 %vm1136_vm2, %v2993_v22  ;;  %2718 = vmatpush3.bf16.msra.mxu0 %v2999_v28 }
 0x14d   : > { %2719 = vmatprep.subr.bf16.mxu0 %v3000_v29 }
 0x14e   : > { %2781 = vmatpush3.bf16.msra.mxu1 %v3001_v30 }
 0x14f   : > { %2774 = vmatprep.subr.bf16.mxu1 %v3002_v31 }
 0x150   : > { %2720 = vmatpush3.bf16.msra.mxu0 %v3000_v29 }
 0x151   : > { %2721 = vmatprep.subr.bf16.mxu0 %v3001_v30 }
 0x152   : > { %2782 = vmatpush3.bf16.msra.mxu1 %v3002_v31 }
 0x153   : > { %2706 = vmatmul.mubr.msk.bf16.gmra.mxu0 %vm1136_vm2, %v2994_v23  ;;  %2775 = vmatprep.subr.bf16.mxu1 %v3003_v32 }
 0x154   : > { %2709 = vmatprep.mubr.msk.bf16.mxu0 %vm1136_vm2, %v2995_v24  ;;  %2722 = vmatpush3.bf16.msra.mxu0 %v3001_v30 }
 0x155   : > { %2723 = vmatprep.subr.bf16.mxu0 %v3002_v31 }
 0x156   : > { %2783 = vmatpush3.bf16.msra.mxu1 %v3003_v32 }
 0x157   : > { %2776 = vmatprep.subr.bf16.mxu1 %v3004_v33 }
 0x158   : > { %2724 = vmatpush3.bf16.msra.mxu0 %v3002_v31 }
 0x159   : > { %2725 = vmatprep.subr.bf16.mxu0 %v3003_v32 }
 0x15a   : > { %2784 = vmatpush3.bf16.msra.mxu1 %v3004_v33 }
 0x15b   : > { %2710 = vmatmul.mubr.msk.bf16.gmra.mxu0 %vm1136_vm2, %v2996_v25 }
 0x15c   : > { %2726 = vmatpush3.bf16.msra.mxu0 %v3003_v32 }
 0x15d   : > { %2727 = vmatprep.subr.bf16.mxu0 %v3004_v33 }
 0x160   : > { %2728 = vmatpush3.bf16.msra.mxu0 %v3004_v33 }
 0x203   : > { %v2699_v35 = vpop.f32.mrf.mxu0 }
 0x204   : > { %v1204_v36 = vadd.f32 %v2699_v35, %v3614_v34 }
 0x205   : > { %v1195_v37 = vpop.f32.mrf.mxu0 }
 0x206   : > { %v1260_v38 = vsub.f32 0.0, %v1204_v36  ;;  %v1196_v39 = vadd.f32 %v3614_v34, %v1195_v37 }
 0x207   : > { %v2700_v40 = vpop.f32.mrf.mxu0 }
 0x208   : > { %v1278_v41 = vmul.f32 1.442695, %v1260_v38  ;;  %v1258_v42 = vsub.f32 0.0, %v1196_v39  ;;  %v1207_v43 = vadd.f32 %v2700_v40, %v3614_v34 }
 0x209   : > { %v1198_v44 = vpop.f32.mrf.mxu0 }
 0x20a   : > { %3005 = vpow2.f32 %v1278_v41  ;;  %v1274_v45 = vmul.f32 1.442695, %v1258_v42  ;;  %v1261_v46 = vsub.f32 0.0, %v1207_v43  ;;  %v1199_v47 = vadd.f32 %v3614_v34, %v1198_v44 }
 0x20b   : > { %v2703_v48 = vpop.f32.mrf.mxu0 }
 0x20c   : > { %3007 = vpow2.f32 %v1274_v45  ;;  %v1280_v49 = vmul.f32 1.442695, %v1261_v46  ;;  %v1259_v50 = vsub.f32 0.0, %v1199_v47  ;;  %v1220_v51 = vadd.f32 %v2703_v48, %v3614_v34 }
 0x20d   : > { %v1211_v52 = vpop.f32.mrf.mxu0 }
 0x20e   : > { %3009 = vpow2.f32 %v1280_v49  ;;  %v1276_v53 = vmul.f32 1.442695, %v1259_v50  ;;  %v1264_v54 = vsub.f32 0.0, %v1220_v51  ;;  %v1212_v55 = vadd.f32 %v3614_v34, %v1211_v52 }
 0x20f   : > { %v2704_v56 = vpop.f32.mrf.mxu0 }
 0x210   : > { %3011 = vpow2.f32 %v1276_v53  ;;  %v1286_v57 = vmul.f32 1.442695, %v1264_v54  ;;  %v1262_v58 = vsub.f32 0.0, %v1212_v55  ;;  %v1223_v59 = vadd.f32 %v2704_v56, %v3614_v34 }
 0x211   : > { %v1214_v60 = vpop.f32.mrf.mxu0 }
 0x212   : > { %3013 = vpow2.f32 %v1286_v57  ;;  %v1282_v61 = vmul.f32 1.442695, %v1262_v58  ;;  %v1265_v62 = vsub.f32 0.0, %v1223_v59  ;;  %v1215_v63 = vadd.f32 %v3614_v34, %v1214_v60 }
 0x213   : > { %v2707_v0 = vpop.f32.mrf.mxu0 }
 0x214   : > { %3015 = vpow2.f32 %v1282_v61  ;;  %v1288_v1 = vmul.f32 1.442695, %v1265_v62  ;;  %v1263_v2 = vsub.f32 0.0, %v1215_v63  ;;  %v1236_v3 = vadd.f32 %v2707_v0, %v3614_v34 }
 0x215   : > { %v1227_v4 = vpop.f32.mrf.mxu0 }
 0x216   : > { %3017 = vpow2.f32 %v1288_v1  ;;  %v1284_v5 = vmul.f32 1.442695, %v1263_v2  ;;  %v1268_v6 = vsub.f32 0.0, %v1236_v3  ;;  %v1228_v7 = vadd.f32 %v3614_v34, %v1227_v4 }
 0x217   : > { %v3006_v8 = vpop.eup %3005  ;;  %v2708_v9 = vpop.f32.mrf.mxu0 }
 0x218   : > { %v1308_v10 = vadd.f32 1.0, %v3006_v8  ;;  %3019 = vpow2.f32 %v1284_v5  ;;  %v1294_v11 = vmul.f32 1.442695, %v1268_v6  ;;  %v1266_v12 = vsub.f32 0.0, %v1228_v7 }
 0x219   : > { %v3008_v13 = vpop.eup %3007  ;;  %v1239_v14 = vadd.f32 %v2708_v9, %v3614_v34  ;;  %v1230_v16 = vpop.f32.mrf.mxu0 }
 0x21a   : > { %3021 = vrcp.f32 %v1308_v10  ;;  %v1306_v15 = vadd.f32 1.0, %v3008_v13  ;;  %v1290_v17 = vmul.f32 1.442695, %v1266_v12  ;;  %v1231_v18 = vadd.f32 %v3614_v34, %v1230_v16 }
 0x21b   : > { %v3010_v19 = vpop.eup %3009  ;;  %3023 = vpow2.f32 %v1294_v11  ;;  %v1269_v20 = vsub.f32 0.0, %v1239_v14  ;;  %v2711_v21 = vpop.f32.mrf.mxu0 }
 0x21c   : > { %3025 = vrcp.f32 %v1306_v15  ;;  %v1309_v22 = vadd.f32 1.0, %v3010_v19  ;;  %v1267_v23 = vsub.f32 0.0, %v1231_v18  ;;  %v1252_v24 = vadd.f32 %v2711_v21, %v3614_v34 }
 0x21d   : > { %v3012_v25 = vpop.eup %3011  ;;  %3027 = vpow2.f32 %v1290_v17  ;;  %v1296_v26 = vmul.f32 1.442695, %v1269_v20  ;;  %v1243_v27 = vpop.f32.mrf.mxu0 }
 0x21e   : > { %3029 = vrcp.f32 %v1309_v22  ;;  %v1307_v28 = vadd.f32 1.0, %v3012_v25  ;;  %v1292_v29 = vmul.f32 1.442695, %v1267_v23  ;;  %v1272_v30 = vsub.f32 0.0, %v1252_v24 }
 0x21f   : > { %v3014_v31 = vpop.eup %3013  ;;  %3031 = vpow2.f32 %v1296_v26  ;;  %v1244_v32 = vadd.f32 %v3614_v34, %v1243_v27  ;;  %v2712_v33 = vpop.f32.mrf.mxu0  ;;  %v1436_v27 = vld [vmem:[#allocation3 + $0x10] sm:$0xff] }
 0x220   : > { %3033 = vrcp.f32 %v1307_v28  ;;  %v1312_v35 = vadd.f32 1.0, %v3014_v31  ;;  %v1302_v36 = vmul.f32 1.442695, %v1272_v30  ;;  %v1255_v37 = vadd.f32 %v2712_v33, %v3614_v34 }
 0x221   : > { %v3016_v38 = vpop.eup %3015  ;;  %3035 = vpow2.f32 %v1292_v29  ;;  %v1270_v39 = vsub.f32 0.0, %v1244_v32  ;;  %v1246_v40 = vpop.f32.mrf.mxu0  ;;  %v1434_v29 = vld [vmem:[#allocation3] sm:$0xff]  ;;  %v1437_v32 = vld [vmem:[#allocation3 + $0x18] sm:$0xff] }
 0x222   : > { %3037 = vrcp.f32 %v1312_v35  ;;  %v1310_v41 = vadd.f32 1.0, %v3016_v38  ;;  %v1273_v42 = vsub.f32 0.0, %v1255_v37  ;;  %v1247_v43 = vadd.f32 %v3614_v34, %v1246_v40 }
 0x223   : > { %v3018_v44 = vpop.eup %3017  ;;  %3039 = vpow2.f32 %v1302_v36  ;;  %v1298_v45 = vmul.f32 1.442695, %v1270_v39  ;;  %v1435_v36 = vld [vmem:[#allocation3 + $0x8] sm:$0xff]  ;;  %v1440_v39 = vld [vmem:[#allocation3 + $0x30] sm:$0xff] }
 0x224   : > { %3041 = vrcp.f32 %v1310_v41  ;;  %v1313_v46 = vadd.f32 1.0, %v3018_v44  ;;  %v1304_v47 = vmul.f32 1.442695, %v1273_v42  ;;  %v1271_v48 = vsub.f32 0.0, %v1247_v43  ;;  %v1438_v42 = vld [vmem:[#allocation3 + $0x20] sm:$0xff] }
 0x225   : > { %v3020_v49 = vpop.eup %3019  ;;  %3043 = vpow2.f32 %v1298_v45  ;;  %v1441_v45 = vld [vmem:[#allocation3 + $0x38] sm:$0xff] }
 0x226   : > { %3045 = vrcp.f32 %v1313_v46  ;;  %v1311_v50 = vadd.f32 1.0, %v3020_v49  ;;  %v1300_v51 = vmul.f32 1.442695, %v1271_v48  ;;  %v1439_v48 = vld [vmem:[#allocation3 + $0x28] sm:$0xff] }
 0x227   : > { %v3022_v52 = vpop.eup %3021  ;;  %3047 = vpow2.f32 %v1304_v47 }
 0x228   : > { %v3024_v53 = vpop.eup %3023  ;;  %3049 = vrcp.f32 %v1311_v50 }
 0x229   : > { %v3026_v54 = vpop.eup %3025  ;;  %3051 = vpow2.f32 %v1300_v51  ;;  %v1316_v55 = vadd.f32 1.0, %v3024_v53 }
 0x22a   : > { %v3028_v34 = vpop.eup %3027 }
 0x22b   : > { %v3030_v56 = vpop.eup %3029  ;;  %v1314_v58 = vadd.f32 1.0, %v3028_v34  ;;  %3053 = vrcp.f32 %v1316_v55 }
 0x22c   : > { %v3032_v57 = vpop.eup %3031  ;;  %v1355_v59 = vpack.c.bf16 %v3030_v56, %v3022_v52  ;;  %v1444_v52 = vld [vmem:[#allocation3 + $0x50] sm:$0xff]  ;;  %v1445_v56 = vld [vmem:[#allocation3 + $0x58] sm:$0xff] }
 0x22d   : > { %v3034_v60 = vpop.eup %3033  ;;  %v1317_v61 = vadd.f32 1.0, %v3032_v57 }
 0x22e   : > { %v3036_v62 = vpop.eup %3035  ;;  %v1354_v63 = vpack.c.bf16 %v3034_v60, %v3026_v54  ;;  %2620 = vst [vmem:[%s3511_s5 + $0x8] sm:$0xff] %v1355_v59   ;;  %v1442_v54 = vld [vmem:[#allocation3 + $0x40] sm:$0xff] }
 0x22f   : > { %v3038_v0 = vpop.eup %3037  ;;  %3055 = vrcp.f32 %v1317_v61  ;;  %v1315_v1 = vadd.f32 1.0, %v3036_v62  ;;  %v1448_v62 = vld [vmem:[#allocation3 + $0x70] sm:$0xff] }
 0x230   : > { %v3040_v2 = vpop.eup %3039  ;;  %3057 = vrcp.f32 %v1314_v58  ;;  %2584 = vst [vmem:[%s3511_s5] sm:$0xff] %v1354_v63   ;;  %2729 = vmatprep.mubr.bf16.mxu0 %v1354_v63 }
 0x231   : > { %v3042_v3 = vpop.eup %3041  ;;  %3059 = vrcp.f32 %v1315_v1  ;;  %2730 = vmatmul.mubr.bf16.vlgmr.msra.gmra.mxu0 %v1355_v59  ;;  %v1320_v5 = vadd.f32 1.0, %v3040_v2  ;;  %v1443_v59 = vld [vmem:[#allocation3 + $0x48] sm:$0xff]  ;;  %v1446_v1 = vld [vmem:[#allocation3 + $0x60] sm:$0xff] }
 0x232   : > { %v3044_v4 = vpop.eup %3043 }
 0x233   : > { %v3046_v6 = vpop.eup %3045  ;;  %v1318_v8 = vadd.f32 1.0, %v3044_v4  ;;  %3061 = vrcp.f32 %v1320_v5  ;;  %v1449_v4 = vld [vmem:[#allocation3 + $0x78] sm:$0xff] }
 0x234   : > { %v3048_v7 = vpop.eup %3047  ;;  %v1357_v9 = vpack.c.bf16 %v3046_v6, %v3038_v0 }
 0x235   : > { %v3050_v10 = vpop.eup %3049  ;;  %v1321_v11 = vadd.f32 1.0, %v3048_v7  ;;  %v1447_v7 = vld [vmem:[#allocation3 + $0x68] sm:$0xff] }
 0x236   : > { %v3052_v12 = vpop.eup %3051  ;;  %v1356_v13 = vpack.c.bf16 %v3050_v10, %v3042_v3  ;;  %2622 = vst [vmem:[%s3511_s5 + $0x18] sm:$0xff] %v1357_v9  }
 0x237   : > { %3063 = vrcp.f32 %v1321_v11  ;;  %v1319_v14 = vadd.f32 1.0, %v3052_v12 }
 0x238   : > { %3065 = vrcp.f32 %v1318_v8  ;;  %2621 = vst [vmem:[%s3511_s5 + $0x10] sm:$0xff] %v1356_v13   ;;  %2733 = vmatprep.mubr.bf16.mxu1 %v1356_v13  ;;  %v3054_v16 = vpop.eup %3053 }
 0x239   : > { %3067 = vrcp.f32 %v1319_v14  ;;  %2734 = vmatmul.mubr.bf16.vlgmr.msra.gmra.mxu1 %v1357_v9 }
 0x23c   : > { %v3056_v15 = vpop.eup %3055 }
 0x23d   : > { %v3058_v17 = vpop.eup %3057  ;;  %v1359_v18 = vpack.c.bf16 %v3056_v15, %v3054_v16 }
 0x23e   : > { %v3060_v19 = vpop.eup %3059 }
 0x23f   : > { %v1358_v20 = vpack.c.bf16 %v3060_v19, %v3058_v17  ;;  %2624 = vst [vmem:[%s3511_s5 + $0x28] sm:$0xff] %v1359_v18  }
 0x240   : > { %v3062_v21 = vpop.eup %3061 }
 0x241   : > { %2623 = vst [vmem:[%s3511_s5 + $0x20] sm:$0xff] %v1358_v20   ;;  %2737 = vmatprep.mubr.bf16.mxu1 %v1358_v20 }
 0x242   : > { %2738 = vmatmul.mubr.bf16.gmra.mxu1 %v1359_v18 }
 0x244   : > { %v3064_v22 = vpop.eup %3063 }
 0x245   : > { %v3066_v23 = vpop.eup %3065  ;;  %v1361_v24 = vpack.c.bf16 %v3064_v22, %v3062_v21 }
 0x246   : > { %v3068_v25 = vpop.eup %3067 }
 0x247   : > { %v1360_v26 = vpack.c.bf16 %v3068_v25, %v3066_v23  ;;  %2626 = vst [vmem:[%s3511_s5 + $0x38] sm:$0xff] %v1361_v24  }
 0x249   : > { %2625 = vst [vmem:[%s3511_s5 + $0x30] sm:$0xff] %v1360_v26   ;;  %2741 = vmatprep.mubr.bf16.mxu1 %v1360_v26 }
 0x24a   : > { %2742 = vmatmul.mubr.bf16.gmra.mxu1 %v1361_v24 }
 0x2f1   : > { %v2731_v28 = vpop.f32.mrf.mxu0 }
 0x2f2   : > { %v1613_v30 = vadd.f32 %v2731_v28, %v1436_v27 }
 0x2f3   : > { %v1548_v31 = vpop.f32.mrf.mxu0 }
 0x2f4   : > { %1629 = vst.msk [vmem:[#allocation3 + $0x10] sm:$0xff] %vm1136_vm2, %v1613_v30  ;;  %v1611_v33 = vadd.f32 %v1548_v31, %v1434_v29 }
 0x2f5   : > { %v2732_v35 = vpop.f32.mrf.mxu0 }
 0x2f6   : > { %1627 = vst.msk [vmem:[#allocation3] sm:$0xff] %vm1136_vm2, %v1611_v33  ;;  %v1614_v37 = vadd.f32 %v2732_v35, %v1437_v32 }
 0x2f7   : > { %v1551_v38 = vpop.f32.mrf.mxu0 }
 0x2f8   : > { %1630 = vst.msk [vmem:[#allocation3 + $0x18] sm:$0xff] %vm1136_vm2, %v1614_v37  ;;  %v1612_v40 = vadd.f32 %v1551_v38, %v1435_v36 }
 0x2f9   : > { %v2735_v41 = vpop.f32.mrf.mxu1 }
 0x2fa   : > { %1628 = vst.msk [vmem:[#allocation3 + $0x8] sm:$0xff] %vm1136_vm2, %v1612_v40  ;;  %v1617_v43 = vadd.f32 %v2735_v41, %v1440_v39 }
 0x2fb   : > { %v1564_v44 = vpop.f32.mrf.mxu1 }
 0x2fc   : > { %1633 = vst.msk [vmem:[#allocation3 + $0x30] sm:$0xff] %vm1136_vm2, %v1617_v43  ;;  %v1615_v46 = vadd.f32 %v1564_v44, %v1438_v42 }
 0x2fd   : > { %v2736_v47 = vpop.f32.mrf.mxu1 }
 0x2fe   : > { %1631 = vst.msk [vmem:[#allocation3 + $0x20] sm:$0xff] %vm1136_vm2, %v1615_v46  ;;  %v1618_v49 = vadd.f32 %v2736_v47, %v1441_v45 }
 0x2ff   : > { %v1567_v50 = vpop.f32.mrf.mxu1 }
 0x300   : > { %1634 = vst.msk [vmem:[#allocation3 + $0x38] sm:$0xff] %vm1136_vm2, %v1618_v49  ;;  %v1616_v51 = vadd.f32 %v1567_v50, %v1439_v48 }
 0x302   : > { %1632 = vst.msk [vmem:[#allocation3 + $0x28] sm:$0xff] %vm1136_vm2, %v1616_v51  ;;  %v2739_v53 = vpop.f32.mrf.mxu1 }
 0x303   : > { %v1621_v34 = vadd.f32 %v2739_v53, %v1444_v52 }
 0x304   : > { %v1580_v55 = vpop.f32.mrf.mxu1 }
 0x305   : > { %1637 = vst.msk [vmem:[#allocation3 + $0x50] sm:$0xff] %vm1136_vm2, %v1621_v34  ;;  %v1619_v57 = vadd.f32 %v1580_v55, %v1442_v54 }
 0x306   : > { %v2740_v58 = vpop.f32.mrf.mxu1 }
 0x307   : > { %1635 = vst.msk [vmem:[#allocation3 + $0x40] sm:$0xff] %vm1136_vm2, %v1619_v57  ;;  %v1622_v60 = vadd.f32 %v2740_v58, %v1445_v56 }
 0x308   : > { %v1583_v61 = vpop.f32.mrf.mxu1 }
 0x309   : > { %1638 = vst.msk [vmem:[#allocation3 + $0x58] sm:$0xff] %vm1136_vm2, %v1622_v60  ;;  %v1620_v63 = vadd.f32 %v1583_v61, %v1443_v59 }
 0x30a   : > { %v2743_v0 = vpop.f32.mrf.mxu1 }
 0x30b   : > { %1636 = vst.msk [vmem:[#allocation3 + $0x48] sm:$0xff] %vm1136_vm2, %v1620_v63  ;;  %v1625_v2 = vadd.f32 %v2743_v0, %v1448_v62 }
 0x30c   : > { %v1596_v3 = vpop.f32.mrf.mxu1 }
 0x30d   : > { %1641 = vst.msk [vmem:[#allocation3 + $0x70] sm:$0xff] %vm1136_vm2, %v1625_v2  ;;  %v1623_v5 = vadd.f32 %v1596_v3, %v1446_v1 }
 0x30e   : > { %v2744_v6 = vpop.f32.mrf.mxu1 }
 0x30f   : > { %1639 = vst.msk [vmem:[#allocation3 + $0x60] sm:$0xff] %vm1136_vm2, %v1623_v5  ;;  %v1626_v8 = vadd.f32 %v2744_v6, %v1449_v4  ;;  %1646 = sbr.rel (%p2473_p3) target bundleno = 1011 (0x3f3), region = 97 }
 0x310   : > { %v1599_v9 = vpop.f32.mrf.mxu1 }
 0x311   : > { %1642 = vst.msk [vmem:[#allocation3 + $0x78] sm:$0xff] %vm1136_vm2, %v1626_v8  ;;  %v1624_v10 = vadd.f32 %v1599_v9, %v1447_v7 }
 0x313   : > { %1640 = vst.msk [vmem:[#allocation3 + $0x68] sm:$0xff] %vm1136_vm2, %v1624_v10 }
 0x314   : > { %v3069_v11 = vld [vmem:[%s3972_s26 + $0x8] sm:$0xff]   ;;  %v3070_v12 = vld [vmem:[%s3972_s26] sm:$0xff]   ;;  %v1649_v19 = vld [vmem:[#allocation3 + $0x10] sm:$0xff]  ;;  %vm1911_vm3 = vcmask 519168  }
 0x315   : > { %2745 = vmatprep.subr.bf16.mxu0 %v3069_v11  ;;  %2785 = vmatprep.subr.bf16.mxu1 %v3069_v11  ;;  %v1647_v13 = vld [vmem:[#allocation3] sm:$0xff]  ;;  %v1648_v14 = vld [vmem:[#allocation3 + $0x8] sm:$0xff]  ;;  %v1650_v22 = vld [vmem:[#allocation3 + $0x18] sm:$0xff]  ;;  %v1665_v25 = vmul.f32 0.0069444445, %v1649_v19 }
 0x316   : > { %v1655_v16 = vld [vmem:[#allocation3 + $0x40] sm:$0xff]  ;;  %2746 = vmatpush3.bf16.msra.mxu0 %v3069_v11  ;;  %2787 = vmatpush3.bf16.msra.mxu1 %v3069_v11  ;;  %v1663_v15 = vmul.f32 0.0069444445, %v1647_v13  ;;  %v1664_v17 = vmul.f32 0.0069444445, %v1648_v14  ;;  %v1656_v18 = vld [vmem:[#allocation3 + $0x48] sm:$0xff] }
 0x317   : > { %2747 = vmatprep.subr.bf16.mxu0 %v3070_v12  ;;  %2786 = vmatprep.subr.bf16.mxu1 %v3070_v12  ;;  %v1671_v20 = vmul.f32 0.0069444445, %v1655_v16  ;;  %v1672_v21 = vmul.f32 0.0069444445, %v1656_v18  ;;  %v1657_v23 = vld [vmem:[#allocation3 + $0x50] sm:$0xff]  ;;  %v1658_v27 = vld [vmem:[#allocation3 + $0x58] sm:$0xff] }
 0x318   : > { %v1679_v24 = vpack.c.bf16 %v1664_v17, %v1663_v15  ;;  %v1666_v26 = vmul.f32 0.0069444445, %v1650_v22  ;;  %v1651_v28 = vld [vmem:[#allocation3 + $0x20] sm:$0xff]  ;;  %v1673_v30 = vmul.f32 0.0069444445, %v1657_v23  ;;  %v1652_v32 = vld [vmem:[#allocation3 + $0x28] sm:$0xff] }
 0x319   : > { %v1683_v29 = vpack.c.bf16 %v1672_v21, %v1671_v20  ;;  %v1674_v31 = vmul.f32 0.0069444445, %v1658_v27  ;;  %v1659_v33 = vld [vmem:[#allocation3 + $0x60] sm:$0xff]  ;;  %v1667_v36 = vmul.f32 0.0069444445, %v1651_v28  ;;  %v1653_v39 = vld [vmem:[#allocation3 + $0x30] sm:$0xff] }
 0x31a   : > { %2748 = vmatpush3.bf16.msra.mxu0 %v3070_v12  ;;  %2788 = vmatpush3.bf16.msra.mxu1 %v3070_v12  ;;  %v1680_v35 = vpack.c.bf16 %v1666_v26, %v1665_v25  ;;  %v1668_v37 = vmul.f32 0.0069444445, %v1652_v32  ;;  %v1660_v38 = vld [vmem:[#allocation3 + $0x68] sm:$0xff]  ;;  %v1675_v41 = vmul.f32 0.0069444445, %v1659_v33  ;;  %v1654_v43 = vld [vmem:[#allocation3 + $0x38] sm:$0xff] }
 0x31b   : > { %2749 = vmatprep.mubr.msk.bf16.mxu0 %vm1136_vm2, %v1679_v24  ;;  %2757 = vmatprep.mubr.msk.bf16.mxu1 %vm1136_vm2, %v1683_v29  ;;  %v1684_v40 = vpack.c.bf16 %v1674_v31, %v1673_v30  ;;  %v1676_v42 = vmul.f32 0.0069444445, %v1660_v38  ;;  %v1661_v44 = vld [vmem:[#allocation3 + $0x70] sm:$0xff]  ;;  %v1669_v46 = vmul.f32 0.0069444445, %v1653_v39  ;;  %v1662_v47 = vld [vmem:[#allocation3 + $0x78] sm:$0xff] }
 0x31c   : > { %v1681_v45 = vpack.c.bf16 %v1668_v37, %v1667_v36  ;;  %v1670_v49 = vmul.f32 0.0069444445, %v1654_v43  ;;  %v1677_v50 = vmul.f32 0.0069444445, %v1661_v44  ;;  %v1678_v51 = vmul.f32 0.0069444445, %v1662_v47 }
 0x31d   : > { %2750 = vmatmul.mubr.msk.bf16.vlgmr.msra.gmra.mxu0 %vm1136_vm2, %v1680_v35  ;;  %2758 = vmatmul.mubr.msk.bf16.vlgmr.msra.gmra.mxu1 %vm1136_vm2, %v1684_v40  ;;  %v1685_v48 = vpack.c.bf16 %v1676_v42, %v1675_v41  ;;  %v3676_v54 = vld [vmem:[%s3973_s19] ss:$0 sm:$0xff] }
 0x31e   : > { %2753 = vmatprep.mubr.msk.bf16.mxu0 %vm1136_vm2, %v1681_v45  ;;  %v1682_v52 = vpack.c.bf16 %v1670_v49, %v1669_v46  ;;  %v1686_v53 = vpack.c.bf16 %v1678_v51, %v1677_v50 }
 0x31f   : > { %2761 = vmatprep.mubr.msk.bf16.mxu1 %vm1136_vm2, %v1685_v48 }
 0x325   : > { %2754 = vmatmul.mubr.msk.bf16.gmra.mxu0 %vm1136_vm2, %v1682_v52  ;;  %2762 = vmatmul.mubr.msk.bf16.gmra.mxu1 %vm1136_vm2, %v1686_v53 }
 0x3dd   : > { %v2751_v34 = vpop.f32.mrf.mxu0  ;;  %v2759_v55 = vpop.f32.mrf.mxu1 }
 0x3de   : > { %v1777_v56 = vadd.f32 %v2751_v34, %v3676_v54  ;;  %v1809_v57 = vadd.f32 %v2759_v55, %v3676_v54 }
 0x3df   : > { %v1768_v58 = vpop.f32.mrf.mxu0  ;;  %v1800_v59 = vpop.f32.mrf.mxu1 }
 0x3e0   : > { %v1833_v60 = vmax.f32 %v1777_v56, 0.0  ;;  %v1841_v61 = vmax.f32 %v1809_v57, 0.0  ;;  %v1769_v62 = vadd.f32 %v3676_v54, %v1768_v58  ;;  %v1801_v63 = vadd.f32 %v3676_v54, %v1800_v59 }
 0x3e1   : > { %v2752_v0 = vpop.f32.mrf.mxu0  ;;  %v2760_v1 = vpop.f32.mrf.mxu1 }
 0x3e2   : > { %v2563_v2 = vpack.c.bf16 %v1833_v60, %v1833_v60  ;;  %v2571_v3 = vpack.c.bf16 %v1841_v61, %v1841_v61  ;;  %v1831_v4 = vmax.f32 %v1769_v62, 0.0  ;;  %v1839_v5 = vmax.f32 %v1801_v63, 0.0 }
 0x3e3   : > { %v1780_v6 = vadd.f32 %v2752_v0, %v3676_v54  ;;  %v1812_v7 = vadd.f32 %v2760_v1, %v3676_v54  ;;  %v1771_v8 = vpop.f32.mrf.mxu0  ;;  %v1803_v9 = vpop.f32.mrf.mxu1 }
 0x3e4   : > { %1914 = vst.msk [vmem:[%s3509_s29 + $0x8] sm:$0xf] %vm1911_vm3, %v2563_v2  ;;  %1922 = vst.msk [vmem:[%s3509_s29 + $0x28] sm:$0xf] %vm1911_vm3, %v2571_v3  ;;  %v2561_v10 = vpack.c.bf16 %v1831_v4, %v1831_v4  ;;  %v2569_v11 = vpack.c.bf16 %v1839_v5, %v1839_v5  ;;  %v1772_v12 = vadd.f32 %v3676_v54, %v1771_v8 }
 0x3e5   : > { %v1804_v13 = vadd.f32 %v3676_v54, %v1803_v9  ;;  %v1834_v14 = vmax.f32 %v1780_v6, 0.0  ;;  %v1842_v16 = vmax.f32 %v1812_v7, 0.0  ;;  %v2755_v15 = vpop.f32.mrf.mxu0  ;;  %v2763_v17 = vpop.f32.mrf.mxu1 }
 0x3e6   : > { %1912 = vst.msk [vmem:[%s3509_s29] sm:$0xf] %vm1911_vm3, %v2561_v10  ;;  %1920 = vst.msk [vmem:[%s3509_s29 + $0x20] sm:$0xf] %vm1911_vm3, %v2569_v11  ;;  %v1832_v18 = vmax.f32 %v1772_v12, 0.0  ;;  %v1793_v20 = vadd.f32 %v2755_v15, %v3676_v54  ;;  %v1825_v21 = vadd.f32 %v2763_v17, %v3676_v54 }
 0x3e7   : > { %v1840_v19 = vmax.f32 %v1804_v13, 0.0  ;;  %v2564_v22 = vpack.c.bf16 %v1834_v14, %v1834_v14  ;;  %v2572_v23 = vpack.c.bf16 %v1842_v16, %v1842_v16  ;;  %v1784_v24 = vpop.f32.mrf.mxu0  ;;  %v1816_v25 = vpop.f32.mrf.mxu1 }
 0x3e8   : > { %v2562_v26 = vpack.c.bf16 %v1832_v18, %v1832_v18  ;;  %v1837_v28 = vmax.f32 %v1793_v20, 0.0  ;;  %v1845_v29 = vmax.f32 %v1825_v21, 0.0  ;;  %v1785_v30 = vadd.f32 %v3676_v54, %v1784_v24 }
 0x3e9   : > { %v2570_v27 = vpack.c.bf16 %v1840_v19, %v1840_v19  ;;  %1915 = vst.msk [vmem:[%s3509_s29 + $0xc] sm:$0xf] %vm1911_vm3, %v2564_v22  ;;  %1923 = vst.msk [vmem:[%s3509_s29 + $0x2c] sm:$0xf] %vm1911_vm3, %v2572_v23  ;;  %v1817_v31 = vadd.f32 %v3676_v54, %v1816_v25  ;;  %v2756_v32 = vpop.f32.mrf.mxu0  ;;  %v2764_v33 = vpop.f32.mrf.mxu1 }
 0x3ea   : > { %1913 = vst.msk [vmem:[%s3509_s29 + $0x4] sm:$0xf] %vm1911_vm3, %v2562_v26  ;;  %v2567_v35 = vpack.c.bf16 %v1837_v28, %v1837_v28  ;;  %v2575_v36 = vpack.c.bf16 %v1845_v29, %v1845_v29  ;;  %v1796_v37 = vadd.f32 %v2756_v32, %v3676_v54  ;;  %v1828_v38 = vadd.f32 %v2764_v33, %v3676_v54 }
 0x3eb   : > { %1921 = vst.msk [vmem:[%s3509_s29 + $0x24] sm:$0xf] %vm1911_vm3, %v2570_v27  ;;  %v1835_v39 = vmax.f32 %v1785_v30, 0.0  ;;  %v1843_v40 = vmax.f32 %v1817_v31, 0.0  ;;  %v1787_v41 = vpop.f32.mrf.mxu0  ;;  %v1819_v42 = vpop.f32.mrf.mxu1 }
 0x3ec   : > { %1918 = vst.msk [vmem:[%s3509_s29 + $0x18] sm:$0xf] %vm1911_vm3, %v2567_v35  ;;  %1926 = vst.msk [vmem:[%s3509_s29 + $0x38] sm:$0xf] %vm1911_vm3, %v2575_v36  ;;  %v1838_v43 = vmax.f32 %v1796_v37, 0.0  ;;  %v1846_v44 = vmax.f32 %v1828_v38, 0.0  ;;  %v1788_v45 = vadd.f32 %v3676_v54, %v1787_v41  ;;  %v1820_v46 = vadd.f32 %v3676_v54, %v1819_v42 }
 0x3ed   : > { %v2565_v47 = vpack.c.bf16 %v1835_v39, %v1835_v39  ;;  %v2573_v48 = vpack.c.bf16 %v1843_v40, %v1843_v40 }
 0x3ee   : > { %v2568_v49 = vpack.c.bf16 %v1838_v43, %v1838_v43  ;;  %v2576_v50 = vpack.c.bf16 %v1846_v44, %v1846_v44  ;;  %v1836_v51 = vmax.f32 %v1788_v45, 0.0  ;;  %v1844_v52 = vmax.f32 %v1820_v46, 0.0 }
 0x3ef   : > { %1916 = vst.msk [vmem:[%s3509_s29 + $0x10] sm:$0xf] %vm1911_vm3, %v2565_v47  ;;  %1924 = vst.msk [vmem:[%s3509_s29 + $0x30] sm:$0xf] %vm1911_vm3, %v2573_v48 }
 0x3f0   : > { %1919 = vst.msk [vmem:[%s3509_s29 + $0x1c] sm:$0xf] %vm1911_vm3, %v2568_v49  ;;  %1927 = vst.msk [vmem:[%s3509_s29 + $0x3c] sm:$0xf] %vm1911_vm3, %v2576_v50  ;;  %v2566_v53 = vpack.c.bf16 %v1836_v51, %v1836_v51  ;;  %v2574_v34 = vpack.c.bf16 %v1844_v52, %v1844_v52 }
 0x3f2   : > { %1917 = vst.msk [vmem:[%s3509_s29 + $0x14] sm:$0xf] %vm1911_vm3, %v2566_v53  ;;  %1925 = vst.msk [vmem:[%s3509_s29 + $0x34] sm:$0xf] %vm1911_vm3, %v2574_v34 }
 0x3f3 PF: > { %s3974_s11 = sand.u32 1, %s3195_s28   ;;  %1939 = sbr.rel (!%p3437_p12) target bundleno = 1065 (0x429), region = 101 }
 0x3f4   : > { %s3728_s10 = scalar_lea.sflag [#allocation7], %s3974_s11  ;;  %s2503_s25 = sshll.u32 (%p3437_p12), %s3223_s13, 4 }
 0x3f5   : > { %s2789_s22 = smul.u32 (%p3437_p12), 18, %s3227_s14  ;;  %s1941_s9 = ssub.s32 (%p3437_p12), 18, %s2503_s25 }
 0x3f6   : > { %p1942_p5 = scmp.lt.s32.totalorder (%p3437_p12), %s1941_s9, 16  ;;  %s3975_s16 = sld [smem:[#allocation27_spill]] (%p3437_p12) }
 0x3f7   : > { %s1947_s7 = sadd.s32 (%p3437_p12), %s2789_s22, %s2503_s25 }
 0x3f8   : > { %s2506_s27 = sshll.u32 %s1947_s7, 2  ;;  %s4024_s9 = smov (!%p1942_p5, %s1941_s9), 16 }
 0x3f9   : > { %s2504_s20 = sshll.u32 %s4024_s9, 6 }
 0x3fa   : > { %p2507_p6 = scmp.eq.s32.totalorder %s2504_s20, 0 }
 0x3fb   : > { %s3743_s15 = sshrl.u32 (!%p2507_p6), %s4024_s9, 4 }
 0x3fc   : > { %s3739_s17 = scalar_lea.vmem %s3975_s16, %s2506_s27   ;;  %1952 = sbr.rel (%p2507_p6) target bundleno = 1065 (0x429), region = 105 }
 0x3fd   : > { %p2508_p12 = scmp.le.s32.totalorder (!%p2507_p6), %s3743_s15, 0 }
 0x401   : > { %2260 = sbr.rel (%p2508_p12) target bundleno = 1048 (0x418), region = 208  ;;  %s3976_s8 = smov (!%p2508_p12), %s3739_s17 }
 0x402   : > { %s3977_s24 = smov (!%p2508_p12), %s3509_s29  ;;  %s3752_s3 = smov (!%p2508_p12), 0  }
 0x403   : > { %s3754_s12 = smov (!%p2508_p12), 0  }
 0x406 LB: >> { %v1969_v54 = vld [vmem:[%s3251_s24] sm:$0xf]  ;;  %v1971_v55 = vld [vmem:[%s3251_s24 + $0x4] sm:$0xf]  ;;  %v1973_v56 = vld [vmem:[%s3251_s24 + $0x8] sm:$0xf]  ;;  %s3259_s12 = sphi %s3754_s12, %s1963_s12   ;;  %s3255_s3 = sphi %s3752_s3, %s3978_s3   ;;  %s3251_s24 = sphi %s3977_s24, %s2006_s24   ;;  %s3247_s8 = sphi %s3976_s8, %s2007_s8  }
 0x407   : >> { %1970 = vst [vmem:[%s3247_s8] sm:$0xf] %v1969_v54  ;;  %1972 = vst [vmem:[%s3247_s8 + $0x4] sm:$0xf] %v1971_v55  ;;  %v1975_v57 = vld [vmem:[%s3251_s24 + $0xc] sm:$0xf]  ;;  %s2001_s21 = sadd.s32 1, %s3255_s3 }
 0x408   : >> { %1974 = vst [vmem:[%s3247_s8 + $0x8] sm:$0xf] %v1973_v56  ;;  %v1977_v58 = vld [vmem:[%s3251_s24 + $0x10] sm:$0xf]  ;;  %v1979_v59 = vld [vmem:[%s3251_s24 + $0x14] sm:$0xf]  ;;  %p2002_p7 = scmp.ge.s32.totalorder %s2001_s21, %s3743_s15 }
 0x409   : >> { %1976 = vst [vmem:[%s3247_s8 + $0xc] sm:$0xf] %v1975_v57  ;;  %1978 = vst [vmem:[%s3247_s8 + $0x10] sm:$0xf] %v1977_v58  ;;  %v1981_v60 = vld [vmem:[%s3251_s24 + $0x18] sm:$0xf] }
 0x40a   : >> { %1980 = vst [vmem:[%s3247_s8 + $0x14] sm:$0xf] %v1979_v59  ;;  %v1983_v61 = vld [vmem:[%s3251_s24 + $0x1c] sm:$0xf]  ;;  %v1985_v62 = vld [vmem:[%s3251_s24 + $0x20] sm:$0xf] }
 0x40b   : >> { %1982 = vst [vmem:[%s3247_s8 + $0x18] sm:$0xf] %v1981_v60  ;;  %1984 = vst [vmem:[%s3247_s8 + $0x1c] sm:$0xf] %v1983_v61  ;;  %v1987_v63 = vld [vmem:[%s3251_s24 + $0x24] sm:$0xf] }
 0x40c   : >> { %1986 = vst [vmem:[%s3247_s8 + $0x20] sm:$0xf] %v1985_v62  ;;  %v1989_v0 = vld [vmem:[%s3251_s24 + $0x28] sm:$0xf]  ;;  %v1991_v1 = vld [vmem:[%s3251_s24 + $0x2c] sm:$0xf] }
 0x40d   : >> { %1988 = vst [vmem:[%s3247_s8 + $0x24] sm:$0xf] %v1987_v63  ;;  %1990 = vst [vmem:[%s3247_s8 + $0x28] sm:$0xf] %v1989_v0  ;;  %v1993_v2 = vld [vmem:[%s3251_s24 + $0x30] sm:$0xf] }
 0x40e   : >> { %1992 = vst [vmem:[%s3247_s8 + $0x2c] sm:$0xf] %v1991_v1  ;;  %v1995_v3 = vld [vmem:[%s3251_s24 + $0x34] sm:$0xf]  ;;  %v1997_v4 = vld [vmem:[%s3251_s24 + $0x38] sm:$0xf] }
 0x40f   : >> { %1994 = vst [vmem:[%s3247_s8 + $0x30] sm:$0xf] %v1993_v2  ;;  %1996 = vst [vmem:[%s3247_s8 + $0x34] sm:$0xf] %v1995_v3  ;;  %v1999_v5 = vld [vmem:[%s3251_s24 + $0x3c] sm:$0xf] }
 0x410   : >> { %1998 = vst [vmem:[%s3247_s8 + $0x38] sm:$0xf] %v1997_v4  ;;  %2000 = vst [vmem:[%s3247_s8 + $0x3c] sm:$0xf] %v1999_v5  ;;  %s4026_s21 = smov (%p2002_p7, %s2001_s21), 0  ;;  %s1963_s12 = sadd.s32 1, %s3259_s12  }
 0x411   : >> { %s2509_s19 = sshll.u32 %s4026_s21, 6  ;;  %p1962_p8 = scmp.ge.s32.totalorder %s1963_s12, %s3743_s15 }
 0x412   : >> { %s2006_s24 = scalar_lea.vmem %s3509_s29, %s2509_s19 [#allocation5]   ;;  %s2007_s8 = scalar_lea.vmem %s3739_s17, %s2509_s19  }
 0x413   : >> { %s3978_s3 = smov %s4026_s21  ;;  %1965 = sbr.rel (!%p1962_p8) target bundleno = 1030 (0x406), region = 214 }
 0x418 PF: > { %s3815_s11 = sand.u32 15, %s4024_s9   ;;  %s2577_s25 = sshll.u32 %s3743_s15, 6 }
 0x419   : > { %s2012_s22 = scalar_lea.vmem %s3509_s29, %s2577_s25 [#allocation5]   ;;  %s2014_s7 = scalar_lea.vmem %s3739_s17, %s2577_s25  }
 0x41a   : > { %p2514_p9 = scmp.le.s32.totalorder %s3815_s11, 0 }
 0x41b   : > { %s3261_s27 = smov (!%p2514_p9), %s2014_s7   ;;  %s3265_s18 = smov (!%p2514_p9), %s2012_s22  }
 0x41c   : > { %2274 = sbr.rel (%p2514_p9) target bundleno = 1065 (0x429), region = 219  ;;  %s3269_s23 = smov (!%p2514_p9), 0  }
 0x41d   : > { %s3273_s16 = smov (!%p2514_p9), 0  }
 0x421 LB: >> { %v2024_v6 = vld [vmem:[%s3267_s18] sm:$0xf]  ;;  %s2026_s9 = sadd.s32 1, %s3271_s23  ;;  %s2018_s16 = sadd.s32 1, %s3275_s16   ;;  %s3275_s16 = sphi %s3273_s16, %s2018_s16   ;;  %s3271_s23 = sphi %s3269_s23, %s3270_s23   ;;  %s3267_s18 = sphi %s3265_s18, %s2031_s18   ;;  %s3263_s27 = sphi %s3261_s27, %s2032_s27  }
 0x422   : >> { %2025 = vst [vmem:[%s3263_s27] sm:$0xf] %v2024_v6  ;;  %p2027_p10 = scmp.ge.s32.totalorder %s2026_s9, %s3815_s11  ;;  %p2017_p11 = scmp.ge.s32.totalorder %s2018_s16, %s3815_s11 }
 0x424   : >> { %s4028_s9 = smov (%p2027_p10, %s2026_s9), 0  ;;  %2020 = sbr.rel (!%p2017_p11) target bundleno = 1057 (0x421), region = 225 }
 0x425   : >> { %s2515_s29 = sshll.u32 %s4028_s9, 2  ;;  %s3270_s23 = smov %s4028_s9  }
 0x426   : >> { %s2031_s18 = scalar_lea.vmem %s2012_s22, %s2515_s29 [#allocation5]   ;;  %s2032_s27 = scalar_lea.vmem %s2014_s7, %s2515_s29  }
 0x429 PF: > { %2114 = sbr.rel (!%p3452_p1) target bundleno = 1102 (0x44e), region = 149  ;;  %s2520_s17 = sshll.u32 (%p3452_p1), %s3223_s13, 4 }
 0x42a   : > { %s2129_s20 = ssub.s32 (%p3452_p1), 18, %s2520_s17 }
 0x42b   : > { %p2130_p13 = scmp.lt.s32.totalorder (%p3452_p1), %s2129_s20, 16 }
 0x42e   : > { %s4030_s20 = smov (!%p2130_p13, %s2129_s20), 16 }
 0x42f   : > { %s3826_s15 = sshll.u32 %s4030_s20, 6 }
 0x430   : > { %s2134_s8 = ssub.s32 1024, %s3826_s15 }
 0x431   : > { %2135 = vsyncadd %s3728_s10, %s2134_s8  ;;  %p2522_p0 = scmp.ne.s32.totalorder %s3826_s15, 0  ;;  %s2579_s2 = sshll.u32 %s3223_s13, 5 }
 0x432   : > { %s2138_s24 = sadd.s32 %s2579_s2, %s4020_s30  ;;  %s2790_s3 = smul.u32 36, %s3227_s14 }
 0x433   : > { %s2144_s12 = sshll.u32 %s3511_s5, 4  ;;  %s3979_s22 = sld [smem:[#allocation28_spill]]  ;;  %s3835_s12 = int_to_ptr.vmem [resolvable:$true] %s2144_s12 }
 0x434   : > { %s2140_s21 = sadd.s32 %s2790_s3, %s2138_s24  ;;  %s3071_s27 = scalar_lea.vmem %s3835_s12, %s3826_s15 }
 0x435   : > { %s2524_s19 = sshll.u32 %s2140_s21, 6  ;;  %p3072_p1 = scmp.ne.s32.totalorder %s3835_s12, %s3071_s27 }
 0x436   : > { %s3278_s13 = smov [#allocation6]  }
 0x437   : > { %p3073_p2 = pnand %p3072_p1, %p2522_p0  ;;  %s3075_s14 = sshll.u32 %s3278_s13, 4  ;;  %s3076_s14 = int_to_ptr.vmem [resolvable:$false] %s3075_s14 }
 0x438   : > { %s3077_s5 = scalar_lea.vmem %s3076_s14, 2048  ;;  %p3078_p5 = scmp.lt.s32.totalorder %s3835_s12, %s3076_s14 }
 0x439   : > { %s3840_s7 = scalar_lea.hbm %s3979_s22, %s2524_s19  ;;  %p3074_p3 = pneg %p3073_p2 }
 0x43a   : > { %p3079_p6 = scmp.lt.s32.totalorder %s3077_s5, %s3071_s27 }
 0x43c   : > { %p3080_p12 = por %p3079_p6, %p3078_p5 }
 0x43e   : > { %p3081_p7 = pnand %p3080_p12, %p3074_p3 }
 0x440   : > { %3084 = shalt.err (!%p3081_p7)
}
 0x441   : > { %s3085_s30 = scalar_lea.hbm %s3840_s7, %s3826_s15  ;;  %s3089_s16 = scalar_lea.hbm %s3979_s22, 4608 }
 0x442   : > { %p3086_p8 = scmp.ne.s32.totalorder %s3840_s7, %s3085_s30  ;;  %p3090_p11 = scmp.lt.s32.totalorder %s3840_s7, %s3979_s22 }
 0x443   : > { %p3091_p13 = scmp.lt.s32.totalorder %s3089_s16, %s3085_s30 }
 0x444   : > { %p3087_p9 = pnand %p3086_p8, %p2522_p0 }
 0x445   : > { %p3092_p1 = por %p3091_p13, %p3090_p11 }
 0x446   : > { %p3088_p10 = pneg %p3087_p9 }
 0x448   : > { %p3093_p2 = pnand %p3092_p1, %p3088_p10 }
 0x44a   : > { %3096 = shalt.err (!%p3093_p2)
}
 0x44b   : > { %s3279_s17 = smov 64   ;;  %s3280_s20 = smov 128  }
 0x44c   : > { %s3281_s8 = smov 4  }
 0x44d   : > { %2150 = dma.vmem_to_hbm [thread:$0]  (%p2522_p0), %s3835_s12, %s3826_s15, %s3840_s7, %s3728_s10, %s3279_s17, %s3280_s20, %s3281_s8  }
 0x44e PF: > { %s3980_s2 = sld [smem:[#allocation16_spill]] }
 0x44f   : > { %s3981_s24 = sld [smem:[#allocation9_spill]] }
 0x454   : > { %p2796_p3 = scmp.ge.s32.totalorder %s3980_s2, 2 }
 0x455   : > { %s2166_s21 = sand.u32 1, %s3981_s24  }
 0x456   : > { %p2793_p5 = pnand %p2796_p3, %p3460_p4  ;;  %s2167_s19 = scalar_lea.sflag [#allocation7], %s2166_s21 }
 0x458   : > { %p2794_p6 = pneg %p2793_p5 }
 0x45a   : > { %3186 = dma.done.wait (%p2794_p6), %s2167_s19, 1024  }
 0x45b   : > { %3188 = vsyncadd (%p2794_p6), %s2167_s19, 4294966272  ;;  %s22_s18 = sadd.s32 1, %s3980_s2   ;;  %s3984_s10 = sld [smem:[#allocation10_spill]] }
 0x45c   : > { %p3871_p12 = scmp.ge.s32.totalorder %s22_s18, 10   ;;  %s3985_s29 = sld [smem:[#allocation22_spill]] }
 0x45d   : > { %s3986_s30 = sld [smem:[#allocation11_spill]]  ;;  %s3997_s27 = smov %s3195_s28 }
 0x45e   : > { %s3987_s9 = sld [smem:[#allocation20_spill]] }
 0x45f   : > { %s3988_s15 = sld [smem:[#allocation12_spill]] }
 0x460   : > { %s3989_s12 = sld [smem:[#allocation21_spill]] }
 0x461   : > { %s3990_s25 = sld [smem:[#allocation13_spill]]  ;;  %s3998_s28 = smov %s3984_s10 }
 0x462   : > { %s3991_s13 = sld [smem:[#allocation14_spill]] }
 0x463   : > { %s3992_s14 = sld [smem:[#allocation15_spill]] }
 0x464   : > { %s3993_s7 = sld [smem:[#allocation17_spill]] }
 0x465   : > { %s3994_s16 = sld [smem:[#allocation18_spill]]  ;;  %s3999_s10 = smov %s3988_s15 }
 0x466   : > { %s3995_s17 = sld [smem:[#allocation19_spill]]  ;;  %s4000_s11 = smov %s3989_s12 }
 0x467   : > { %s4001_s12 = smov %s3990_s25  ;;  %21 = sbr.rel (!%p3871_p12) target bundleno = 14 (0xe), region = 236 }
 0x46a   : > { %s4002_s15 = smov %s3993_s7 }
 0x46c   :  { %2172 = vsyncpa [#allocation7], 1 }
 0x46d   :  { %2174 = vsyncpa [#allocation7 + $0x1], 1 }

</bundles_post_ra>
